<compile_context>
chip_gen: v6e
topology: v6e:2x2x1
jax: 0.10.0
libtpu: 0.0.40
codegen_flags: <defaults>
</compile_context>

<pallas_src>
import functools

import numpy as np
import jax
import jax.numpy as jnp
from jax import lax
from jax.experimental import pallas as pl
from jax.experimental.pallas import tpu as pltpu


def _round_up(x, m):
    return ((x + m - 1) // m) * m


# ----------------------------------------------------------------------------
# Plain-JAX glue: AvgPool2d(3, 2, 1, count_include_pad=False), static divisor
# ----------------------------------------------------------------------------
def avg_pool_3x3_s2_p1(x):
    # x: (B, C, H, W) float32
    _, _, H, W = x.shape
    sums = lax.reduce_window(x, jnp.float32(0.0), lax.add,
                             (1, 1, 3, 3), (1, 1, 2, 2),
                             ((0, 0), (0, 0), (1, 1), (1, 1)))
    oh, ow = sums.shape[2], sums.shape[3]
    r = np.arange(oh) * 2
    c = np.arange(ow) * 2
    rc = np.minimum(r + 1, H - 1) - np.maximum(r - 1, 0) + 1
    cc = np.minimum(c + 1, W - 1) - np.maximum(c - 1, 0) + 1
    inv_cnt = (1.0 / (rc[:, None] * cc[None, :])).astype(np.float32)
    return sums * jnp.asarray(inv_cnt)[None, None]


# ----------------------------------------------------------------------------
# Fused kernel: per (batch, query tile)
#   q projection + mixture-of-softmax attention (prob-sum before PV matmul)
#   + single output GEMM (BN folded) + residual add
# ----------------------------------------------------------------------------
def _self_trans_kernel(x_ref, k_ref, v_ref, wq_ref, bq_ref, pi_ref,
                       wo_ref, bo_ref, o_ref, *, n_head, n_mix, d_k, d_v,
                       n2_valid, n2_pad):
    f32 = jnp.float32
    bf16 = jnp.bfloat16

    x = x_ref[0]                              # (C, TQ) f32 -- q path + residual
    x_b = x.astype(bf16)

    # q projection for this tile; inv_temp already folded into wq_ref/bq_ref.
    qt = jnp.dot(wq_ref[...], x_b, preferred_element_type=f32) + bq_ref[...]
    q_b = qt.astype(bf16)                     # (HK, TQ)

    k_b = k_ref[0]                            # (HK, N2p) bf16, precomputed
    v_b = v_ref[0]                            # (HV, N2p) bf16, precomputed
    pi = pi_ref[0]                            # (HM, 1) f32 mixture weights
    wo = wo_ref[...]                          # (C, HV) f32, BN pre-folded

    # Mask for padded key columns (compile-time constant shapes).
    if n2_pad > n2_valid:
        col = lax.broadcasted_iota(jnp.int32, (1, n2_pad), 1)
        neg_bias = jnp.where(col < n2_valid, 0.0, -1e30).astype(f32)
    else:
        neg_bias = None

    d = d_k // n_mix
    out_heads = []
    # TODO(synk): for large n_head*n_mix configs, switch to lax.fori_loop over
    # VMEM-staged slices to bound vreg live ranges.
    for h in range(n_head):
        a_sum = None
        for mi in range(n_mix):
            lo = h * d_k + mi * d
            qm = q_b[lo:lo + d, :]                                 # (d, TQ)
            km = k_b[lo:lo + d, :]                                 # (d, N2p)
            s = lax.dot_general(qm, km, (((0,), (0,)), ((), ())),
                                preferred_element_type=f32)        # (TQ, N2p)
            if neg_bias is not None:
                s = s + neg_bias
            m_ = jnp.max(s, axis=-1, keepdims=True)
            p = jnp.exp(s - m_)
            l = jnp.sum(p, axis=-1, keepdims=True)
            scale = pl.reciprocal(l, approx=True)                  # (TQ, 1)
            if n_mix > 1:
                idx = h * n_mix + mi
                scale = scale * pi[idx:idx + 1, 0:1]               # mixture weight
            # TODO(synk): attention dropout (p=0.1) is identity in eval mode.
            contrib = p * scale
            a_sum = contrib if a_sum is None else a_sum + contrib
        # One PV matmul per head on the summed probabilities.
        a_b = a_sum.astype(bf16)                                   # (TQ, N2p)
        v_h = v_b[h * d_v:(h + 1) * d_v, :]                        # (dv, N2p)
        out_heads.append(
            lax.dot_general(v_h, a_b, (((1,), (1,)), ((), ())),
                            preferred_element_type=f32))           # (dv, TQ)

    out_all = out_heads[0] if n_head == 1 else jnp.concatenate(out_heads, axis=0)
    z = jnp.dot(wo, out_all, preferred_element_type=f32)           # (C, TQ)
    o_ref[0] = z + bo_ref[...] + x            # BN bias + residual, f32


# ----------------------------------------------------------------------------
# Wrapper
# ----------------------------------------------------------------------------
def self_trans_forward(x, params, *, n_head, n_mix, d_k, d_v, pooling=True,
                       tq=256, eps=1e-5):
    assert d_k % n_mix == 0, "n_mix must divide d_k"
    B, C, H, W = x.shape
    N = H * W
    HK, HV, HM = n_head * d_k, n_head * d_v, n_head * n_mix
    f32, bf16 = jnp.float32, jnp.bfloat16

    x = x.astype(f32)
    xp = avg_pool_3x3_s2_p1(x) if pooling else x
    N2 = xp.shape[2] * xp.shape[3]

    x_flat = x.reshape(B, C, N)                    # f32: q path + residual
    xp_flat = xp.reshape(B, C, N2)                 # f32: k/v path (projected below)

    wq, bq = params["wq"], params["bq"]
    wv, bv = params["wv"], params["bv"]

    # Mixture weights pi: mean over N is linear, so compute exactly (f32) on
    # the host from mean(x) -- query tiling then needs no cross-tile reduce.
    if n_mix > 1:
        x_mean = jnp.mean(x_flat, axis=2)                               # (B, C)
        bar_qt = jnp.einsum("oc,bc->bo", wq, x_mean) + bq               # (B, H*dk)
        bar_qt = bar_qt.reshape(B, n_head, d_k)
        logits = jnp.einsum("md,bhd->bhm", params["mix_w"], bar_qt)     # (B, H, m)
        pi = jax.nn.softmax(logits, axis=-1).reshape(B, HM, 1).astype(f32)
    else:
        pi = jnp.ones((B, HM, 1), f32)

    # k/v projections hoisted out of the query-tile grid (per-batch, once).
    kt = jnp.einsum("oc,bcn->bon", wq, xp_flat) + bq[None, :, None]     # (B, HK, N2)
    vt = jnp.einsum("oc,bcn->bon", wv, xp_flat) + bv[None, :, None]     # (B, HV, N2)

    # Pad key/value spatial dim to a lane-dense multiple of 128 (masked in kernel).
    N2p = _round_up(N2, 128)
    if N2p > N2:
        kt = jnp.pad(kt, ((0, 0), (0, 0), (0, N2p - N2)))
        vt = jnp.pad(vt, ((0, 0), (0, 0), (0, N2p - N2)))
    k_b = kt.astype(bf16)
    v_b = vt.astype(bf16)
    # TODO(synk): for very large N2 on v7x, add a key-axis tile + online softmax
    # so VMEM footprint stays independent of N2.

    # Query-tile size: multiple of 128; pad N up to a multiple of TQ.
    TQ = min(int(tq), _round_up(N, 128))
    TQ = max(128, (TQ // 128) * 128)
    Np = _round_up(N, TQ)
    x_pad = jnp.pad(x_flat, ((0, 0), (0, 0), (0, Np - N))) if Np > N else x_flat

    # Fold 1/sqrt(d_k) into a q-only copy of the projection weights/bias.
    inv_temp = float(1.0 / np.power(d_k, 0.5))
    wq_q = (wq * inv_temp).astype(bf16)            # (HK, C)
    bq_q = (bq * inv_temp).reshape(HK, 1).astype(f32)

    # Fold eval-mode BatchNorm into the output conv: z = wo' @ y + bo'.
    bn_scale = params["bn_gamma"] * lax.rsqrt(params["bn_var"] + eps)   # (C, 1)
    wo_f = (bn_scale * params["wo"]).astype(f32)                        # (C, HV)
    bo = (params["bn_beta"] - bn_scale * params["bn_mean"]).astype(f32)  # (C, 1)

    grid = (B, Np // TQ)

    # VMEM limit: derive from hardware and keep headroom (v7x: 64 MiB total).
    try:
        vmem_cap = int(getattr(pltpu.get_tpu_info(), "vmem_capacity_bytes"))
    except Exception:
        vmem_cap = 64 * 1024 * 1024
    vmem_limit = int(min(vmem_cap - 16 * 1024 * 1024, 100 * 1024 * 1024))
    vmem_limit = max(vmem_limit, 32 * 1024 * 1024)

    out = pl.pallas_call(
        functools.partial(_self_trans_kernel, n_head=n_head, n_mix=n_mix,
                          d_k=d_k, d_v=d_v, n2_valid=N2, n2_pad=N2p),
        out_shape=jax.ShapeDtypeStruct((B, C, Np), f32),
        grid_spec=pltpu.PrefetchScalarGridSpec(
            num_scalar_prefetch=0,
            grid=grid,
            in_specs=[
                pl.BlockSpec((1, C, TQ), lambda b, nq: (b, 0, nq)),    # x tile (f32)
                pl.BlockSpec((1, HK, N2p), lambda b, nq: (b, 0, 0)),   # k (bf16, precomp)
                pl.BlockSpec((1, HV, N2p), lambda b, nq: (b, 0, 0)),   # v (bf16, precomp)
                pl.BlockSpec((HK, C), lambda b, nq: (0, 0)),           # wq * inv_temp
                pl.BlockSpec((HK, 1), lambda b, nq: (0, 0)),           # bq * inv_temp
                pl.BlockSpec((1, HM, 1), lambda b, nq: (b, 0, 0)),     # pi
                pl.BlockSpec((C, HV), lambda b, nq: (0, 0)),           # wo (BN folded)
                pl.BlockSpec((C, 1), lambda b, nq: (0, 0)),            # bo (BN folded)
            ],
            out_specs=pl.BlockSpec((1, C, TQ), lambda b, nq: (b, 0, nq)),
        ),
        compiler_params=pltpu.CompilerParams(
            dimension_semantics=("parallel", "parallel"),
            vmem_limit_bytes=vmem_limit),
    )(x_pad, k_b, v_b, wq_q, bq_q, pi, wo_f, bo)

    # TODO(synk): concat=True branch (channel concat with residual) not implemented.
    return out[:, :, :N].reshape(B, C, H, W)


# ----------------------------------------------------------------------------
# Pure-JAX reference (mirrors the PyTorch forward, eval mode, f32 HIGHEST)
# ----------------------------------------------------------------------------
def reference_forward(x, params, *, n_head, n_mix, d_k, d_v, pooling=True):
    hp = lax.Precision.HIGHEST
    B, C, H, W = x.shape
    N = H * W
    x = x.astype(jnp.float32)
    xp = avg_pool_3x3_s2_p1(x) if pooling else x
    N2 = xp.shape[2] * xp.shape[3]

    def conv1x1(inp, w, b):
        out = jnp.einsum("oc,bcn->bon", w, inp, precision=hp)
        return out if b is None else out + b[None, :, None]

    xf, xpf = x.reshape(B, C, N), xp.reshape(B, C, N2)
    qt = conv1x1(xf, params["wq"], params["bq"]).reshape(B * n_head, d_k, N)
    kt = conv1x1(xpf, params["wq"], params["bq"]).reshape(B * n_head, d_k, N2)
    vt = conv1x1(xpf, params["wv"], params["bv"]).reshape(B * n_head, d_v, N2)

    m, d = n_mix, d_k // n_mix
    temp = np.power(d_k, 0.5)
    if m > 1:
        bar_qt = jnp.mean(qt, axis=2, keepdims=True)
        pi = jax.nn.softmax(
            jnp.einsum("md,bdo->bmo", params["mix_w"], bar_qt, precision=hp), axis=1)
        pi = pi.reshape(B * n_head * m, 1, 1)
    q = qt.reshape(B * n_head * m, d, N).transpose(0, 2, 1)
    k = kt.reshape(B * n_head * m, d, N2)
    v = vt.transpose(0, 2, 1)
    attn = jnp.einsum("bnd,bdk->bnk", q, k, precision=hp) / temp
    attn = jax.nn.softmax(attn, axis=2)
    if m > 1:
        attn = (attn * pi).reshape(B * n_head, m, N, N2).sum(axis=1)
    output = jnp.einsum("bnk,bkd->bnd", attn, v, precision=hp)
    output = output.transpose(0, 2, 1).reshape(B, n_head * d_v, N)
    output = jnp.einsum("oc,bcn->bon", params["wo"], output, precision=hp)

    g = params["bn_gamma"][:, 0][None, :, None]
    bt = params["bn_beta"][:, 0][None, :, None]
    mu = params["bn_mean"][:, 0][None, :, None]
    var = params["bn_var"][:, 0][None, :, None]
    output = g * (output - mu) / jnp.sqrt(var + 1e-5) + bt
    return (output + xf).reshape(B, C, H, W)


# ----------------------------------------------------------------------------
if __name__ == "__main__":
    B, d_model, H, W = 2, 16, 16, 16
    n_head, n_mix, d_k, d_v = 2, 2, 16, 16

    key = jax.random.PRNGKey(0)
    ks = jax.random.split(key, 12)

    std_q = np.sqrt(2.0 / (d_model + d_k))
    std_v = np.sqrt(2.0 / (d_model + d_v))
    std_m = np.power(n_mix, -0.5)

    params = {
        "wq": jax.random.normal(ks[0], (n_head * d_k, d_model), jnp.float32) * std_q,
        "bq": jax.random.normal(ks[1], (n_head * d_k,), jnp.float32) * 0.02,
        "wv": jax.random.normal(ks[2], (n_head * d_v, d_model), jnp.float32) * std_v,
        "bv": jax.random.normal(ks[3], (n_head * d_v,), jnp.float32) * 0.02,
        "mix_w": jax.random.uniform(ks[4], (n_mix, d_k), jnp.float32, -std_m, std_m),
        "wo": jax.random.normal(ks[5], (d_model, n_head * d_v), jnp.float32)
              * np.sqrt(1.0 / (n_head * d_v)),
        "bn_gamma": jax.random.uniform(ks[6], (d_model, 1), jnp.float32, 0.5, 1.5),
        "bn_beta": jax.random.normal(ks[7], (d_model, 1), jnp.float32) * 0.1,
        "bn_mean": jax.random.normal(ks[8], (d_model, 1), jnp.float32) * 0.1,
        "bn_var": jax.random.uniform(ks[9], (d_model, 1), jnp.float32, 0.5, 1.5),
    }

    x = jax.random.normal(ks[10], (B, d_model, H, W), jnp.float32)  # NCHW

    out = self_trans_forward(x, params, n_head=n_head, n_mix=n_mix,
                             d_k=d_k, d_v=d_v, pooling=True, tq=256)
    out = jax.block_until_ready(out)

    ref = reference_forward(x, params, n_head=n_head, n_mix=n_mix,
                            d_k=d_k, d_v=d_v, pooling=True)
    ref = jax.block_until_ready(ref)

    # Tolerance reflects bf16 MXU inputs + approx reciprocal vs f32 HIGHEST reference.
    np.testing.assert_allclose(np.asarray(out), np.asarray(ref),
                               rtol=2e-2, atol=2e-2)
    print("KERNEL_OK")
</pallas_src>

<mosaic_0001>
module attributes {stable_mosaic.version = 11 : i64} {
  func.func @_self_trans_kernel(%arg0: i32, %arg1: i32, %arg2: memref<1x16x256xf32, #tpu.memory_space<vmem>>, %arg3: memref<1x32x128xbf16, #tpu.memory_space<vmem>>, %arg4: memref<1x32x128xbf16, #tpu.memory_space<vmem>>, %arg5: memref<32x16xbf16, #tpu.memory_space<vmem>>, %arg6: memref<32x1xf32, #tpu.memory_space<vmem>>, %arg7: memref<1x4x1xf32, #tpu.memory_space<vmem>>, %arg8: memref<16x32xf32, #tpu.memory_space<vmem>>, %arg9: memref<16x1xf32, #tpu.memory_space<vmem>>, %arg10: memref<1x16x256xf32, #tpu.memory_space<vmem>>) attributes {dimension_semantics = [#tpu.dimension_semantics<parallel>, #tpu.dimension_semantics<parallel>], iteration_bounds = array<i64: 2, 1>, scalar_prefetch = 0 : i64, scratch_operands = 0 : i64, tpu.core_type = #tpu.core_type<tc>, window_params = [{transform_indices = @transform_0, window_bounds = array<i64: 1, 16, 256>}, {transform_indices = @transform_1, window_bounds = array<i64: 1, 32, 128>}, {transform_indices = @transform_2, window_bounds = array<i64: 1, 32, 128>}, {pipeline_mode = #tpu.pipeline_mode<synchronous>, transform_indices = @transform_3, window_bounds = array<i64: 32, 16>}, {pipeline_mode = #tpu.pipeline_mode<synchronous>, transform_indices = @transform_4, window_bounds = array<i64: 32, 1>}, {transform_indices = @transform_5, window_bounds = array<i64: 1, 4, 1>}, {pipeline_mode = #tpu.pipeline_mode<synchronous>, transform_indices = @transform_6, window_bounds = array<i64: 16, 32>}, {pipeline_mode = #tpu.pipeline_mode<synchronous>, transform_indices = @transform_7, window_bounds = array<i64: 16, 1>}, {transform_indices = @transform_8, window_bounds = array<i64: 1, 16, 256>}]} {
    %c0 = arith.constant 0 : index
    %c0_0 = arith.constant 0 : index
    %c0_1 = arith.constant 0 : index
    %0 = vector.load %arg2[%c0, %c0_0, %c0_1] : memref<1x16x256xf32, #tpu.memory_space<vmem>>, vector<1x16x256xf32>
    %1 = vector.shape_cast %0 : vector<1x16x256xf32> to vector<16x256xf32>
    %2 = arith.truncf %1 : vector<16x256xf32> to vector<16x256xbf16>
    %c0_2 = arith.constant 0 : index
    %c0_3 = arith.constant 0 : index
    %3 = vector.load %arg5[%c0_2, %c0_3] : memref<32x16xbf16, #tpu.memory_space<vmem>>, vector<32x16xbf16>
    %cst = arith.constant dense<0.000000e+00> : vector<32x256xf32>
    %4 = tpu.matmul %3, %2, %cst {dimension_numbers = #tpu.dot_dimension_numbers<[1], [0], [0], [1], [0, 0, 1, 1], [], []>} : vector<32x16xbf16>, vector<16x256xbf16>, vector<32x256xf32> -> vector<32x256xf32>
    %c0_4 = arith.constant 0 : index
    %c0_5 = arith.constant 0 : index
    %5 = vector.load %arg6[%c0_4, %c0_5] : memref<32x1xf32, #tpu.memory_space<vmem>>, vector<32x1xf32>
    %6 = vector.broadcast %5 : vector<32x1xf32> to vector<32x256xf32>
    %7 = arith.addf %4, %6 : vector<32x256xf32>
    %8 = arith.truncf %7 : vector<32x256xf32> to vector<32x256xbf16>
    %c0_6 = arith.constant 0 : index
    %c0_7 = arith.constant 0 : index
    %c0_8 = arith.constant 0 : index
    %9 = vector.load %arg3[%c0_6, %c0_7, %c0_8] : memref<1x32x128xbf16, #tpu.memory_space<vmem>>, vector<1x32x128xbf16>
    %10 = vector.shape_cast %9 : vector<1x32x128xbf16> to vector<32x128xbf16>
    %c0_9 = arith.constant 0 : index
    %c0_10 = arith.constant 0 : index
    %c0_11 = arith.constant 0 : index
    %11 = vector.load %arg4[%c0_9, %c0_10, %c0_11] : memref<1x32x128xbf16, #tpu.memory_space<vmem>>, vector<1x32x128xbf16>
    %12 = vector.shape_cast %11 : vector<1x32x128xbf16> to vector<32x128xbf16>
    %c0_12 = arith.constant 0 : index
    %c0_13 = arith.constant 0 : index
    %c0_14 = arith.constant 0 : index
    %13 = vector.load %arg7[%c0_12, %c0_13, %c0_14] : memref<1x4x1xf32, #tpu.memory_space<vmem>>, vector<1x4x1xf32>
    %14 = vector.shape_cast %13 : vector<1x4x1xf32> to vector<4x1xf32>
    %c0_15 = arith.constant 0 : index
    %c0_16 = arith.constant 0 : index
    %15 = vector.load %arg8[%c0_15, %c0_16] : memref<16x32xf32, #tpu.memory_space<vmem>>, vector<16x32xf32>
    %16 = tpu.iota {dimensions = array<i32: 1>} : vector<1x128xi32>
    %c64_i32 = arith.constant 64 : i32
    %17 = vector.broadcast %c64_i32 : i32 to vector<1x128xi32>
    %18 = arith.cmpi slt, %16, %17 : vector<1x128xi32>
    %cst_17 = arith.constant 0.000000e+00 : f32
    %cst_18 = arith.constant -1.000000e+30 : f32
    %19 = vector.broadcast %cst_17 : f32 to vector<1x128xf32>
    %20 = vector.broadcast %cst_18 : f32 to vector<1x128xf32>
    %21 = arith.select %18, %19, %20 : vector<1x128xi1>, vector<1x128xf32>
    %22 = vector.extract_strided_slice %8 {offsets = [0, 0], sizes = [8, 256], strides = [1, 1]} : vector<32x256xbf16> to vector<8x256xbf16>
    %23 = vector.extract_strided_slice %10 {offsets = [0, 0], sizes = [8, 128], strides = [1, 1]} : vector<32x128xbf16> to vector<8x128xbf16>
    %cst_19 = arith.constant dense<0.000000e+00> : vector<256x128xf32>
    %24 = tpu.matmul %22, %23, %cst_19 {dimension_numbers = #tpu.dot_dimension_numbers<[0], [0], [1], [1], [0, 1, 1, 1], [], []>} : vector<8x256xbf16>, vector<8x128xbf16>, vector<256x128xf32> -> vector<256x128xf32>
    %25 = vector.broadcast %21 : vector<1x128xf32> to vector<256x128xf32>
    %26 = arith.addf %24, %25 : vector<256x128xf32>
    %cst_20 = arith.constant dense<0xFF800000> : vector<256xf32>
    %27 = vector.multi_reduction <maximumf>, %26, %cst_20 [1] : vector<256x128xf32> to vector<256xf32>
    %28 = vector.shape_cast %27 : vector<256xf32> to vector<256x1xf32>
    %29 = vector.broadcast %28 : vector<256x1xf32> to vector<256x128xf32>
    %30 = arith.subf %26, %29 : vector<256x128xf32>
    %31 = math.exp %30 : vector<256x128xf32>
    %cst_21 = arith.constant dense<0.000000e+00> : vector<256xf32>
    %32 = vector.multi_reduction <add>, %31, %cst_21 [1] : vector<256x128xf32> to vector<256xf32>
    %33 = vector.shape_cast %32 : vector<256xf32> to vector<256x1xf32>
    %34 = tpu.reciprocal %33 {approx = true} : vector<256x1xf32> -> vector<256x1xf32>
    %35 = vector.extract_strided_slice %14 {offsets = [0, 0], sizes = [1, 1], strides = [1, 1]} : vector<4x1xf32> to vector<1x1xf32>
    %36 = vector.broadcast %35 : vector<1x1xf32> to vector<256x1xf32>
    %37 = arith.mulf %34, %36 : vector<256x1xf32>
    %38 = vector.broadcast %37 : vector<256x1xf32> to vector<256x128xf32>
    %39 = arith.mulf %31, %38 : vector<256x128xf32>
    %40 = vector.extract_strided_slice %8 {offsets = [8, 0], sizes = [8, 256], strides = [1, 1]} : vector<32x256xbf16> to vector<8x256xbf16>
    %41 = vector.extract_strided_slice %10 {offsets = [8, 0], sizes = [8, 128], strides = [1, 1]} : vector<32x128xbf16> to vector<8x128xbf16>
    %cst_22 = arith.constant dense<0.000000e+00> : vector<256x128xf32>
    %42 = tpu.matmul %40, %41, %cst_22 {dimension_numbers = #tpu.dot_dimension_numbers<[0], [0], [1], [1], [0, 1, 1, 1], [], []>} : vector<8x256xbf16>, vector<8x128xbf16>, vector<256x128xf32> -> vector<256x128xf32>
    %43 = vector.broadcast %21 : vector<1x128xf32> to vector<256x128xf32>
    %44 = arith.addf %42, %43 : vector<256x128xf32>
    %cst_23 = arith.constant dense<0xFF800000> : vector<256xf32>
    %45 = vector.multi_reduction <maximumf>, %44, %cst_23 [1] : vector<256x128xf32> to vector<256xf32>
    %46 = vector.shape_cast %45 : vector<256xf32> to vector<256x1xf32>
    %47 = vector.broadcast %46 : vector<256x1xf32> to vector<256x128xf32>
    %48 = arith.subf %44, %47 : vector<256x128xf32>
    %49 = math.exp %48 : vector<256x128xf32>
    %cst_24 = arith.constant dense<0.000000e+00> : vector<256xf32>
    %50 = vector.multi_reduction <add>, %49, %cst_24 [1] : vector<256x128xf32> to vector<256xf32>
    %51 = vector.shape_cast %50 : vector<256xf32> to vector<256x1xf32>
    %52 = tpu.reciprocal %51 {approx = true} : vector<256x1xf32> -> vector<256x1xf32>
    %53 = vector.extract_strided_slice %14 {offsets = [1, 0], sizes = [1, 1], strides = [1, 1]} : vector<4x1xf32> to vector<1x1xf32>
    %54 = vector.broadcast %53 : vector<1x1xf32> to vector<256x1xf32>
    %55 = arith.mulf %52, %54 : vector<256x1xf32>
    %56 = vector.broadcast %55 : vector<256x1xf32> to vector<256x128xf32>
    %57 = arith.mulf %49, %56 : vector<256x128xf32>
    %58 = arith.addf %39, %57 : vector<256x128xf32>
    %59 = arith.truncf %58 : vector<256x128xf32> to vector<256x128xbf16>
    %60 = vector.extract_strided_slice %12 {offsets = [0, 0], sizes = [16, 128], strides = [1, 1]} : vector<32x128xbf16> to vector<16x128xbf16>
    %cst_25 = arith.constant dense<0.000000e+00> : vector<16x256xf32>
    %61 = tpu.matmul %60, %59, %cst_25 {dimension_numbers = #tpu.dot_dimension_numbers<[1], [1], [0], [0], [0, 0, 1, 0], [], []>} : vector<16x128xbf16>, vector<256x128xbf16>, vector<16x256xf32> -> vector<16x256xf32>
    %62 = vector.extract_strided_slice %8 {offsets = [16, 0], sizes = [8, 256], strides = [1, 1]} : vector<32x256xbf16> to vector<8x256xbf16>
    %63 = vector.extract_strided_slice %10 {offsets = [16, 0], sizes = [8, 128], strides = [1, 1]} : vector<32x128xbf16> to vector<8x128xbf16>
    %cst_26 = arith.constant dense<0.000000e+00> : vector<256x128xf32>
    %64 = tpu.matmul %62, %63, %cst_26 {dimension_numbers = #tpu.dot_dimension_numbers<[0], [0], [1], [1], [0, 1, 1, 1], [], []>} : vector<8x256xbf16>, vector<8x128xbf16>, vector<256x128xf32> -> vector<256x128xf32>
    %65 = vector.broadcast %21 : vector<1x128xf32> to vector<256x128xf32>
    %66 = arith.addf %64, %65 : vector<256x128xf32>
    %cst_27 = arith.constant dense<0xFF800000> : vector<256xf32>
    %67 = vector.multi_reduction <maximumf>, %66, %cst_27 [1] : vector<256x128xf32> to vector<256xf32>
    %68 = vector.shape_cast %67 : vector<256xf32> to vector<256x1xf32>
    %69 = vector.broadcast %68 : vector<256x1xf32> to vector<256x128xf32>
    %70 = arith.subf %66, %69 : vector<256x128xf32>
    %71 = math.exp %70 : vector<256x128xf32>
    %cst_28 = arith.constant dense<0.000000e+00> : vector<256xf32>
    %72 = vector.multi_reduction <add>, %71, %cst_28 [1] : vector<256x128xf32> to vector<256xf32>
    %73 = vector.shape_cast %72 : vector<256xf32> to vector<256x1xf32>
    %74 = tpu.reciprocal %73 {approx = true} : vector<256x1xf32> -> vector<256x1xf32>
    %75 = vector.extract_strided_slice %14 {offsets = [2, 0], sizes = [1, 1], strides = [1, 1]} : vector<4x1xf32> to vector<1x1xf32>
    %76 = vector.broadcast %75 : vector<1x1xf32> to vector<256x1xf32>
    %77 = arith.mulf %74, %76 : vector<256x1xf32>
    %78 = vector.broadcast %77 : vector<256x1xf32> to vector<256x128xf32>
    %79 = arith.mulf %71, %78 : vector<256x128xf32>
    %80 = vector.extract_strided_slice %8 {offsets = [24, 0], sizes = [8, 256], strides = [1, 1]} : vector<32x256xbf16> to vector<8x256xbf16>
    %81 = vector.extract_strided_slice %10 {offsets = [24, 0], sizes = [8, 128], strides = [1, 1]} : vector<32x128xbf16> to vector<8x128xbf16>
    %cst_29 = arith.constant dense<0.000000e+00> : vector<256x128xf32>
    %82 = tpu.matmul %80, %81, %cst_29 {dimension_numbers = #tpu.dot_dimension_numbers<[0], [0], [1], [1], [0, 1, 1, 1], [], []>} : vector<8x256xbf16>, vector<8x128xbf16>, vector<256x128xf32> -> vector<256x128xf32>
    %83 = vector.broadcast %21 : vector<1x128xf32> to vector<256x128xf32>
    %84 = arith.addf %82, %83 : vector<256x128xf32>
    %cst_30 = arith.constant dense<0xFF800000> : vector<256xf32>
    %85 = vector.multi_reduction <maximumf>, %84, %cst_30 [1] : vector<256x128xf32> to vector<256xf32>
    %86 = vector.shape_cast %85 : vector<256xf32> to vector<256x1xf32>
    %87 = vector.broadcast %86 : vector<256x1xf32> to vector<256x128xf32>
    %88 = arith.subf %84, %87 : vector<256x128xf32>
    %89 = math.exp %88 : vector<256x128xf32>
    %cst_31 = arith.constant dense<0.000000e+00> : vector<256xf32>
    %90 = vector.multi_reduction <add>, %89, %cst_31 [1] : vector<256x128xf32> to vector<256xf32>
    %91 = vector.shape_cast %90 : vector<256xf32> to vector<256x1xf32>
    %92 = tpu.reciprocal %91 {approx = true} : vector<256x1xf32> -> vector<256x1xf32>
    %93 = vector.extract_strided_slice %14 {offsets = [3, 0], sizes = [1, 1], strides = [1, 1]} : vector<4x1xf32> to vector<1x1xf32>
    %94 = vector.broadcast %93 : vector<1x1xf32> to vector<256x1xf32>
    %95 = arith.mulf %92, %94 : vector<256x1xf32>
    %96 = vector.broadcast %95 : vector<256x1xf32> to vector<256x128xf32>
    %97 = arith.mulf %89, %96 : vector<256x128xf32>
    %98 = arith.addf %79, %97 : vector<256x128xf32>
    %99 = arith.truncf %98 : vector<256x128xf32> to vector<256x128xbf16>
    %100 = vector.extract_strided_slice %12 {offsets = [16, 0], sizes = [16, 128], strides = [1, 1]} : vector<32x128xbf16> to vector<16x128xbf16>
    %cst_32 = arith.constant dense<0.000000e+00> : vector<16x256xf32>
    %101 = tpu.matmul %100, %99, %cst_32 {dimension_numbers = #tpu.dot_dimension_numbers<[1], [1], [0], [0], [0, 0, 1, 0], [], []>} : vector<16x128xbf16>, vector<256x128xbf16>, vector<16x256xf32> -> vector<16x256xf32>
    %102 = tpu.concatenate %61, %101 in 0 : vector<16x256xf32>, vector<16x256xf32> -> vector<32x256xf32>
    %cst_33 = arith.constant dense<0.000000e+00> : vector<16x256xf32>
    %103 = tpu.matmul %15, %102, %cst_33 {dimension_numbers = #tpu.dot_dimension_numbers<[1], [0], [0], [1], [0, 0, 1, 1], [], []>} : vector<16x32xf32>, vector<32x256xf32>, vector<16x256xf32> -> vector<16x256xf32>
    %c0_34 = arith.constant 0 : index
    %c0_35 = arith.constant 0 : index
    %104 = vector.load %arg9[%c0_34, %c0_35] : memref<16x1xf32, #tpu.memory_space<vmem>>, vector<16x1xf32>
    %105 = vector.broadcast %104 : vector<16x1xf32> to vector<16x256xf32>
    %106 = arith.addf %103, %105 : vector<16x256xf32>
    %107 = arith.addf %106, %1 : vector<16x256xf32>
    %c0_36 = arith.constant 0 : index
    %c0_37 = arith.constant 0 : index
    %c0_38 = arith.constant 0 : index
    %108 = vector.load %arg10[%c0_36, %c0_37, %c0_38] : memref<1x16x256xf32, #tpu.memory_space<vmem>>, vector<1x16x256xf32>
    %109 = vector.shape_cast %108 : vector<1x16x256xf32> to vector<16x256xf32>
    %110 = vector.shape_cast %107 : vector<16x256xf32> to vector<1x16x256xf32>
    tpu.vector_store %arg10[%c0_36, %c0_37, %c0_38], %110 {strides = array<i32>} : memref<1x16x256xf32, #tpu.memory_space<vmem>>, vector<1x16x256xf32>,
    return
  }
  func.func @transform_0(%arg0: i32, %arg1: i32) -> (i32, i32, i32) {
    %c0_i32 = arith.constant 0 : i32
    %c0_i32_0 = arith.constant 0 : i32
    return %arg0, %c0_i32, %arg1 : i32, i32, i32
  }
  func.func @transform_1(%arg0: i32, %arg1: i32) -> (i32, i32, i32) {
    %c0_i32 = arith.constant 0 : i32
    %c0_i32_0 = arith.constant 0 : i32
    %c0_i32_1 = arith.constant 0 : i32
    return %arg0, %c0_i32, %c0_i32_0 : i32, i32, i32
  }
  func.func @transform_2(%arg0: i32, %arg1: i32) -> (i32, i32, i32) {
    %c0_i32 = arith.constant 0 : i32
    %c0_i32_0 = arith.constant 0 : i32
    %c0_i32_1 = arith.constant 0 : i32
    return %arg0, %c0_i32, %c0_i32_0 : i32, i32, i32
  }
  func.func @transform_3(%arg0: i32, %arg1: i32) -> (i32, i32) {
    %c0_i32 = arith.constant 0 : i32
    %c0_i32_0 = arith.constant 0 : i32
    %c0_i32_1 = arith.constant 0 : i32
    return %c0_i32, %c0_i32_0 : i32, i32
  }
  func.func @transform_4(%arg0: i32, %arg1: i32) -> (i32, i32) {
    %c0_i32 = arith.constant 0 : i32
    %c0_i32_0 = arith.constant 0 : i32
    %c0_i32_1 = arith.constant 0 : i32
    return %c0_i32, %c0_i32_0 : i32, i32
  }
  func.func @transform_5(%arg0: i32, %arg1: i32) -> (i32, i32, i32) {
    %c0_i32 = arith.constant 0 : i32
    %c0_i32_0 = arith.constant 0 : i32
    %c0_i32_1 = arith.constant 0 : i32
    return %arg0, %c0_i32, %c0_i32_0 : i32, i32, i32
  }
  func.func @transform_6(%arg0: i32, %arg1: i32) -> (i32, i32) {
    %c0_i32 = arith.constant 0 : i32
    %c0_i32_0 = arith.constant 0 : i32
    %c0_i32_1 = arith.constant 0 : i32
    return %c0_i32, %c0_i32_0 : i32, i32
  }
  func.func @transform_7(%arg0: i32, %arg1: i32) -> (i32, i32) {
    %c0_i32 = arith.constant 0 : i32
    %c0_i32_0 = arith.constant 0 : i32
    %c0_i32_1 = arith.constant 0 : i32
    return %c0_i32, %c0_i32_0 : i32, i32
  }
  func.func @transform_8(%arg0: i32, %arg1: i32) -> (i32, i32, i32) {
    %c0_i32 = arith.constant 0 : i32
    %c0_i32_0 = arith.constant 0 : i32
    return %arg0, %c0_i32, %arg1 : i32, i32, i32
  }
}

</mosaic_0001>

<bundles_post_ra>
// kernel: tpu_custom_call.1
= control target key start
LH: loop header
LB: loop body
LE: loop exit
PB: predicated region body
PF: predicated region fallthrough
CT: control target
= control target key end

     0   :  { %s7185_s0 = inlined_call_operand.vmem [shape: f32[2,16,256], index: 0, kind: input, shape index: {}]   ;;  %s7186_s1 = inlined_call_operand.hbm [shape: bf16[2,32,128], index: 1, kind: input, shape index: {}]   ;;  %s7187_s2 = inlined_call_operand.hbm [shape: bf16[2,32,128], index: 2, kind: input, shape index: {}]   ;;  %s7188_s3 = inlined_call_operand.vmem [shape: bf16[32,16], index: 3, kind: input, shape index: {}]   ;;  %s7189_s4 = inlined_call_operand.vmem [shape: f32[32,1], index: 4, kind: input, shape index: {}]   ;;  %s7190_s5 = inlined_call_operand.vmem [shape: f32[2,4,1], index: 5, kind: input, shape index: {}]   ;;  %s7191_s6 = inlined_call_operand.vmem [shape: f32[16,32], index: 6, kind: input, shape index: {}]   ;;  %s7192_s7 = inlined_call_operand.vmem [shape: f32[16,1], index: 7, kind: input, shape index: {}]   ;;  %s7193_s8 = inlined_call_operand.hbm [shape: f32[2,16,256], index: 8, kind: output, shape index: {}]  }
   0x1   :  { %7296 = sst [smem:[#allocation85_spill]] %s7186_s1 }
   0x2   :  { %13 = vsyncpa [#allocation3], 0 }
   0x3   :  { %15 = vsyncpa [#allocation3 + $0x1], 0 }
   0x4   :  { %16 = vsyncpa [#allocation6], 0 }
   0x5   :  { %18 = vsyncpa [#allocation6 + $0x1], 0 }
   0x6   :  { %19 = vsyncpa [#allocation4], 0 }
   0x7   :  { %21 = vsyncpa [#allocation4 + $0x1], 0  ;;  %s5077_s27 = smov 0   ;;  %s5079_s28 = smov 0  }
   0x8   :  { %s5081_s29 = smov 0   ;;  %s5083_s30 = smov 0  }
   0x9   :  { %s5085_s9 = smov 0   ;;  %s5087_s10 = smov 0  }
   0xa LB: > { %7297 = sst [smem:[#allocation11_spill]] %s5000_s27  ;;  %s3933_s11 = sadd.s32 4294967295, %s5020_s10   ;;  %s5020_s10 = sphi %s5087_s10, %s27_s10   ;;  %s5016_s9 = sphi %s5085_s9, %s7604_s9   ;;  %s5012_s30 = sphi %s5083_s30, %s7603_s30   ;;  %s5008_s29 = sphi %s5081_s29, %s7599_s29   ;;  %s5004_s28 = sphi %s5079_s28, %s7602_s28   ;;  %s5000_s27 = sphi %s5077_s27, %s7601_s27  }
   0xb   : > { %7298 = sst [smem:[#allocation12_spill]] %s5008_s29  ;;  %s3934_s12 = sadd.s32 4294967294, %s5020_s10  }
   0xc   : > { %s39_s13 = sadd.s32 1, %s5016_s9  ;;  %s74_s14 = sadd.s32 1, %s5008_s29 }
   0xd   : > { %p41_p0 = scmp.ge.s32.totalorder %s39_s13, 2  ;;  %p81_p1 = scmp.ne.s32.totalorder %s5008_s29, %s5004_s28 }
   0xe   : > { %p82_p2 = scmp.eq.s32.totalorder %s5020_s10, 0  ;;  %p87_p3 = scmp.ne.s32.totalorder %s5004_s28, %s5000_s27 }
   0xf   : > { %s7606_s13 = smov (%p41_p0, %s39_s13), 0  ;;  %p88_p5 = scmp.eq.s32.totalorder %s3933_s11, 0 }
  0x10   : > { %7299 = sst [smem:[#allocation13_spill]] %s7606_s13  ;;  %p5118_p4 = por %p82_p2, %p81_p1 }
  0x11   : > { %s71_s16 = ssub.s32 %s5016_s9, %s7606_s13  ;;  %p249_p6 = scmp.eq.s32.totalorder %s3933_s11, 1 }
  0x12   : > { %p72_p7 = scmp.eq.s32.totalorder %s71_s16, 0  ;;  %p5124_p8 = por %p88_p5, %p87_p3 }
  0x13   : > { %p5128_p9 = por %p249_p6, %p81_p1  ;;  %p255_p10 = scmp.eq.s32.totalorder %s3934_s12, 1 }
  0x14   : > { %s5133_s19 = scalar_select %p72_p7, %s5008_s29, %s74_s14  }
  0x15   : > { %p5135_p11 = por %p255_p10, %p87_p3  ;;  %p3936_p12 = scmp.ge.s32.totalorder %s5020_s10, 2 }
  0x16   : > { %7303 = sst [smem:[#allocation14_spill]] %s5133_s19  ;;  %p4300_p13 = scmp.lt.s32.totalorder %s5020_s10, 2 }
  0x17   : > { %s7304_s20 = scalar_select %p5135_p11, 1, 0 }
  0x18   : > { %s5142_s21 = sand.u32 1, %s5008_s29   ;;  %s4027_s23 = sshll.u32 %s5016_s9, 8 }
  0x19   : > { %7305 = sst [smem:[#allocation15_spill]] %s7304_s20  ;;  %s7195_s22 = sshll.u32 %s5142_s21, 4 }
  0x1a   : > { %s7306_s1 = sld [smem:[#allocation85_spill]]  ;;  %s304_s11 = scalar_lea.vmem [#allocation2], %s7195_s22 }
  0x1b   : > { %s311_s12 = sshll.u32 %s304_s11, 4  ;;  %p5155_p0 = pnand %p4300_p13, %p5118_p4  ;;  %s312_s12 = int_to_ptr.vmem [resolvable:$true] %s311_s12 }
  0x1c   : > { %p3943_p1 = scmp.ge.s32.totalorder %s5020_s10, 1  ;;  %s301_s16 = scalar_lea.sflag [#allocation3], %s5142_s21 }
  0x1d   : > { %p4882_p2 = pneg %p5155_p0  ;;  %s4893_s13 = scalar_lea.vmem %s312_s12, 256 }
  0x1e   : > { %p4894_p3 = scmp.ne.s32.totalorder %s312_s12, %s4893_s13  ;;  %s5022_s24 = smov [#allocation2]  }
  0x1f   : > { %s4898_s25 = sshll.u32 %s5022_s24, 4  ;;  %s4899_s25 = int_to_ptr.vmem [resolvable:$false] %s4898_s25 }
  0x20   : > { %s310_s26 = scalar_lea.hbm %s7306_s1, %s4027_s23  ;;  %p4896_p5 = pnand %p4894_p3, %p4882_p2 }
  0x21   : > { %s4900_s15 = scalar_lea.vmem %s4899_s25, 512  ;;  %p4901_p4 = scmp.lt.s32.totalorder %s312_s12, %s4899_s25 }
  0x22   : > { %p4897_p6 = pneg %p4896_p5  ;;  %p4902_p7 = scmp.lt.s32.totalorder %s4900_s15, %s4893_s13 }
  0x24   : > { %p4903_p10 = por %p4902_p7, %p4901_p4 }
  0x26   : > { %p4904_p13 = pnand %p4903_p10, %p4897_p6 }
  0x28   : > { %4907 = shalt.err (!%p4904_p13)
}
  0x29   : > { %s5023_s11 = smov 64   ;;  %s5024_s22 = smov 4  }
  0x2a   : > { %4292 = dma.hbm_to_vmem [thread:$0]  (!%p5155_p0), %s310_s26, 256, %s312_s12, %s301_s16, %s5023_s11, %s5023_s11, %s5024_s22  }
  0x2b   : > { %p347_p3 = scmp.lt.s32.totalorder %s5020_s10, 3  ;;  %s331_s13 = scalar_lea.hbm %s7187_s2, %s4027_s23 }
  0x2c   : > { %s7309_s15 = sshll.u32 %s5142_s21, 4  ;;  %s322_s20 = scalar_lea.sflag [#allocation6], %s5142_s21 }
  0x2d   : > { %p5176_p5 = pnand %p3943_p1, %p347_p3  ;;  %s325_s19 = scalar_lea.vmem [#allocation5], %s7309_s15 }
  0x2e   : > { %s332_s29 = sshll.u32 %s325_s19, 4  ;;  %s5025_s26 = smov [#allocation5]   ;;  %s333_s29 = int_to_ptr.vmem [resolvable:$true] %s332_s29 }
  0x2f   : > { %s4921_s27 = scalar_lea.vmem %s333_s29, 256  ;;  %s4926_s12 = sshll.u32 %s5025_s26, 4  ;;  %s4927_s12 = int_to_ptr.vmem [resolvable:$false] %s4926_s12 }
  0x30   : > { %p4922_p6 = scmp.ne.s32.totalorder %s333_s29, %s4921_s27  ;;  %s4928_s1 = scalar_lea.vmem %s4927_s12, 512 }
  0x31   : > { %p4929_p10 = scmp.lt.s32.totalorder %s333_s29, %s4927_s12  ;;  %p4930_p1 = scmp.lt.s32.totalorder %s4928_s1, %s4921_s27 }
  0x32   : > { %p4924_p4 = pnand %p4922_p6, %p4882_p2 }
  0x33   : > { %p4931_p13 = por %p4930_p1, %p4929_p10 }
  0x34   : > { %p4925_p7 = pneg %p4924_p4 }
  0x36   : > { %p4932_p3 = pnand %p4931_p13, %p4925_p7 }
  0x38   : > { %4935 = shalt.err (!%p4932_p3)
}
  0x39   : > { %4295 = dma.hbm_to_vmem [thread:$0]  (!%p5155_p0), %s331_s13, 256, %s333_s29, %s322_s20, %s5023_s11, %s5023_s11, %s5024_s22  }
  0x3a   : > { %351 = sbr.rel (%p5176_p5) target bundleno = 2984 (0xba8), region = 52 }
  0x3f   : > { %s5191_s19 = sand.u32 1, %s5004_s28  }
  0x40   : > { %s3944_s21 = sshll.u32 %s5191_s19, 4  ;;  %s354_s23 = scalar_lea.sflag [#allocation3], %s5191_s19 }
  0x41   : > { %s5195_s16 = scalar_lea.vmem [#allocation2], %s3944_s21 }
  0x42   : > { %4987 = dma.done.wait (%p5124_p8), %s354_s23, 256  }
  0x43   : > { %4989 = vsyncadd (%p5124_p8), %s354_s23, 4294967040  ;;  %s363_s27 = scalar_lea.sflag [#allocation6], %s5191_s19  ;;  %s5202_s29 = scalar_lea.vmem [#allocation5], %s3944_s21 }
  0x44   : > { %4991 = dma.done.wait (%p5124_p8), %s363_s27, 256  }
  0x45   : > { %4993 = vsyncadd (%p5124_p8), %s363_s27, 4294967040  ;;  %p418_p0 = scmp.lt.s32.totalorder %s5012_s30, 1  ;;  %v552_v0 = vlaneseq  ;;  %v5026_v1 = vmov 0   ;;  %v443_v14 = vld [vmem:[%s7189_s4] sm:$0xff]  ;;  %vm477_vm0 = vcmask 130048   ;;  %v444_v16 = vld [vmem:[%s7189_s4 + $0x8] sm:$0xff] }
  0x46   : > { %516 = vmatprep.mubr.bf16.mxu0 %v5026_v1  ;;  %4357 = vset.pattern.permute.xlu0 %v5026_v1  ;;  %v4359_v15 = vld [vmem:[%s7188_s3] sm:$0xff]   ;;  %v446_v17 = vld [vmem:[%s7189_s4 + $0x18] sm:$0xff]  ;;  %v4360_v18 = vld [vmem:[%s7188_s3 + $0x8] sm:$0xff]   ;;  %vm637_vm1 = vcmask 1043456   ;;  %vm588_vm2 = vcmask 64512   ;;  %vm3688_vm4 = vcmask 261120  }
  0x47   : > { %s419_s20 = scalar_select %p418_p0, %s5012_s30, 1  ;;  %v5211_v2 = vshrl.u32 %v552_v0, 7  ;;  %4358 = vset.pattern.permute.xlu1 %v5026_v1  ;;  %449 = vperm.xlu0 %4357, %v443_v14   ;;  %v541_v19 = vld [vmem:[%s5195_s16] sm:$0xf]  ;;  %v542_v33 = vld [vmem:[%s5195_s16 + $0x4] sm:$0xf] }
  0x48   : > { %464 = vperm.xlu1 %4358, %v446_v17   ;;  %4279 = vmatprep.subr.msk.bf16.mxu1 %vm637_vm1, %v541_v19  ;;  %v639_v20 = vsel %vm637_vm1, %v541_v19, 0  ;;  %v1373_v34 = vsel %vm637_vm1, %v542_v33, 0  ;;  %v445_v36 = vld [vmem:[%s7189_s4 + $0x10] sm:$0xff]  ;;  %s3946_s23 = sshll.u32 %s5191_s19, 5 }
  0x49   : > { %7310 = vst [vmem:[#allocation16_spill] sm:$0xff] %v5211_v2  ;;  %s4029_s22 = sshll.u32 %s419_s20, 5  ;;  %s3949_s14 = sshll.u32 %s419_s20, 2  ;;  %v2619_v3 = vsub.s32 2, %v5211_v2  ;;  %v3353_v4 = vsub.s32 3, %v5211_v2  ;;  %4136 = vmatpush3.bf16.msra.mxu1 %v639_v20 }
  0x4a   : > { %s5217_s17 = scalar_lea.vmem %s7185_s0, %s4029_s22  ;;  %s5222_s15 = scalar_lea.vmem %s7190_s5, %s3949_s14 }
  0x4b   : > { %v434_v5 = vld [vmem:[%s5217_s17 + $0x8] sm:$0xff]  ;;  %v436_v6 = vld [vmem:[%s5217_s17 + $0x18] sm:$0xff]  ;;  %v549_v7 = vld [vmem:[%s5222_s15] sm:$0xf]  ;;  %454 = vperm.xlu0 %4357, %v444_v16   ;;  %s416_s27 = scalar_lea.vmem [#allocation7], %s3946_s23  ;;  %s4030_s22 = sshll.u32 %s5012_s30, 9 }
  0x4c   : > { %v438_v8 = vpack.c.bf16 %v436_v6, %v434_v5  ;;  %v5228_v9 = vrot.slane %v549_v7, %v2619_v3  ;;  %v433_v10 = vld [vmem:[%s5217_s17] sm:$0xff]  ;;  %v435_v11 = vld [vmem:[%s5217_s17 + $0x10] sm:$0xff]  ;;  %v5232_v12 = vrot.slane %v549_v7, %v3353_v4  ;;  %s3796_s20 = sshll.u32 %s416_s27, 4  ;;  %s7135_s24 = scalar_lea.hbm %s7193_s8, %s4030_s22  ;;  %s7129_s20 = int_to_ptr.vmem [resolvable:$true] %s3796_s20 }
  0x4d   : > { %v437_v13 = vpack.c.bf16 %v435_v11, %v433_v10  ;;  %v553_v10 = vand.u32 127, %v552_v0  ;;  %v5027_v11 = vmov -1e+30   ;;  %s3781_s30 = scalar_lea.sflag [#allocation4], %s5191_s19  ;;  %s4936_s13 = scalar_lea.vmem %s7129_s20, 512 }
  0x4e   : > { %7311 = vst [vmem:[#allocation17_spill] sm:$0xff] %v5228_v9  ;;  %7312 = vst [vmem:[#allocation18_spill] sm:$0xff] %v5232_v12  ;;  %498 = vmatprep.subr.bf16.mxu0 %v438_v8  ;;  %p4937_p8 = scmp.ne.s32.totalorder %s7129_s20, %s4936_s13 }
  0x4f   : > { %499 = vmatpush1.bf16.msra.mxu0 %v437_v13  ;;  %vm554_vm3 = vcmp.lt.s32.totalorder %v553_v10, 64 }
  0x50   : > { %4280 = vmatprep.subr.msk.bf16.mxu0 %vm637_vm1, %v542_v33  ;;  %v5293_v13 = vsel %vm554_vm3, 0.0, %v5027_v11  ;;  %p4938_p2 = pnand %p4937_p8, %p5128_p9 }
  0x51   : > { %7314 = vst [vmem:[#allocation20_spill] sm:$0xff] %v5293_v13 }
  0x52   : > { %3952 = vmatmul.mubr.msk.bf16.vlgmr.msra.gmra.mxu0 %vm477_vm0, %v4359_v15  ;;  %p4939_p5 = pneg %p4938_p2 }
  0x53   : > { %526 = vmatprep.mubr.bf16.mxu0 %v5026_v1  ;;  %4170 = vmatpush3.bf16.msra.mxu0 %v1373_v34 }
  0x5a   : > { %3953 = vmatmul.mubr.msk.bf16.gmra.mxu0 %vm477_vm0, %v4360_v18 }
  0xc2   : > { %v450_v21 = vpop.permute.xlu0 %449 }
  0xc3   : > { %v5258_v38 = vpop.permute.xlu1 %464 }
  0xc4   : > { %7313 = vst [vmem:[#allocation19_spill] sm:$0xff] %v5258_v38 }
  0xc6   : > { %v455_v24 = vpop.permute.xlu0 %454 }
 0x112   : > { %v518_v22 = vpop.f32.mrf.mxu0 }
 0x113   : > { %v519_v26 = vadd.f32 %v518_v22, %v450_v21 }
 0x114   : > { %v520_v23 = vpop.f32.mrf.mxu0 }
 0x115   : > { %v521_v29 = vadd.f32 %v520_v23, %v450_v21 }
 0x116   : > { %v522_v25 = vpop.f32.mrf.mxu0 }
 0x117   : > { %v523_v27 = vadd.f32 %v522_v25, %v455_v24 }
 0x118   : > { %v524_v28 = vpop.f32.mrf.mxu0 }
 0x119   : > { %v537_v30 = vpack.c.bf16 %v523_v27, %v519_v26  ;;  %v525_v31 = vadd.f32 %v524_v28, %v455_v24 }
 0x11a   : > { %v5303_v19 = vpop.f32.mrf.mxu0 }
 0x11b   : > { %v538_v32 = vpack.c.bf16 %v525_v31, %v521_v29  ;;  %556 = vxpose.xlu1.c.b16.start.end [1/1] (short) %v537_v30, 128  ;;  %v1288_v35 = vrot.slane %v537_v30, 4  ;;  %7315 = vst [vmem:[#allocation21_spill] sm:$0xff] %v5303_v19 }
 0x11c   : > { %v5305_v0 = vpop.f32.mrf.mxu0 }
 0x11d   : > { %572 = vxpose.xlu0.c.b16.start.end [1/1] (short) %v538_v32, 128  ;;  %v1289_v37 = vrot.slane %v538_v32, 4  ;;  %7316 = vst [vmem:[#allocation22_spill] sm:$0xff] %v5305_v0 }
 0x11e   : > { %v5307_v20 = vpop.f32.mrf.mxu0 }
 0x11f   : > { %7317 = vst [vmem:[#allocation23_spill] sm:$0xff] %v5307_v20 }
 0x120   : > { %v5309_v22 = vpop.f32.mrf.mxu0 }
 0x121   : > { %7318 = vst [vmem:[#allocation24_spill] sm:$0xff] %v5309_v22 }
 0x138   : > { %1292 = vxpose.xlu1.c.b16.start.end [1/1] (short) %v1288_v35, 128 }
 0x142   : > { %459 = vperm.xlu0 %4357, %v445_v36  }
 0x155   : > { %1308 = vxpose.xlu1.c.b16.start.end [1/1] (short) %v1289_v37, 128 }
 0x17d   : > { %v564_v39 = vpop.trf.xlu1 }
 0x17e   : > { %4137 = vmatprep.mubr.msk.bf16.mxu1 %vm588_vm2, %v564_v39 }
 0x17f   : > { %v580_v44 = vpop.trf.xlu0 }
 0x181   : > { %v565_v40 = vpop.trf.xlu1 }
 0x182   : > { %4138 = vmatmul.mubr.msk.bf16.vlgmr.msra.gmra.mxu1 %vm588_vm2, %v565_v40 }
 0x183   : > { %v581_v46 = vpop.trf.xlu0 }
 0x185   : > { %v566_v41 = vpop.trf.xlu1 }
 0x186   : > { %4141 = vmatprep.mubr.msk.bf16.mxu1 %vm588_vm2, %v566_v41 }
 0x187   : > { %v582_v49 = vpop.trf.xlu0 }
 0x189   : > { %v567_v42 = vpop.trf.xlu1 }
 0x18a   : > { %4142 = vmatmul.mubr.msk.bf16.gmra.mxu1 %vm588_vm2, %v567_v42 }
 0x18b   : > { %v583_v51 = vpop.trf.xlu0 }
 0x18d   : > { %v568_v43 = vpop.trf.xlu1 }
 0x18e   : > { %4145 = vmatprep.mubr.msk.bf16.mxu1 %vm588_vm2, %v568_v43 }
 0x18f   : > { %v584_v54 = vpop.trf.xlu0 }
 0x191   : > { %v569_v45 = vpop.trf.xlu1 }
 0x192   : > { %4146 = vmatmul.mubr.msk.bf16.gmra.mxu1 %vm588_vm2, %v569_v45 }
 0x193   : > { %v585_v56 = vpop.trf.xlu0 }
 0x195   : > { %v570_v47 = vpop.trf.xlu1 }
 0x196   : > { %4149 = vmatprep.mubr.msk.bf16.mxu1 %vm588_vm2, %v570_v47 }
 0x197   : > { %v586_v59 = vpop.trf.xlu0 }
 0x199   : > { %v571_v48 = vpop.trf.xlu1 }
 0x19a   : > { %4150 = vmatmul.mubr.msk.bf16.gmra.mxu1 %vm588_vm2, %v571_v48 }
 0x19b   : > { %4153 = vmatprep.mubr.msk.bf16.mxu1 %vm588_vm2, %v580_v44  ;;  %v587_v61 = vpop.trf.xlu0 }
 0x19d   : > { %v1300_v50 = vpop.trf.xlu1 }
 0x19e   : > { %4171 = vmatprep.mubr.msk.bf16.mxu0 %vm588_vm2, %v1300_v50 }
 0x1a1   : > { %v1301_v52 = vpop.trf.xlu1 }
 0x1a2   : > { %4172 = vmatmul.mubr.msk.bf16.vlgmr.msra.gmra.mxu0 %vm588_vm2, %v1301_v52  ;;  %4154 = vmatmul.mubr.msk.bf16.gmra.mxu1 %vm588_vm2, %v581_v46 }
 0x1a3   : > { %4157 = vmatprep.mubr.msk.bf16.mxu1 %vm588_vm2, %v582_v49 }
 0x1a5   : > { %v1302_v53 = vpop.trf.xlu1 }
 0x1a6   : > { %4175 = vmatprep.mubr.msk.bf16.mxu0 %vm588_vm2, %v1302_v53 }
 0x1a9   : > { %v1303_v55 = vpop.trf.xlu1 }
 0x1aa   : > { %4176 = vmatmul.mubr.msk.bf16.gmra.mxu0 %vm588_vm2, %v1303_v55  ;;  %4158 = vmatmul.mubr.msk.bf16.gmra.mxu1 %vm588_vm2, %v583_v51 }
 0x1ab   : > { %4161 = vmatprep.mubr.msk.bf16.mxu1 %vm588_vm2, %v584_v54 }
 0x1ad   : > { %v1304_v57 = vpop.trf.xlu1 }
 0x1ae   : > { %4179 = vmatprep.mubr.msk.bf16.mxu0 %vm588_vm2, %v1304_v57 }
 0x1b1   : > { %v1305_v58 = vpop.trf.xlu1 }
 0x1b2   : > { %4180 = vmatmul.mubr.msk.bf16.gmra.mxu0 %vm588_vm2, %v1305_v58  ;;  %4162 = vmatmul.mubr.msk.bf16.gmra.mxu1 %vm588_vm2, %v585_v56 }
 0x1b3   : > { %4165 = vmatprep.mubr.msk.bf16.mxu1 %vm588_vm2, %v586_v59 }
 0x1b5   : > { %v1306_v60 = vpop.trf.xlu1 }
 0x1b6   : > { %4183 = vmatprep.mubr.msk.bf16.mxu0 %vm588_vm2, %v1306_v60 }
 0x1b9   : > { %v1307_v62 = vpop.trf.xlu1 }
 0x1ba   : > { %4184 = vmatmul.mubr.msk.bf16.gmra.mxu0 %vm588_vm2, %v1307_v62  ;;  %4166 = vmatmul.mubr.msk.bf16.gmra.mxu1 %vm588_vm2, %v587_v61 }
 0x1bd   : > { %v1316_v63 = vpop.trf.xlu1 }
 0x1be   : > { %4187 = vmatprep.mubr.msk.bf16.mxu0 %vm588_vm2, %v1316_v63 }
 0x1c1   : > { %v1317_v1 = vpop.trf.xlu1 }
 0x1c2   : > { %4188 = vmatmul.mubr.msk.bf16.gmra.mxu0 %vm588_vm2, %v1317_v1 }
 0x1c5   : > { %v1318_v3 = vpop.trf.xlu1 }
 0x1c6   : > { %4191 = vmatprep.mubr.msk.bf16.mxu0 %vm588_vm2, %v1318_v3 }
 0x1c9   : > { %v1319_v4 = vpop.trf.xlu1 }
 0x1ca   : > { %4192 = vmatmul.mubr.msk.bf16.gmra.mxu0 %vm588_vm2, %v1319_v4 }
 0x1cd   : > { %v1320_v5 = vpop.trf.xlu1 }
 0x1ce   : > { %4195 = vmatprep.mubr.msk.bf16.mxu0 %vm588_vm2, %v1320_v5 }
 0x1d1   : > { %v1321_v6 = vpop.trf.xlu1 }
 0x1d2   : > { %4196 = vmatmul.mubr.msk.bf16.gmra.mxu0 %vm588_vm2, %v1321_v6 }
 0x1d5   : > { %v1322_v7 = vpop.trf.xlu1 }
 0x1d6   : > { %4199 = vmatprep.mubr.msk.bf16.mxu0 %vm588_vm2, %v1322_v7 }
 0x1d9   : > { %v1323_v8 = vpop.trf.xlu1 }
 0x1da   : > { %4200 = vmatmul.mubr.msk.bf16.gmra.mxu0 %vm588_vm2, %v1323_v8 }
 0x242   : > { %v4139_v14 = vpop.f32.mrf.mxu1 }
 0x243   : > { %v5296_v15 = vadd.f32 %v4139_v14, %v5293_v13 }
 0x244   : > { %v675_v16 = vpop.f32.mrf.mxu1 }
 0x245   : > { %806 = vmax.xlane.f32.xlu0 %v5296_v15  ;;  %v5316_v29 = vadd.f32 %v675_v16, %v5293_v13 }
 0x246   : > { %v4140_v17 = vpop.f32.mrf.mxu1 }
 0x247   : > { %v5300_v18 = vadd.f32 %v4140_v17, %v5293_v13 }
 0x248   : > { %v678_v21 = vpop.f32.mrf.mxu1 }
 0x249   : > { %808 = vmax.xlane.f32.xlu1 %v5300_v18  ;;  %v5324_v34 = vadd.f32 %v678_v21, %v5293_v13 }
 0x24a   : > { %v4143_v23 = vpop.f32.mrf.mxu1 }
 0x24b   : > { %v5332_v39 = vadd.f32 %v4143_v23, %v5293_v13 }
 0x24c   : > { %v691_v26 = vpop.f32.mrf.mxu1 }
 0x24d   : > { %v5348_v48 = vadd.f32 %v691_v26, %v5293_v13 }
 0x24e   : > { %v4144_v31 = vpop.f32.mrf.mxu1 }
 0x24f   : > { %v5343_v44 = vadd.f32 %v4144_v31, %v5293_v13 }
 0x250   : > { %v694_v36 = vpop.f32.mrf.mxu1 }
 0x251   : > { %v5356_v52 = vadd.f32 %v694_v36, %v5293_v13 }
 0x252   : > { %v4147_v41 = vpop.f32.mrf.mxu1 }
 0x253   : > { %v5364_v56 = vadd.f32 %v4147_v41, %v5293_v13 }
 0x254   : > { %v707_v45 = vpop.f32.mrf.mxu1 }
 0x255   : > { %v5380_v1 = vadd.f32 %v707_v45, %v5293_v13 }
 0x256   : > { %v4148_v50 = vpop.f32.mrf.mxu1 }
 0x257   : > { %v5375_v61 = vadd.f32 %v4148_v50, %v5293_v13 }
 0x258   : > { %v710_v54 = vpop.f32.mrf.mxu1 }
 0x259   : > { %v5388_v6 = vadd.f32 %v710_v54, %v5293_v13 }
 0x25a   : > { %v4151_v58 = vpop.f32.mrf.mxu1 }
 0x25b   : > { %v5396_v14 = vadd.f32 %v4151_v58, %v5293_v13 }
 0x25c   : > { %v723_v62 = vpop.f32.mrf.mxu1 }
 0x25d   : > { %v5412_v31 = vadd.f32 %v723_v62, %v5293_v13 }
 0x25e   : > { %v4152_v4 = vpop.f32.mrf.mxu1 }
 0x260   : > { %v726_v8 = vpop.f32.mrf.mxu1 }
 0x261   : > { %v5407_v26 = vadd.f32 %v726_v8, %v5293_v13 }
 0x262   : > { %v4173_v24 = vpop.f32.mrf.mxu0  ;;  %v4155_v11 = vpop.f32.mrf.mxu1 }
 0x263   : > { %v5312_v25 = vadd.f32 %v4173_v24, %v5293_v13  ;;  %v5442_v58 = vadd.f32 %v4155_v11, %v5293_v13 }
 0x264   : > { %v1409_v27 = vpop.f32.mrf.mxu0  ;;  %v739_v23 = vpop.f32.mrf.mxu1 }
 0x265   : > { %1540 = vmax.xlane.f32.xlu0 %v5312_v25  ;;  %v5327_v35 = vadd.f32 %v1409_v27, %v5293_v13 }
 0x266   : > { %v4174_v28 = vpop.f32.mrf.mxu0  ;;  %v4156_v27 = vpop.f32.mrf.mxu1 }
 0x267   : > { %v5319_v30 = vadd.f32 %v4174_v28, %v5293_v13 }
 0x268   : > { %v1412_v32 = vpop.f32.mrf.mxu0  ;;  %v742_v41 = vpop.f32.mrf.mxu1 }
 0x269   : > { %802 = vmax.xlane.f32.xlu0 %v5316_v29  ;;  %1542 = vmax.xlane.f32.xlu1 %v5319_v30  ;;  %v5335_v40 = vadd.f32 %v1412_v32, %v5293_v13  ;;  %v5436_v50 = vadd.f32 %v742_v41, %v5293_v13 }
 0x26a   : > { %v4177_v33 = vpop.f32.mrf.mxu0  ;;  %v4159_v45 = vpop.f32.mrf.mxu1 }
 0x26b   : > { %v5338_v43 = vadd.f32 %v4177_v33, %v5293_v13  ;;  %v5420_v33 = vadd.f32 %v4156_v27, %v5293_v13 }
 0x26c   : > { %v1425_v37 = vpop.f32.mrf.mxu0 }
 0x26d   : > { %804 = vmax.xlane.f32.xlu1 %v5324_v34  ;;  %1536 = vmax.xlane.f32.xlu0 %v5327_v35  ;;  %v5359_v53 = vadd.f32 %v1425_v37, %v5293_v13  ;;  %v5423_v37 = vadd.f32 %v4152_v4, %v5293_v13 }
 0x26e   : > { %v4178_v42 = vpop.f32.mrf.mxu0 }
 0x26f   : > { %v5351_v49 = vadd.f32 %v4178_v42, %v5293_v13 }
 0x270   : > { %v1428_v46 = vpop.f32.mrf.mxu0 }
 0x271   : > { %1538 = vmax.xlane.f32.xlu1 %v5335_v40  ;;  %814 = vmax.xlane.f32.xlu0 %v5332_v39  ;;  %v5367_v57 = vadd.f32 %v1428_v46, %v5293_v13 }
 0x272   : > { %v4181_v47 = vpop.f32.mrf.mxu0 }
 0x273   : > { %v5370_v59 = vadd.f32 %v4181_v47, %v5293_v13 }
 0x274   : > { %v1441_v51 = vpop.f32.mrf.mxu0 }
 0x275   : > { %816 = vmax.xlane.f32.xlu1 %v5343_v44  ;;  %1548 = vmax.xlane.f32.xlu0 %v5338_v43  ;;  %v5391_v7 = vadd.f32 %v1441_v51, %v5293_v13  ;;  %v755_v51 = vpop.f32.mrf.mxu1 }
 0x276   : > { %v4182_v55 = vpop.f32.mrf.mxu0 }
 0x277   : > { %v5383_v3 = vadd.f32 %v4182_v55, %v5293_v13  ;;  %v4160_v62 = vpop.f32.mrf.mxu1 }
 0x278   : > { %v1444_v60 = vpop.f32.mrf.mxu0 }
 0x279   : > { %810 = vmax.xlane.f32.xlu0 %v5348_v48  ;;  %1550 = vmax.xlane.f32.xlu1 %v5351_v49  ;;  %v5399_v16 = vadd.f32 %v1444_v60, %v5293_v13 }
 0x27a   : > { %v4185_v63 = vpop.f32.mrf.mxu0 }
 0x27b   : > { %v5402_v21 = vadd.f32 %v4185_v63, %v5293_v13 }
 0x27c   : > { %v1457_v5 = vpop.f32.mrf.mxu0 }
 0x27d   : > { %812 = vmax.xlane.f32.xlu1 %v5356_v52  ;;  %1544 = vmax.xlane.f32.xlu0 %v5359_v53  ;;  %v5431_v46 = vadd.f32 %v1457_v5, %v5293_v13  ;;  %v5455_v5 = vadd.f32 %v4160_v62, %v5293_v13 }
 0x27e   : > { %v4186_v10 = vpop.f32.mrf.mxu0 }
 0x27f   : > { %v5439_v55 = vadd.f32 %v4186_v10, %v5293_v13  ;;  %v758_v10 = vpop.f32.mrf.mxu1 }
 0x280   : > { %v1460_v17 = vpop.f32.mrf.mxu0 }
 0x281   : > { %1546 = vmax.xlane.f32.xlu1 %v5367_v57  ;;  %822 = vmax.xlane.f32.xlu0 %v5364_v56  ;;  %v5415_v32 = vadd.f32 %v1460_v17, %v5293_v13  ;;  %v4163_v17 = vpop.f32.mrf.mxu1 }
 0x282   : > { %v4189_v24 = vpop.f32.mrf.mxu0 }
 0x283   : > { %v5450_v4 = vadd.f32 %v4189_v24, %v5293_v13  ;;  %v5463_v24 = vadd.f32 %v739_v23, %v5293_v13  ;;  %v771_v41 = vpop.f32.mrf.mxu1 }
 0x284   : > { %v1473_v28 = vpop.f32.mrf.mxu0 }
 0x285   : > { %824 = vmax.xlane.f32.xlu1 %v5375_v61  ;;  %1556 = vmax.xlane.f32.xlu0 %v5370_v59  ;;  %v5471_v62 = vadd.f32 %v1473_v28, %v5293_v13  ;;  %v4164_v9 = vpop.f32.mrf.mxu1 }
 0x286   : > { %v4190_v36 = vpop.f32.mrf.mxu0  ;;  %v5487_v28 = vadd.f32 %v4164_v9, %v5293_v13 }
 0x287   : > { %v5428_v42 = vadd.f32 %v4190_v36, %v5293_v13  ;;  %v5468_v36 = vadd.f32 %v758_v10, %v5293_v13  ;;  %v774_v22 = vpop.f32.mrf.mxu1 }
 0x288   : > { %v1476_v47 = vpop.f32.mrf.mxu0  ;;  %7320 = vst [vmem:[#allocation26_spill] sm:$0xff] %v5487_v28  ;;  %v5500_v9 = vadd.f32 %v774_v22, %v5293_v13 }
 0x289   : > { %818 = vmax.xlane.f32.xlu0 %v5380_v1  ;;  %1558 = vmax.xlane.f32.xlu1 %v5383_v3  ;;  %v5447_v60 = vadd.f32 %v1476_v47, %v5293_v13  ;;  %v4167_v0 = vpop.f32.mrf.mxu1 }
 0x28a   : > { %v4193_v54 = vpop.f32.mrf.mxu0  ;;  %7322 = vst [vmem:[#allocation28_spill] sm:$0xff] %v5500_v9 }
 0x28b   : > { %v5482_v10 = vadd.f32 %v4193_v54, %v5293_v13  ;;  %v5495_v54 = vadd.f32 %v755_v51, %v5293_v13  ;;  %v787_v38 = vpop.f32.mrf.mxu1 }
 0x28c   : > { %v1489_v63 = vpop.f32.mrf.mxu0 }
 0x28d   : > { %820 = vmax.xlane.f32.xlu1 %v5388_v6  ;;  %1552 = vmax.xlane.f32.xlu0 %v5391_v7  ;;  %v5503_v2 = vadd.f32 %v1489_v63, %v5293_v13 }
 0x28e   : > { %v4194_v8 = vpop.f32.mrf.mxu0 }
 0x28f   : > { %v5460_v11 = vadd.f32 %v4194_v8, %v5293_v13  ;;  %v5474_v8 = vadd.f32 %v4159_v45, %v5293_v13  ;;  %7323 = vst [vmem:[#allocation29_spill] sm:$0xff] %v5503_v2 }
 0x290   : > { %v1492_v27 = vpop.f32.mrf.mxu0 }
 0x291   : > { %1554 = vmax.xlane.f32.xlu1 %v5399_v16  ;;  %830 = vmax.xlane.f32.xlu0 %v5396_v14  ;;  %v5479_v23 = vadd.f32 %v1492_v27, %v5293_v13 }
 0x292   : > { %v4197_v47 = vpop.f32.mrf.mxu0 }
 0x293   : > { %7319 = vst [vmem:[#allocation25_spill] sm:$0xff] %v5479_v23  ;;  %v5514_v22 = vadd.f32 %v4197_v47, %v5293_v13  ;;  %v5527_v47 = vadd.f32 %v771_v41, %v5293_v13 }
 0x294   : > { %v1505_v12 = vpop.f32.mrf.mxu0 }
 0x295   : > { %828 = vmax.xlane.f32.xlu1 %v5407_v26  ;;  %1564 = vmax.xlane.f32.xlu0 %v5402_v21  ;;  %7326 = vst [vmem:[#allocation32_spill] sm:$0xff] %v5514_v22 }
 0x296   : > { %v4198_v45 = vpop.f32.mrf.mxu0 }
 0x297   : > { %v5492_v27 = vadd.f32 %v4198_v45, %v5293_v13  ;;  %v5506_v45 = vadd.f32 %v4163_v17, %v5293_v13 }
 0x298   : > { %v1508_v20 = vpop.f32.mrf.mxu0 }
 0x299   : > { %826 = vmax.xlane.f32.xlu0 %v5412_v31  ;;  %1562 = vmax.xlane.f32.xlu1 %v5415_v32  ;;  %7321 = vst [vmem:[#allocation27_spill] sm:$0xff] %v5492_v27  ;;  %7324 = vst [vmem:[#allocation30_spill] sm:$0xff] %v5506_v45  ;;  %v5511_v51 = vadd.f32 %v1508_v20, %v5293_v13 }
 0x29a   : > { %v4201_v19 = vpop.f32.mrf.mxu0 }
 0x29b   : > { %7325 = vst [vmem:[#allocation31_spill] sm:$0xff] %v5511_v51 }
 0x29d   : > { %832 = vmax.xlane.f32.xlu0 %v5423_v37  ;;  %840 = vmax.xlane.f32.xlu1 %v5420_v33 }
 0x2a1   : > { %1560 = vmax.xlane.f32.xlu0 %v5431_v46  ;;  %1574 = vmax.xlane.f32.xlu1 %v5428_v42 }
 0x2a5   : > { %1566 = vmax.xlane.f32.xlu0 %v5439_v55  ;;  %836 = vmax.xlane.f32.xlu1 %v5436_v50 }
 0x2a9   : > { %838 = vmax.xlane.f32.xlu0 %v5442_v58  ;;  %1570 = vmax.xlane.f32.xlu1 %v5447_v60 }
 0x2ad   : > { %1572 = vmax.xlane.f32.xlu0 %v5450_v4  ;;  %848 = vmax.xlane.f32.xlu1 %v5455_v5 }
 0x2b1   : > { %834 = vmax.xlane.f32.xlu0 %v5463_v24  ;;  %1582 = vmax.xlane.f32.xlu1 %v5460_v11 }
 0x2b5   : > { %1568 = vmax.xlane.f32.xlu0 %v5471_v62  ;;  %844 = vmax.xlane.f32.xlu1 %v5468_v36 }
 0x2b9   : > { %846 = vmax.xlane.f32.xlu0 %v5474_v8  ;;  %1578 = vmax.xlane.f32.xlu1 %v5479_v23 }
 0x2bd   : > { %1580 = vmax.xlane.f32.xlu0 %v5482_v10  ;;  %856 = vmax.xlane.f32.xlu1 %v5487_v28  ;;  %v4168_v28 = vpop.f32.mrf.mxu1 }
 0x2be   : > { %v5519_v63 = vadd.f32 %v4168_v28, %v5293_v13 }
 0x2bf   : > { %v790_v17 = vpop.f32.mrf.mxu1 }
 0x2c0   : > { %7327 = vst [vmem:[#allocation33_spill] sm:$0xff] %v5519_v63  ;;  %v5524_v20 = vadd.f32 %v790_v17, %v5293_v13 }
 0x2c1   : > { %842 = vmax.xlane.f32.xlu0 %v5495_v54  ;;  %1590 = vmax.xlane.f32.xlu1 %v5492_v27  ;;  %v1521_v27 = vpop.f32.mrf.mxu0 }
 0x2c2   : > { %7328 = vst [vmem:[#allocation34_spill] sm:$0xff] %v5524_v20 }
 0x2c3   : > { %v4202_v23 = vpop.f32.mrf.mxu0 }
 0x2c5   : > { %1576 = vmax.xlane.f32.xlu0 %v5503_v2  ;;  %852 = vmax.xlane.f32.xlu1 %v5500_v9  ;;  %v1524_v9 = vpop.f32.mrf.mxu0  ;;  %v5529_v2 = vpop.permute.xlu0 %459 }
 0x2c6   : > { %7329 = vst [vmem:[#allocation35_spill] sm:$0xff] %v5529_v2  ;;  %v5534_v28 = vadd.f32 %v1524_v9, %v5293_v13  ;;  %v5547_v9 = vadd.f32 %v4201_v19, %v5293_v13 }
 0x2c8   : > { %7330 = vst [vmem:[#allocation36_spill] sm:$0xff] %v5534_v28 }
 0x2c9   : > { %854 = vmax.xlane.f32.xlu0 %v5506_v45  ;;  %1586 = vmax.xlane.f32.xlu1 %v5511_v51  ;;  %v5541_v45 = vadd.f32 %v4167_v0, %v5293_v13  ;;  %v5556_v0 = vadd.f32 %v1521_v27, %v5293_v13 }
 0x2cd   : > { %1588 = vmax.xlane.f32.xlu0 %v5514_v22  ;;  %864 = vmax.xlane.f32.xlu1 %v5519_v63  ;;  %v5537_v22 = vadd.f32 %v1505_v12, %v5293_v13 }
 0x2ce   : > { %v807_v63 = vpop.xlane.xlu0 %806 }
 0x2cf   : > { %v868_v2 = vsub.f32 %v5296_v15, %v807_v63  ;;  %v5563_v15 = vadd.f32 %v4202_v23, %v5293_v13 }
 0x2d1   : > { %850 = vmax.xlane.f32.xlu0 %v5527_v47  ;;  %860 = vmax.xlane.f32.xlu1 %v5524_v20  ;;  %v902_v12 = vmul.f32 1.442695, %v868_v2  ;;  %7332 = vst [vmem:[#allocation38_spill] sm:$0xff] %v5563_v15 }
 0x2d2   : > { %v809_v51 = vpop.xlane.xlu1 %808 }
 0x2d3   : > { %v869_v17 = vsub.f32 %v5300_v18, %v809_v51  ;;  %v5552_v18 = vadd.f32 %v787_v38, %v5293_v13 }
 0x2d5   : > { %v904_v41 = vmul.f32 1.442695, %v869_v17  ;;  %1584 = vmax.xlane.f32.xlu0 %v5537_v22  ;;  %1594 = vmax.xlane.f32.xlu1 %v5534_v28 }
 0x2d7   : > { %4363 = vpow2.f32 %v904_v41 }
 0x2d8   : > { %4365 = vpow2.f32 %v902_v12 }
 0x2d9   : > { %862 = vmax.xlane.f32.xlu0 %v5541_v45 }
 0x2dd   : > { %1596 = vmax.xlane.f32.xlu0 %v5547_v9 }
 0x2e1   : > { %858 = vmax.xlane.f32.xlu0 %v5552_v18 }
 0x2e4   : > { %v5558_v51 = vpop.eup %4363 }
 0x2e5   : > { %7331 = vst [vmem:[#allocation37_spill] sm:$0xff] %v5558_v51  ;;  %1592 = vmax.xlane.f32.xlu0 %v5556_v0  ;;  %968 = vadd.xlane.f32.xlu1 %v5558_v51  ;;  %v5566_v2 = vpop.eup %4365 }
 0x2e6   : > { %7333 = vst [vmem:[#allocation39_spill] sm:$0xff] %v5566_v2 }
 0x2e9   : > { %1598 = vmax.xlane.f32.xlu0 %v5563_v15 }
 0x2ed   : > { %966 = vadd.xlane.f32.xlu0 %v5566_v2 }
 0x2ee   : > { %v1541_v38 = vpop.xlane.xlu0 %1540 }
 0x2ef   : > { %v1602_v19 = vsub.f32 %v5312_v25, %v1541_v38 }
 0x2f1   : > { %v1636_v27 = vmul.f32 1.442695, %v1602_v19 }
 0x2f2   : > { %v803_v63 = vpop.xlane.xlu0 %802  ;;  %v1543_v17 = vpop.xlane.xlu1 %1542 }
 0x2f3   : > { %4367 = vpow2.f32 %v1636_v27  ;;  %v866_v41 = vsub.f32 %v5316_v29, %v803_v63  ;;  %v1603_v12 = vsub.f32 %v5319_v30, %v1543_v17 }
 0x2f5   : > { %v898_v51 = vmul.f32 1.442695, %v866_v41  ;;  %v1638_v23 = vmul.f32 1.442695, %v1603_v12 }
 0x2f6   : > { %v1537_v13 = vpop.xlane.xlu0 %1536  ;;  %v805_v28 = vpop.xlane.xlu1 %804 }
 0x2f7   : > { %4369 = vpow2.f32 %v898_v51  ;;  %v1600_v15 = vsub.f32 %v5327_v35, %v1537_v13  ;;  %v867_v2 = vsub.f32 %v5324_v34, %v805_v28 }
 0x2f8   : > { %4371 = vpow2.f32 %v1638_v23 }
 0x2f9   : > { %v1632_v20 = vmul.f32 1.442695, %v1600_v15  ;;  %v900_v25 = vmul.f32 1.442695, %v867_v2 }
 0x2fa   : > { %v815_v38 = vpop.xlane.xlu0 %814  ;;  %v1539_v19 = vpop.xlane.xlu1 %1538 }
 0x2fb   : > { %4373 = vpow2.f32 %v1632_v20  ;;  %v872_v27 = vsub.f32 %v5332_v39, %v815_v38  ;;  %v1601_v29 = vsub.f32 %v5335_v40, %v1539_v19 }
 0x2fc   : > { %4375 = vpow2.f32 %v900_v25 }
 0x2fd   : > { %v910_v30 = vmul.f32 1.442695, %v872_v27  ;;  %v1634_v63 = vmul.f32 1.442695, %v1601_v29 }
 0x2fe   : > { %v1549_v17 = vpop.xlane.xlu0 %1548  ;;  %v817_v41 = vpop.xlane.xlu1 %816 }
 0x2ff   : > { %4377 = vpow2.f32 %v910_v30  ;;  %v1606_v13 = vsub.f32 %v5338_v43, %v1549_v17  ;;  %v873_v34 = vsub.f32 %v5343_v44, %v817_v41 }
 0x300   : > { %v5578_v35 = vpop.eup %4367  ;;  %4379 = vpow2.f32 %v1634_v63 }
 0x301   : > { %7334 = vst [vmem:[#allocation40_spill] sm:$0xff] %v5578_v35  ;;  %v1644_v28 = vmul.f32 1.442695, %v1606_v13  ;;  %v912_v51 = vmul.f32 1.442695, %v873_v34  ;;  %1700 = vadd.xlane.f32.xlu0 %v5578_v35 }
 0x302   : > { %v811_v39 = vpop.xlane.xlu0 %810  ;;  %v1551_v20 = vpop.xlane.xlu1 %1550 }
 0x303   : > { %4381 = vpow2.f32 %v1644_v28  ;;  %v870_v40 = vsub.f32 %v5348_v48, %v811_v39  ;;  %v1607_v15 = vsub.f32 %v5351_v49, %v1551_v20 }
 0x304   : > { %v5583_v2 = vpop.eup %4369  ;;  %4383 = vpow2.f32 %v912_v51 }
 0x305   : > { %7335 = vst [vmem:[#allocation41_spill] sm:$0xff] %v5583_v2  ;;  %v5585_v43 = vpop.eup %4371  ;;  %v906_v44 = vmul.f32 1.442695, %v870_v40  ;;  %v1646_v12 = vmul.f32 1.442695, %v1607_v15  ;;  %962 = vadd.xlane.f32.xlu0 %v5583_v2 }
 0x306   : > { %7336 = vst [vmem:[#allocation42_spill] sm:$0xff] %v5585_v43  ;;  %1702 = vadd.xlane.f32.xlu1 %v5585_v43  ;;  %v1545_v23 = vpop.xlane.xlu0 %1544  ;;  %v813_v25 = vpop.xlane.xlu1 %812 }
 0x307   : > { %4385 = vpow2.f32 %v906_v44  ;;  %v1604_v38 = vsub.f32 %v5359_v53, %v1545_v23  ;;  %v871_v48 = vsub.f32 %v5356_v52, %v813_v25 }
 0x308   : > { %v5591_v19 = vpop.eup %4373  ;;  %4387 = vpow2.f32 %v1646_v12 }
 0x309   : > { %7337 = vst [vmem:[#allocation43_spill] sm:$0xff] %v5591_v19  ;;  %v5593_v49 = vpop.eup %4375  ;;  %v1640_v27 = vmul.f32 1.442695, %v1604_v38  ;;  %v908_v29 = vmul.f32 1.442695, %v871_v48  ;;  %1696 = vadd.xlane.f32.xlu0 %v5591_v19 }
 0x30a   : > { %7338 = vst [vmem:[#allocation44_spill] sm:$0xff] %v5593_v49  ;;  %964 = vadd.xlane.f32.xlu1 %v5593_v49  ;;  %v823_v30 = vpop.xlane.xlu0 %822  ;;  %v1547_v63 = vpop.xlane.xlu1 %1546 }
 0x30b   : > { %4389 = vpow2.f32 %v1640_v27  ;;  %v876_v17 = vsub.f32 %v5364_v56, %v823_v30  ;;  %v1605_v53 = vsub.f32 %v5367_v57, %v1547_v63 }
 0x30c   : > { %v5599_v41 = vpop.eup %4377  ;;  %4391 = vpow2.f32 %v908_v29 }
 0x30d   : > { %7339 = vst [vmem:[#allocation45_spill] sm:$0xff] %v5599_v41  ;;  %v5601_v52 = vpop.eup %4379  ;;  %v918_v13 = vmul.f32 1.442695, %v876_v17  ;;  %v1642_v34 = vmul.f32 1.442695, %v1605_v53  ;;  %974 = vadd.xlane.f32.xlu0 %v5599_v41 }
 0x30e   : > { %7340 = vst [vmem:[#allocation46_spill] sm:$0xff] %v5601_v52  ;;  %1698 = vadd.xlane.f32.xlu1 %v5601_v52  ;;  %v1557_v28 = vpop.xlane.xlu0 %1556  ;;  %v825_v51 = vpop.xlane.xlu1 %824 }
 0x30f   : > { %4393 = vpow2.f32 %v918_v13  ;;  %v1610_v39 = vsub.f32 %v5370_v59, %v1557_v28  ;;  %v877_v56 = vsub.f32 %v5375_v61, %v825_v51 }
 0x310   : > { %v5607_v20 = vpop.eup %4381  ;;  %4395 = vpow2.f32 %v1642_v34 }
 0x311   : > { %7341 = vst [vmem:[#allocation47_spill] sm:$0xff] %v5607_v20  ;;  %v5609_v57 = vpop.eup %4383  ;;  %v1652_v40 = vmul.f32 1.442695, %v1610_v39  ;;  %v920_v15 = vmul.f32 1.442695, %v877_v56  ;;  %1708 = vadd.xlane.f32.xlu0 %v5607_v20 }
 0x312   : > { %7342 = vst [vmem:[#allocation48_spill] sm:$0xff] %v5609_v57  ;;  %976 = vadd.xlane.f32.xlu1 %v5609_v57  ;;  %v819_v44 = vpop.xlane.xlu0 %818  ;;  %v1559_v12 = vpop.xlane.xlu1 %1558 }
 0x313   : > { %4397 = vpow2.f32 %v1652_v40  ;;  %v874_v23 = vsub.f32 %v5380_v1, %v819_v44  ;;  %v1611_v59 = vsub.f32 %v5383_v3, %v1559_v12 }
 0x314   : > { %v5615_v25 = vpop.eup %4385  ;;  %4399 = vpow2.f32 %v920_v15 }
 0x315   : > { %7343 = vst [vmem:[#allocation49_spill] sm:$0xff] %v5615_v25  ;;  %v5617_v61 = vpop.eup %4387  ;;  %v914_v38 = vmul.f32 1.442695, %v874_v23  ;;  %v1654_v48 = vmul.f32 1.442695, %v1611_v59  ;;  %970 = vadd.xlane.f32.xlu0 %v5615_v25 }
 0x316   : > { %7344 = vst [vmem:[#allocation50_spill] sm:$0xff] %v5617_v61  ;;  %1710 = vadd.xlane.f32.xlu1 %v5617_v61  ;;  %v1553_v27 = vpop.xlane.xlu0 %1552  ;;  %v821_v29 = vpop.xlane.xlu1 %820 }
 0x317   : > { %4401 = vpow2.f32 %v914_v38  ;;  %v1608_v30 = vsub.f32 %v5391_v7, %v1553_v27  ;;  %v875_v1 = vsub.f32 %v5388_v6, %v821_v29 }
 0x318   : > { %v5623_v63 = vpop.eup %4389  ;;  %4403 = vpow2.f32 %v1654_v48 }
 0x319   : > { %7345 = vst [vmem:[#allocation51_spill] sm:$0xff] %v5623_v63  ;;  %v5625_v3 = vpop.eup %4391  ;;  %v1648_v17 = vmul.f32 1.442695, %v1608_v30  ;;  %v916_v53 = vmul.f32 1.442695, %v875_v1  ;;  %1704 = vadd.xlane.f32.xlu0 %v5623_v63 }
 0x31a   : > { %7346 = vst [vmem:[#allocation52_spill] sm:$0xff] %v5625_v3  ;;  %972 = vadd.xlane.f32.xlu1 %v5625_v3  ;;  %v831_v13 = vpop.xlane.xlu0 %830  ;;  %v1555_v34 = vpop.xlane.xlu1 %1554  ;;  %v4875_v3 = vld [vmem:[%s5222_s15] sm:$0xf] }
 0x31b   : > { %4405 = vpow2.f32 %v1648_v17  ;;  %v880_v28 = vsub.f32 %v5396_v14, %v831_v13  ;;  %v1609_v7 = vsub.f32 %v5399_v16, %v1555_v34 }
 0x31c   : > { %v5631_v51 = vpop.eup %4393  ;;  %4407 = vpow2.f32 %v916_v53 }
 0x31d   : > { %v5633_v6 = vpop.eup %4395  ;;  %v926_v39 = vmul.f32 1.442695, %v880_v28  ;;  %v1650_v56 = vmul.f32 1.442695, %v1609_v7  ;;  %982 = vadd.xlane.f32.xlu0 %v5631_v51 }
 0x31e   : > { %7347 = vst [vmem:[#allocation53_spill] sm:$0xff] %v5633_v6  ;;  %1706 = vadd.xlane.f32.xlu1 %v5633_v6  ;;  %v1565_v40 = vpop.xlane.xlu0 %1564  ;;  %v829_v15 = vpop.xlane.xlu1 %828 }
 0x31f   : > { %4409 = vpow2.f32 %v926_v39  ;;  %v1614_v44 = vsub.f32 %v5402_v21, %v1565_v40 }
 0x320   : > { %v5638_v12 = vpop.eup %4397  ;;  %4411 = vpow2.f32 %v1650_v56 }
 0x321   : > { %v5640_v14 = vpop.eup %4399  ;;  %v1660_v16 = vmul.f32 1.442695, %v1614_v44  ;;  %1716 = vadd.xlane.f32.xlu0 %v5638_v12 }
 0x322   : > { %984 = vadd.xlane.f32.xlu1 %v5640_v14  ;;  %v827_v23 = vpop.xlane.xlu0 %826  ;;  %v1563_v59 = vpop.xlane.xlu1 %1562 }
 0x323   : > { %4413 = vpow2.f32 %v1660_v16  ;;  %v878_v38 = vsub.f32 %v5412_v31, %v827_v23 }
 0x324   : > { %v5645_v48 = vpop.eup %4401 }
 0x325   : > { %7348 = vst [vmem:[#allocation54_spill] sm:$0xff] %v5645_v48  ;;  %v5647_v27 = vpop.eup %4403  ;;  %v922_v21 = vmul.f32 1.442695, %v878_v38  ;;  %978 = vadd.xlane.f32.xlu0 %v5645_v48 }
 0x326   : > { %1718 = vadd.xlane.f32.xlu1 %v5647_v27  ;;  %v833_v29 = vpop.xlane.xlu0 %832  ;;  %v841_v30 = vpop.xlane.xlu1 %840 }
 0x327   : > { %4415 = vpow2.f32 %v922_v21  ;;  %v881_v1 = vsub.f32 %v5423_v37, %v833_v29  ;;  %v879_v37 = vsub.f32 %v5407_v26, %v829_v15  ;;  %v1613_v21 = vsub.f32 %v5415_v32, %v1563_v59 }
 0x328   : > { %v5652_v17 = vpop.eup %4405 }
 0x329   : > { %7349 = vst [vmem:[#allocation55_spill] sm:$0xff] %v5652_v17  ;;  %v5654_v53 = vpop.eup %4407  ;;  %v928_v13 = vmul.f32 1.442695, %v881_v1  ;;  %1712 = vadd.xlane.f32.xlu0 %v5652_v17 }
 0x32a   : > { %7350 = vst [vmem:[#allocation56_spill] sm:$0xff] %v5654_v53  ;;  %980 = vadd.xlane.f32.xlu1 %v5654_v53  ;;  %v1561_v31 = vpop.xlane.xlu0 %1560  ;;  %v1575_v34 = vpop.xlane.xlu1 %1574 }
 0x32b   : > { %4417 = vpow2.f32 %v928_v13  ;;  %v1612_v28 = vsub.f32 %v5431_v46, %v1561_v31  ;;  %v924_v46 = vmul.f32 1.442695, %v879_v37  ;;  %v885_v31 = vsub.f32 %v5420_v33, %v841_v30 }
 0x32c   : > { %v5659_v7 = vpop.eup %4409 }
 0x32d   : > { %v5661_v39 = vpop.eup %4411  ;;  %v1656_v56 = vmul.f32 1.442695, %v1612_v28  ;;  %990 = vadd.xlane.f32.xlu0 %v5659_v7 }
 0x32e   : > { %7351 = vst [vmem:[#allocation57_spill] sm:$0xff] %v5661_v39  ;;  %1714 = vadd.xlane.f32.xlu1 %v5661_v39  ;;  %v1567_v40 = vpop.xlane.xlu0 %1566  ;;  %v837_v44 = vpop.xlane.xlu1 %836 }
 0x32f   : > { %4419 = vpow2.f32 %v1656_v56  ;;  %v1615_v16 = vsub.f32 %v5439_v55, %v1567_v40  ;;  %v1658_v55 = vmul.f32 1.442695, %v1613_v21  ;;  %v1619_v40 = vsub.f32 %v5428_v42, %v1575_v34 }
 0x330   : > { %v5667_v23 = vpop.eup %4413  ;;  %v883_v21 = vsub.f32 %v5436_v50, %v837_v44 }
 0x331   : > { %v1662_v38 = vmul.f32 1.442695, %v1615_v16  ;;  %1724 = vadd.xlane.f32.xlu0 %v5667_v23 }
 0x332   : > { %v839_v29 = vpop.xlane.xlu0 %838  ;;  %v1571_v1 = vpop.xlane.xlu1 %1570 }
 0x333   : > { %4421 = vpow2.f32 %v1662_v38  ;;  %v884_v26 = vsub.f32 %v5442_v58, %v839_v29  ;;  %v936_v58 = vmul.f32 1.442695, %v885_v31 }
 0x334   : > { %v5672_v15 = vpop.eup %4415  ;;  %4423 = vpow2.f32 %v924_v46 }
 0x335   : > { %v934_v13 = vmul.f32 1.442695, %v884_v26  ;;  %986 = vadd.xlane.f32.xlu0 %v5672_v15 }
 0x336   : > { %v1573_v28 = vpop.xlane.xlu0 %1572  ;;  %v849_v56 = vpop.xlane.xlu1 %848 }
 0x337   : > { %4425 = vpow2.f32 %v934_v13  ;;  %v1618_v37 = vsub.f32 %v5450_v4, %v1573_v28  ;;  %v1670_v4 = vmul.f32 1.442695, %v1619_v40 }
 0x338   : > { %v5677_v32 = vpop.eup %4417  ;;  %4427 = vpow2.f32 %v1658_v55  ;;  %v1617_v55 = vsub.f32 %v5447_v60, %v1571_v1 }
 0x339   : > { %v1668_v59 = vmul.f32 1.442695, %v1618_v37  ;;  %992 = vadd.xlane.f32.xlu1 %v5677_v32 }
 0x33a   : > { %v835_v16 = vpop.xlane.xlu0 %834  ;;  %v1583_v38 = vpop.xlane.xlu1 %1582 }
 0x33b   : > { %4429 = vpow2.f32 %v1668_v59  ;;  %v882_v46 = vsub.f32 %v5463_v24, %v835_v16  ;;  %v932_v24 = vmul.f32 1.442695, %v883_v21  ;;  %v1666_v59 = vmul.f32 1.442695, %v1617_v55 }
 0x33c   : > { %v5682_v33 = vpop.eup %4419  ;;  %4431 = vpow2.f32 %v936_v58  ;;  %v889_v58 = vsub.f32 %v5455_v5, %v849_v56 }
 0x33d   : > { %v930_v30 = vmul.f32 1.442695, %v882_v46  ;;  %1720 = vadd.xlane.f32.xlu0 %v5682_v33 }
 0x33e   : > { %v1569_v29 = vpop.xlane.xlu0 %1568  ;;  %v845_v13 = vpop.xlane.xlu1 %844  ;;  %v944_v46 = vmul.f32 1.442695, %v889_v58 }
 0x33f   : > { %4433 = vpow2.f32 %v930_v30  ;;  %v1616_v26 = vsub.f32 %v5471_v62, %v1569_v29  ;;  %v1623_v30 = vsub.f32 %v5460_v11, %v1583_v38  ;;  %v7357_v38 = vld [vmem:[#allocation29_spill] sm:$0xff] }
 0x340   : > { %v5687_v42 = vpop.eup %4421  ;;  %4435 = vpow2.f32 %v1670_v4 }
 0x341   : > { %v1664_v34 = vmul.f32 1.442695, %v1616_v26  ;;  %1726 = vadd.xlane.f32.xlu1 %v5687_v42  ;;  %v5691_v28 = vpop.eup %4423  ;;  %v1678_v26 = vmul.f32 1.442695, %v1623_v30 }
 0x342   : > { %v847_v31 = vpop.xlane.xlu0 %846  ;;  %v1579_v62 = vpop.xlane.xlu1 %1578 }
 0x343   : > { %4437 = vpow2.f32 %v1664_v34  ;;  %v888_v50 = vsub.f32 %v5474_v8, %v847_v31  ;;  %v887_v34 = vsub.f32 %v5468_v36, %v845_v13  ;;  %v7361_v13 = vld [vmem:[#allocation30_spill] sm:$0xff] }
 0x344   : > { %v5694_v44 = vpop.eup %4425  ;;  %4439 = vpow2.f32 %v932_v24 }
 0x345   : > { %7352 = vst [vmem:[#allocation58_spill] sm:$0xff] %v5694_v44  ;;  %v942_v37 = vmul.f32 1.442695, %v888_v50  ;;  %998 = vadd.xlane.f32.xlu0 %v5694_v44  ;;  %988 = vadd.xlane.f32.xlu1 %v5691_v28  ;;  %v5699_v60 = vpop.eup %4427  ;;  %v7380_v44 = vld [vmem:[#allocation16_spill] sm:$0xff] }
 0x346   : > { %v1581_v40 = vpop.xlane.xlu0 %1580  ;;  %v857_v5 = vpop.xlane.xlu1 %856  ;;  %v1060_v25 = vsub.s32 0, %v7380_v44 }
 0x347   : > { %4441 = vpow2.f32 %v942_v37  ;;  %v1622_v1 = vsub.f32 %v5482_v10, %v1581_v40  ;;  %v940_v37 = vmul.f32 1.442695, %v887_v34  ;;  %v7365_v34 = vld [vmem:[#allocation32_spill] sm:$0xff] }
 0x348   : > { %v5702_v16 = vpop.eup %4429  ;;  %4443 = vpow2.f32 %v1666_v59  ;;  %v7359_v59 = vld [vmem:[#allocation25_spill] sm:$0xff]  ;;  %v5835_v63 = vrot.slane %v4875_v3, %v1060_v25 }
 0x349   : > { %7353 = vst [vmem:[#allocation59_spill] sm:$0xff] %v5702_v16  ;;  %v1676_v8 = vmul.f32 1.442695, %v1622_v1  ;;  %1732 = vadd.xlane.f32.xlu0 %v5702_v16  ;;  %1722 = vadd.xlane.f32.xlu1 %v5699_v60  ;;  %v5707_v21 = vpop.eup %4431  ;;  %v1621_v58 = vsub.f32 %v7359_v59, %v1579_v62 }
 0x34a   : > { %v843_v4 = vpop.xlane.xlu0 %842  ;;  %7354 = vst [vmem:[#allocation60_spill] sm:$0xff] %v5707_v21 }
 0x34b   : > { %4445 = vpow2.f32 %v1676_v8  ;;  %v886_v56 = vsub.f32 %v5495_v54, %v843_v4  ;;  %v1591_v54 = vpop.xlane.xlu1 %1590  ;;  %v1674_v30 = vmul.f32 1.442695, %v1621_v58  ;;  %v7363_v4 = vld [vmem:[#allocation26_spill] sm:$0xff] }
 0x34c   : > { %v5710_v29 = vpop.eup %4433  ;;  %4447 = vpow2.f32 %v944_v46 }
 0x34d   : > { %7355 = vst [vmem:[#allocation61_spill] sm:$0xff] %v5710_v29  ;;  %v938_v10 = vmul.f32 1.442695, %v886_v56  ;;  %994 = vadd.xlane.f32.xlu0 %v5710_v29  ;;  %1000 = vadd.xlane.f32.xlu1 %v5707_v21  ;;  %v5715_v11 = vpop.eup %4435  ;;  %v893_v56 = vsub.f32 %v7363_v4, %v857_v5 }
 0x34e   : > { %v1577_v24 = vpop.xlane.xlu0 %1576  ;;  %7356 = vst [vmem:[#allocation62_spill] sm:$0xff] %v5715_v11 }
 0x34f   : > { %4449 = vpow2.f32 %v938_v10  ;;  %v1620_v55 = vsub.f32 %v7357_v38, %v1577_v24  ;;  %v853_v62 = vpop.xlane.xlu1 %852 }
 0x350   : > { %v5718_v31 = vpop.eup %4437  ;;  %4451 = vpow2.f32 %v1678_v26 }
 0x351   : > { %7358 = vst [vmem:[#allocation29_spill] sm:$0xff] %v5718_v31  ;;  %v1672_v50 = vmul.f32 1.442695, %v1620_v55  ;;  %1728 = vadd.xlane.f32.xlu0 %v5718_v31  ;;  %1734 = vadd.xlane.f32.xlu1 %v5715_v11  ;;  %v5723_v36 = vpop.eup %4439  ;;  %v1794_v11 = vsub.s32 1, %v7380_v44 }
 0x352   : > { %v855_v40 = vpop.xlane.xlu0 %854  ;;  %7360 = vst [vmem:[#allocation25_spill] sm:$0xff] %v5723_v36 }
 0x353   : > { %4453 = vpow2.f32 %v1672_v50  ;;  %v892_v1 = vsub.f32 %v7361_v13, %v855_v40  ;;  %v952_v50 = vmul.f32 1.442695, %v893_v56 }
 0x354   : > { %v5726_v8 = vpop.eup %4441  ;;  %4455 = vpow2.f32 %v940_v37  ;;  %v7367_v37 = vld [vmem:[#allocation27_spill] sm:$0xff] }
 0x355   : > { %7362 = vst [vmem:[#allocation30_spill] sm:$0xff] %v5726_v8  ;;  %v950_v46 = vmul.f32 1.442695, %v892_v1  ;;  %1006 = vadd.xlane.f32.xlu0 %v5726_v8  ;;  %996 = vadd.xlane.f32.xlu1 %v5723_v36  ;;  %v5731_v26 = vpop.eup %4443  ;;  %v1627_v59 = vsub.f32 %v7367_v37, %v1591_v54  ;;  %v1587_v1 = vpop.xlane.xlu1 %1586  ;;  %v7373_v37 = vld [vmem:[#allocation31_spill] sm:$0xff] }
 0x356   : > { %v1589_v10 = vpop.xlane.xlu0 %1588  ;;  %7364 = vst [vmem:[#allocation26_spill] sm:$0xff] %v5731_v26 }
 0x357   : > { %4457 = vpow2.f32 %v950_v46  ;;  %v1626_v24 = vsub.f32 %v7365_v34, %v1589_v10  ;;  %v1686_v4 = vmul.f32 1.442695, %v1627_v59 }
 0x358   : > { %v5734_v38 = vpop.eup %4445  ;;  %4459 = vpow2.f32 %v1674_v30  ;;  %v7370_v30 = vld [vmem:[#allocation28_spill] sm:$0xff] }
 0x359   : > { %7366 = vst [vmem:[#allocation32_spill] sm:$0xff] %v5734_v38  ;;  %v1684_v55 = vmul.f32 1.442695, %v1626_v24  ;;  %1740 = vadd.xlane.f32.xlu0 %v5734_v38  ;;  %1730 = vadd.xlane.f32.xlu1 %v5731_v26  ;;  %v5739_v5 = vpop.eup %4447  ;;  %v891_v56 = vsub.f32 %v7370_v30, %v853_v62  ;;  %v865_v62 = vpop.xlane.xlu1 %864 }
 0x35a   : > { %v851_v58 = vpop.xlane.xlu0 %850  ;;  %7368 = vst [vmem:[#allocation27_spill] sm:$0xff] %v5739_v5 }
 0x35b   : > { %4461 = vpow2.f32 %v1684_v55  ;;  %v890_v40 = vsub.f32 %v5527_v47, %v851_v58  ;;  %v948_v55 = vmul.f32 1.442695, %v891_v56 }
 0x35c   : > { %v5742_v13 = vpop.eup %4449  ;;  %4463 = vpow2.f32 %v952_v50  ;;  %v1625_v50 = vsub.f32 %v7373_v37, %v1587_v1 }
 0x35d   : > { %7369 = vst [vmem:[#allocation63_spill] sm:$0xff] %v5742_v13  ;;  %v946_v46 = vmul.f32 1.442695, %v890_v40  ;;  %1002 = vadd.xlane.f32.xlu0 %v5742_v13  ;;  %1008 = vadd.xlane.f32.xlu1 %v5739_v5  ;;  %v5747_v54 = vpop.eup %4451 }
 0x35e   : > { %v1585_v10 = vpop.xlane.xlu0 %1584  ;;  %7371 = vst [vmem:[#allocation28_spill] sm:$0xff] %v5747_v54  ;;  %v1682_v30 = vmul.f32 1.442695, %v1625_v50 }
 0x35f   : > { %4465 = vpow2.f32 %v946_v46  ;;  %v1624_v34 = vsub.f32 %v5537_v22, %v1585_v10 }
 0x360   : > { %v5750_v24 = vpop.eup %4453  ;;  %4467 = vpow2.f32 %v1686_v4  ;;  %v7375_v4 = vld [vmem:[#allocation33_spill] sm:$0xff] }
 0x361   : > { %7372 = vst [vmem:[#allocation64_spill] sm:$0xff] %v5750_v24  ;;  %v1680_v47 = vmul.f32 1.442695, %v1624_v34  ;;  %1736 = vadd.xlane.f32.xlu0 %v5750_v24  ;;  %1742 = vadd.xlane.f32.xlu1 %v5747_v54  ;;  %v5755_v58 = vpop.eup %4455  ;;  %v897_v56 = vsub.f32 %v7375_v4, %v865_v62 }
 0x362   : > { %v863_v59 = vpop.xlane.xlu0 %862  ;;  %7374 = vst [vmem:[#allocation31_spill] sm:$0xff] %v5755_v58 }
 0x363   : > { %4469 = vpow2.f32 %v1680_v47  ;;  %v896_v40 = vsub.f32 %v5541_v45, %v863_v59  ;;  %v960_v37 = vmul.f32 1.442695, %v897_v56 }
 0x364   : > { %v5758_v46 = vpop.eup %4457  ;;  %4471 = vpow2.f32 %v948_v55 }
 0x365   : > { %v958_v22 = vmul.f32 1.442695, %v896_v40  ;;  %1014 = vadd.xlane.f32.xlu0 %v5758_v46  ;;  %1004 = vadd.xlane.f32.xlu1 %v5755_v58  ;;  %v5763_v1 = vpop.eup %4459 }
 0x366   : > { %v1597_v10 = vpop.xlane.xlu0 %1596  ;;  %7376 = vst [vmem:[#allocation33_spill] sm:$0xff] %v5763_v1 }
 0x367   : > { %4473 = vpow2.f32 %v958_v22  ;;  %v1630_v34 = vsub.f32 %v5547_v9, %v1597_v10  ;;  %v861_v9 = vpop.xlane.xlu1 %860 }
 0x368   : > { %v5766_v47 = vpop.eup %4461  ;;  %4475 = vpow2.f32 %v1682_v30 }
 0x369   : > { %v1692_v45 = vmul.f32 1.442695, %v1630_v34  ;;  %1748 = vadd.xlane.f32.xlu0 %v5766_v47  ;;  %1738 = vadd.xlane.f32.xlu1 %v5763_v1  ;;  %v5770_v55 = vpop.eup %4463 }
 0x36a   : > { %v859_v59 = vpop.xlane.xlu0 %858 }
 0x36b   : > { %4477 = vpow2.f32 %v1692_v45  ;;  %v894_v50 = vsub.f32 %v5552_v18, %v859_v59  ;;  %v7377_v45 = vld [vmem:[#allocation34_spill] sm:$0xff] }
 0x36c   : > { %v5773_v62 = vpop.eup %4465  ;;  %4479 = vpow2.f32 %v960_v37  ;;  %v895_v59 = vsub.f32 %v7377_v45, %v861_v9  ;;  %v7378_v37 = vld [vmem:[#allocation38_spill] sm:$0xff] }
 0x36d   : > { %v954_v40 = vmul.f32 1.442695, %v894_v50  ;;  %1010 = vadd.xlane.f32.xlu0 %v5773_v62  ;;  %1016 = vadd.xlane.f32.xlu1 %v5770_v55  ;;  %v5777_v4 = vpop.eup %4467 }
 0x36e   : > { %v1593_v22 = vpop.xlane.xlu0 %1592 }
 0x36f   : > { %4481 = vpow2.f32 %v954_v40  ;;  %v1628_v30 = vsub.f32 %v5556_v0, %v1593_v22  ;;  %v1595_v40 = vpop.xlane.xlu1 %1594  ;;  %v956_v22 = vmul.f32 1.442695, %v895_v59 }
 0x370   : > { %v5780_v56 = vpop.eup %4469 }
 0x371   : > { %v1688_v10 = vmul.f32 1.442695, %v1628_v30  ;;  %1744 = vadd.xlane.f32.xlu0 %v5780_v56  ;;  %1750 = vadd.xlane.f32.xlu1 %v5777_v4  ;;  %v5784_v34 = vpop.eup %4471  ;;  %v7379_v30 = vld [vmem:[#allocation36_spill] sm:$0xff] }
 0x372   : > { %v1599_v18 = vpop.xlane.xlu0 %1598  ;;  %v1629_v19 = vsub.f32 %v7379_v30, %v1595_v40 }
 0x373   : > { %4483 = vpow2.f32 %v1688_v10  ;;  %v1631_v50 = vsub.f32 %v7378_v37, %v1599_v18 }
 0x374   : > { %v5788_v2 = vpop.eup %4473  ;;  %v1690_v10 = vmul.f32 1.442695, %v1629_v19 }
 0x375   : > { %v1694_v49 = vmul.f32 1.442695, %v1631_v50  ;;  %1022 = vadd.xlane.f32.xlu0 %v5788_v2  ;;  %1012 = vadd.xlane.f32.xlu1 %v5784_v34  ;;  %v5792_v0 = vpop.eup %4475  ;;  %v5818_v50 = vpop.xlane.xlu1 %968 }
 0x376   : > { %v5811_v59 = vpop.xlane.xlu0 %966 }
 0x377   : > { %4485 = vpow2.f32 %v1694_v49 }
 0x378   : > { %v5795_v52 = vpop.eup %4477  ;;  %4487 = vpow2.f32 %v956_v22 }
 0x379   : > { %1756 = vadd.xlane.f32.xlu0 %v5795_v52  ;;  %1746 = vadd.xlane.f32.xlu1 %v5792_v0  ;;  %v5799_v9 = vpop.eup %4479  ;;  %4489 = vpow2.f32 %v1690_v10 }
 0x37c   : > { %v5801_v18 = vpop.eup %4481 }
 0x37d   : > { %1018 = vadd.xlane.f32.xlu0 %v5801_v18  ;;  %1024 = vadd.xlane.f32.xlu1 %v5799_v9 }
 0x380   : > { %v5805_v45 = vpop.eup %4483 }
 0x381   : > { %1752 = vadd.xlane.f32.xlu0 %v5805_v45 }
 0x384   : > { %v5808_v49 = vpop.eup %4485 }
 0x385   : > { %1758 = vadd.xlane.f32.xlu1 %v5808_v49  ;;  %v5813_v37 = vpop.eup %4487 }
 0x386   : > { %v5820_v40 = vpop.eup %4489 }
 0x389   : > { %1020 = vadd.xlane.f32.xlu1 %v5813_v37 }
 0x38a   : > { %v5816_v19 = vpop.xlane.xlu0 %1700 }
 0x38d   : > { %1754 = vadd.xlane.f32.xlu1 %v5820_v40 }
 0x38e   : > { %v5823_v22 = vpop.xlane.xlu0 %962 }
 0x38f   : > { %v5825_v30 = vpop.xlane.xlu1 %1702 }
 0x392   : > { %v5827_v10 = vpop.xlane.xlu0 %1696 }
 0x393   : > { %v5829_v29 = vpop.xlane.xlu1 %964 }
 0x396   : > { %v975_v36 = vpop.xlane.xlu0 %974 }
 0x397   : > { %4491 = vrcp.f32 %v975_v36  ;;  %v5831_v31 = vpop.xlane.xlu1 %1698 }
 0x39a   : > { %v1709_v35 = vpop.xlane.xlu0 %1708 }
 0x39b   : > { %4493 = vrcp.f32 %v1709_v35  ;;  %v977_v26 = vpop.xlane.xlu1 %976 }
 0x39c   : > { %4495 = vrcp.f32 %v977_v26  ;;  %v5841_v26 = vrot.slane %v4875_v3, %v1794_v11 }
 0x39e   : > { %v971_v43 = vpop.xlane.xlu0 %970 }
 0x39f   : > { %4497 = vrcp.f32 %v971_v43  ;;  %v1711_v21 = vpop.xlane.xlu1 %1710 }
 0x3a0   : > { %4499 = vrcp.f32 %v1711_v21 }
 0x3a2   : > { %v1705_v16 = vpop.xlane.xlu0 %1704 }
 0x3a3   : > { %4501 = vrcp.f32 %v1705_v16  ;;  %v5838_v36 = vpop.xlane.xlu1 %972 }
 0x3a4   : > { %v4492_v6 = vpop.eup %4491 }
 0x3a5   : > { %v1068_v35 = vmul.f32 %v4492_v6, %v5835_v63 }
 0x3a6   : > { %v983_v13 = vpop.xlane.xlu0 %982 }
 0x3a7   : > { %4503 = vrcp.f32 %v983_v13  ;;  %v5843_v41 = vpop.xlane.xlu1 %1706  ;;  %1126 = vperm.xlu0 %4357, %v1068_v35  }
 0x3a8   : > { %v4494_v43 = vpop.eup %4493 }
 0x3a9   : > { %v4496_v21 = vpop.eup %4495  ;;  %v1802_v25 = vmul.f32 %v4494_v43, %v5841_v26 }
 0x3aa   : > { %v1717_v58 = vpop.xlane.xlu0 %1716  ;;  %v1069_v44 = vmul.f32 %v4496_v21, %v5835_v63 }
 0x3ab   : > { %4505 = vrcp.f32 %v1717_v58  ;;  %v985_v16 = vpop.xlane.xlu1 %984  ;;  %1860 = vperm.xlu0 %4357, %v1802_v25  }
 0x3ac   : > { %v4498_v24 = vpop.eup %4497  ;;  %4507 = vrcp.f32 %v985_v16  ;;  %1131 = vperm.xlu1 %4358, %v1069_v44  }
 0x3ad   : > { %v4500_v6 = vpop.eup %4499  ;;  %v1066_v3 = vmul.f32 %v4498_v24, %v5835_v63 }
 0x3ae   : > { %v979_v11 = vpop.xlane.xlu0 %978  ;;  %v1803_v13 = vmul.f32 %v4500_v6, %v5841_v26 }
 0x3af   : > { %4509 = vrcp.f32 %v979_v11  ;;  %v1719_v35 = vpop.xlane.xlu1 %1718  ;;  %1116 = vperm.xlu0 %4357, %v1066_v3  }
 0x3b0   : > { %v4502_v57 = vpop.eup %4501  ;;  %4511 = vrcp.f32 %v1719_v35  ;;  %1865 = vperm.xlu1 %4358, %v1803_v13  }
 0x3b1   : > { %v1800_v43 = vmul.f32 %v4502_v57, %v5841_v26 }
 0x3b2   : > { %v1713_v58 = vpop.xlane.xlu0 %1712 }
 0x3b3   : > { %4513 = vrcp.f32 %v1713_v58  ;;  %v981_v21 = vpop.xlane.xlu1 %980  ;;  %1850 = vperm.xlu0 %4357, %v1800_v43  }
 0x3b4   : > { %v4504_v25 = vpop.eup %4503  ;;  %4515 = vrcp.f32 %v981_v21 }
 0x3b5   : > { %v1072_v44 = vmul.f32 %v4504_v25, %v5835_v63 }
 0x3b6   : > { %v991_v24 = vpop.xlane.xlu0 %990 }
 0x3b7   : > { %4517 = vrcp.f32 %v991_v24  ;;  %v1715_v16 = vpop.xlane.xlu1 %1714  ;;  %1146 = vperm.xlu0 %4357, %v1072_v44  }
 0x3b8   : > { %v4506_v6 = vpop.eup %4505  ;;  %4519 = vrcp.f32 %v1715_v16 }
 0x3b9   : > { %v4508_v3 = vpop.eup %4507  ;;  %v1806_v11 = vmul.f32 %v4506_v6, %v5841_v26 }
 0x3ba   : > { %v1725_v13 = vpop.xlane.xlu0 %1724  ;;  %v1073_v57 = vmul.f32 %v4508_v3, %v5835_v63 }
 0x3bb   : > { %4521 = vrcp.f32 %v1725_v13  ;;  %1880 = vperm.xlu0 %4357, %v1806_v11  }
 0x3bc   : > { %v4510_v35 = vpop.eup %4509  ;;  %1151 = vperm.xlu1 %4358, %v1073_v57  }
 0x3bd   : > { %v4512_v43 = vpop.eup %4511  ;;  %v1070_v58 = vmul.f32 %v4510_v35, %v5835_v63 }
 0x3be   : > { %v987_v21 = vpop.xlane.xlu0 %986  ;;  %v1807_v25 = vmul.f32 %v4512_v43, %v5841_v26 }
 0x3bf   : > { %4523 = vrcp.f32 %v987_v21  ;;  %1136 = vperm.xlu0 %4357, %v1070_v58  }
 0x3c0   : > { %v4514_v44 = vpop.eup %4513  ;;  %1885 = vperm.xlu1 %4358, %v1807_v25  }
 0x3c1   : > { %v4516_v24 = vpop.eup %4515  ;;  %v1804_v16 = vmul.f32 %v4514_v44, %v5841_v26 }
 0x3c2   : > { %v993_v6 = vpop.xlane.xlu1 %992  ;;  %v1071_v3 = vmul.f32 %v4516_v24, %v5835_v63 }
 0x3c3   : > { %4525 = vrcp.f32 %v993_v6  ;;  %1870 = vperm.xlu0 %4357, %v1804_v16  }
 0x3c4   : > { %v4518_v11 = vpop.eup %4517  ;;  %1141 = vperm.xlu1 %4358, %v1071_v3  }
 0x3c5   : > { %v4520_v13 = vpop.eup %4519  ;;  %v1076_v57 = vmul.f32 %v4518_v11, %v5835_v63 }
 0x3c6   : > { %v1721_v35 = vpop.xlane.xlu0 %1720  ;;  %v1805_v43 = vmul.f32 %v4520_v13, %v5841_v26 }
 0x3c7   : > { %4527 = vrcp.f32 %v1721_v35  ;;  %1166 = vperm.xlu0 %4357, %v1076_v57  }
 0x3c8   : > { %v4522_v58 = vpop.eup %4521  ;;  %1875 = vperm.xlu1 %4358, %v1805_v43  }
 0x3c9   : > { %v1810_v21 = vmul.f32 %v4522_v58, %v5841_v26 }
 0x3ca   : > { %v1727_v25 = vpop.xlane.xlu1 %1726 }
 0x3cb   : > { %4529 = vrcp.f32 %v1727_v25  ;;  %1900 = vperm.xlu0 %4357, %v1810_v21  }
 0x3cc   : > { %v4524_v44 = vpop.eup %4523 }
 0x3cd   : > { %v1074_v24 = vmul.f32 %v4524_v44, %v5835_v63 }
 0x3ce   : > { %v999_v16 = vpop.xlane.xlu0 %998  ;;  %v989_v6 = vpop.xlane.xlu1 %988 }
 0x3cf   : > { %4531 = vrcp.f32 %v999_v16  ;;  %1156 = vperm.xlu0 %4357, %v1074_v24  }
 0x3d0   : > { %v4526_v3 = vpop.eup %4525  ;;  %4533 = vrcp.f32 %v989_v6 }
 0x3d1   : > { %v1077_v11 = vmul.f32 %v4526_v3, %v5835_v63 }
 0x3d2   : > { %v1733_v13 = vpop.xlane.xlu0 %1732  ;;  %v1723_v57 = vpop.xlane.xlu1 %1722 }
 0x3d3   : > { %4535 = vrcp.f32 %v1733_v13  ;;  %1171 = vperm.xlu1 %4358, %v1077_v11  }
 0x3d4   : > { %v4528_v35 = vpop.eup %4527  ;;  %4537 = vrcp.f32 %v1723_v57 }
 0x3d5   : > { %v1808_v43 = vmul.f32 %v4528_v35, %v5841_v26 }
 0x3d6   : > { %v5863_v58 = vpop.xlane.xlu0 %994  ;;  %v5865_v21 = vpop.xlane.xlu1 %1000 }
 0x3d7   : > { %1890 = vperm.xlu0 %4357, %v1808_v43  }
 0x3d8   : > { %v4530_v25 = vpop.eup %4529 }
 0x3d9   : > { %v1811_v44 = vmul.f32 %v4530_v25, %v5841_v26 }
 0x3da   : > { %v5868_v24 = vpop.xlane.xlu0 %1728  ;;  %v5870_v16 = vpop.xlane.xlu1 %1734 }
 0x3db   : > { %1905 = vperm.xlu1 %4358, %v1811_v44  }
 0x3dc   : > { %v4532_v6 = vpop.eup %4531 }
 0x3dd   : > { %v4534_v3 = vpop.eup %4533  ;;  %v1080_v11 = vmul.f32 %v4532_v6, %v5835_v63 }
 0x3de   : > { %v1007_v13 = vpop.xlane.xlu0 %1006  ;;  %v5873_v57 = vpop.xlane.xlu1 %996  ;;  %v1075_v35 = vmul.f32 %v4534_v3, %v5835_v63 }
 0x3df   : > { %4539 = vrcp.f32 %v1007_v13  ;;  %1186 = vperm.xlu0 %4357, %v1080_v11  }
 0x3e0   : > { %v4536_v43 = vpop.eup %4535  ;;  %1161 = vperm.xlu1 %4358, %v1075_v35  }
 0x3e1   : > { %v4538_v20 = vpop.eup %4537  ;;  %v1814_v25 = vmul.f32 %v4536_v43, %v5841_v26 }
 0x3e2   : > { %v1741_v1 = vpop.xlane.xlu0 %1740  ;;  %v5877_v61 = vpop.xlane.xlu1 %1730  ;;  %v1809_v44 = vmul.f32 %v4538_v20, %v5841_v26 }
 0x3e3   : > { %4541 = vrcp.f32 %v1741_v1  ;;  %1920 = vperm.xlu0 %4357, %v1814_v25  }
 0x3e4   : > { %1895 = vperm.xlu1 %4358, %v1809_v44  }
 0x3e6   : > { %v1003_v6 = vpop.xlane.xlu0 %1002  ;;  %v1009_v8 = vpop.xlane.xlu1 %1008 }
 0x3e7   : > { %4543 = vrcp.f32 %v1003_v6 }
 0x3e8   : > { %4545 = vrcp.f32 %v1009_v8 }
 0x3ea   : > { %v1737_v3 = vpop.xlane.xlu0 %1736  ;;  %v1743_v13 = vpop.xlane.xlu1 %1742 }
 0x3eb   : > { %4547 = vrcp.f32 %v1737_v3 }
 0x3ec   : > { %v4540_v11 = vpop.eup %4539  ;;  %4549 = vrcp.f32 %v1743_v13 }
 0x3ed   : > { %v1084_v35 = vmul.f32 %v4540_v11, %v5835_v63 }
 0x3ee   : > { %v1015_v43 = vpop.xlane.xlu0 %1014  ;;  %v5881_v48 = vpop.xlane.xlu1 %1004 }
 0x3ef   : > { %4551 = vrcp.f32 %v1015_v43  ;;  %1206 = vperm.xlu0 %4357, %v1084_v35  }
 0x3f0   : > { %v4542_v20 = vpop.eup %4541 }
 0x3f1   : > { %v1818_v1 = vmul.f32 %v4542_v20, %v5841_v26 }
 0x3f2   : > { %v1749_v25 = vpop.xlane.xlu0 %1748  ;;  %v5884_v44 = vpop.xlane.xlu1 %1738 }
 0x3f3   : > { %4553 = vrcp.f32 %v1749_v25  ;;  %1940 = vperm.xlu0 %4357, %v1818_v1  }
 0x3f4   : > { %v4544_v8 = vpop.eup %4543 }
 0x3f5   : > { %v4546_v6 = vpop.eup %4545  ;;  %v1082_v3 = vmul.f32 %v4544_v8, %v5835_v63 }
 0x3f6   : > { %v1011_v13 = vpop.xlane.xlu0 %1010  ;;  %v1017_v5 = vpop.xlane.xlu1 %1016  ;;  %v1085_v11 = vmul.f32 %v4546_v6, %v5835_v63 }
 0x3f7   : > { %4555 = vrcp.f32 %v1011_v13  ;;  %1196 = vperm.xlu0 %4357, %v1082_v3  }
 0x3f8   : > { %v4548_v43 = vpop.eup %4547  ;;  %4557 = vrcp.f32 %v1017_v5  ;;  %1211 = vperm.xlu1 %4358, %v1085_v11  }
 0x3f9   : > { %v4550_v35 = vpop.eup %4549  ;;  %v1816_v20 = vmul.f32 %v4548_v43, %v5841_v26 }
 0x3fa   : > { %v1745_v38 = vpop.xlane.xlu0 %1744  ;;  %v1751_v53 = vpop.xlane.xlu1 %1750  ;;  %v1819_v1 = vmul.f32 %v4550_v35, %v5841_v26 }
 0x3fb   : > { %4559 = vrcp.f32 %v1745_v38  ;;  %1930 = vperm.xlu0 %4357, %v1816_v20  }
 0x3fc   : > { %v4552_v25 = vpop.eup %4551  ;;  %4561 = vrcp.f32 %v1751_v53  ;;  %1945 = vperm.xlu1 %4358, %v1819_v1  }
 0x3fd   : > { %v1088_v8 = vmul.f32 %v4552_v25, %v5835_v63 }
 0x3fe   : > { %v1023_v6 = vpop.xlane.xlu0 %1022  ;;  %v1013_v13 = vpop.xlane.xlu1 %1012 }
 0x3ff   : > { %4563 = vrcp.f32 %v1023_v6  ;;  %1226 = vperm.xlu0 %4357, %v1088_v8  }
 0x400   : > { %v4554_v5 = vpop.eup %4553  ;;  %4565 = vrcp.f32 %v1013_v13 }
 0x401   : > { %v1822_v3 = vmul.f32 %v4554_v5, %v5841_v26 }
 0x402   : > { %v1757_v11 = vpop.xlane.xlu0 %1756  ;;  %v1747_v43 = vpop.xlane.xlu1 %1746 }
 0x403   : > { %1960 = vperm.xlu0 %4357, %v1822_v3   ;;  %4567 = vrcp.f32 %v1747_v43 }
 0x404   : > { %v4556_v17 = vpop.eup %4555  ;;  %4569 = vrcp.f32 %v1757_v11 }
 0x405   : > { %v4558_v38 = vpop.eup %4557  ;;  %v1086_v35 = vmul.f32 %v4556_v17, %v5835_v63 }
 0x406   : > { %v1019_v53 = vpop.xlane.xlu0 %1018  ;;  %v1089_v20 = vmul.f32 %v4558_v38, %v5835_v63  ;;  %v1025_v1 = vpop.xlane.xlu1 %1024 }
 0x407   : > { %4571 = vrcp.f32 %v1019_v53  ;;  %1216 = vperm.xlu0 %4357, %v1086_v35  }
 0x408   : > { %v4560_v25 = vpop.eup %4559  ;;  %1231 = vperm.xlu1 %4358, %v1089_v20   ;;  %4573 = vrcp.f32 %v1025_v1 }
 0x409   : > { %v4562_v8 = vpop.eup %4561  ;;  %v1820_v6 = vmul.f32 %v4560_v25, %v5841_v26 }
 0x40a   : > { %v1753_v13 = vpop.xlane.xlu0 %1752  ;;  %v1823_v5 = vmul.f32 %v4562_v8, %v5841_v26 }
 0x40b   : > { %4575 = vrcp.f32 %v1753_v13  ;;  %1950 = vperm.xlu0 %4357, %v1820_v6  }
 0x40c   : > { %v4564_v3 = vpop.eup %4563  ;;  %1965 = vperm.xlu1 %4358, %v1823_v5   ;;  %4577 = vrcp.f32 %v5811_v59 }
 0x40d   : > { %v4566_v17 = vpop.eup %4565  ;;  %v1092_v11 = vmul.f32 %v4564_v3, %v5835_v63  ;;  %4579 = vrcp.f32 %v5816_v19 }
 0x40e   : > { %v1087_v43 = vmul.f32 %v4566_v17, %v5835_v63  ;;  %4581 = vrcp.f32 %v5863_v58  ;;  %v544_v17 = vld [vmem:[%s5195_s16 + $0xc] sm:$0xf] }
 0x40f   : > { %1246 = vperm.xlu0 %4357, %v1092_v11   ;;  %4583 = vrcp.f32 %v5868_v24  ;;  %4282 = vmatprep.subr.msk.bf16.mxu0 %vm637_vm1, %v544_v17  ;;  %v2932_v24 = vsel %vm637_vm1, %v544_v17, 0 }
 0x410   : > { %1221 = vperm.xlu1 %4358, %v1087_v43   ;;  %v4568_v38 = vpop.eup %4567  ;;  %4585 = vrcp.f32 %v5823_v22  ;;  %4238 = vmatpush3.bf16.msra.mxu0 %v2932_v24 }
 0x411   : > { %v1821_v35 = vmul.f32 %v4568_v38, %v5841_v26  ;;  %v4570_v53 = vpop.eup %4569  ;;  %4587 = vrcp.f32 %v5827_v10 }
 0x412   : > { %v1826_v59 = vmul.f32 %v4570_v53, %v5841_v26  ;;  %4589 = vrcp.f32 %v5881_v48 }
 0x413   : > { %4591 = vrcp.f32 %v5884_v44 }
 0x414   : > { %v4572_v20 = vpop.eup %4571  ;;  %1955 = vperm.xlu1 %4358, %v1821_v35   ;;  %4593 = vrcp.f32 %v5838_v36 }
 0x415   : > { %v1090_v1 = vmul.f32 %v4572_v20, %v5835_v63  ;;  %v4574_v25 = vpop.eup %4573  ;;  %4595 = vrcp.f32 %v5843_v41 }
 0x416   : > { %v1093_v13 = vmul.f32 %v4574_v25, %v5835_v63  ;;  %4597 = vrcp.f32 %v5865_v21  ;;  %v7389_v21 = vld [vmem:[#allocation22_spill] sm:$0xff] }
 0x417   : > { %1236 = vperm.xlu0 %4357, %v1090_v1   ;;  %v7381_v1 = vld [vmem:[#allocation35_spill] sm:$0xff]  ;;  %4599 = vrcp.f32 %v5870_v16 }
 0x418   : > { %v4576_v8 = vpop.eup %4575  ;;  %1980 = vperm.xlu1 %4358, %v1826_v59   ;;  %v7382_v59 = vld [vmem:[#allocation21_spill] sm:$0xff]  ;;  %4601 = vrcp.f32 %v5818_v50 }
 0x419   : > { %v1824_v19 = vmul.f32 %v4576_v8, %v5841_v26  ;;  %v4578_v6 = vpop.eup %4577  ;;  %v529_v25 = vadd.f32 %v7382_v59, %v7381_v1  ;;  %v1759_v8 = vpop.xlane.xlu1 %1758  ;;  %4603 = vrcp.f32 %v5825_v30 }
 0x41a   : > { %v1064_v58 = vmul.f32 %v4578_v6, %v5835_v63  ;;  %v4580_v5 = vpop.eup %4579  ;;  %v7384_v6 = vld [vmem:[#allocation23_spill] sm:$0xff]  ;;  %4605 = vrcp.f32 %v5873_v57 }
 0x41b   : > { %1970 = vperm.xlu0 %4357, %v1824_v19   ;;  %v1798_v3 = vmul.f32 %v4580_v5, %v5841_v26  ;;  %v4582_v11 = vpop.eup %4581  ;;  %v7383_v19 = vld [vmem:[#allocation19_spill] sm:$0xff]  ;;  %4607 = vrcp.f32 %v5877_v61 }
 0x41c   : > { %1251 = vperm.xlu1 %4358, %v1093_v13   ;;  %v1078_v43 = vmul.f32 %v4582_v11, %v5835_v63  ;;  %v4584_v38 = vpop.eup %4583  ;;  %v533_v13 = vadd.f32 %v7384_v6, %v7383_v19  ;;  %4609 = vrcp.f32 %v5829_v29 }
 0x41d   : > { %v1812_v22 = vmul.f32 %v4584_v38, %v5841_v26  ;;  %v4586_v35 = vpop.eup %4585  ;;  %v1021_v5 = vpop.xlane.xlu1 %1020  ;;  %4611 = vrcp.f32 %v5831_v31 }
 0x41e   : > { %v1062_v10 = vmul.f32 %v4586_v35, %v5835_v63  ;;  %v4588_v53 = vpop.eup %4587  ;;  %4613 = vrcp.f32 %v1759_v8 }
 0x41f   : > { %1106 = vperm.xlu0 %4357, %v1064_v58   ;;  %v1796_v20 = vmul.f32 %v4588_v53, %v5841_v26  ;;  %v539_v58 = vpack.c.bf16 %v533_v13, %v529_v25  ;;  %v531_v25 = vadd.f32 %v7389_v21, %v7381_v1  ;;  %4615 = vrcp.f32 %v1021_v5 }
 0x421   : > { %v5922_v17 = vpop.xlane.xlu1 %1754 }
 0x422   : > { %4617 = vrcp.f32 %v5922_v17 }
 0x423   : > { %1840 = vperm.xlu0 %4357, %v1798_v3   ;;  %v2847_v3 = vrot.slane %v539_v58, 4 }
 0x427   : > { %1176 = vperm.xlu0 %4357, %v1078_v43   ;;  %v5924_v11 = vpop.permute.xlu1 %1131 }
 0x428   : > { %7385 = vst [vmem:[#allocation34_spill] sm:$0xff] %v5924_v11 }
 0x42b   : > { %1910 = vperm.xlu0 %4357, %v1812_v22   ;;  %v5926_v24 = vpop.permute.xlu1 %1865  ;;  %v4590_v22 = vpop.eup %4589 }
 0x42c   : > { %7386 = vst [vmem:[#allocation38_spill] sm:$0xff] %v5926_v24  ;;  %v4592_v53 = vpop.eup %4591 }
 0x42d   : > { %v1817_v44 = vmul.f32 %v4592_v53, %v5841_v26  ;;  %v4594_v36 = vpop.eup %4593 }
 0x42e   : > { %v4596_v59 = vpop.eup %4595 }
 0x42f   : > { %1096 = vperm.xlu0 %4357, %v1062_v10   ;;  %v1083_v10 = vmul.f32 %v4590_v22, %v5835_v63  ;;  %v1801_v6 = vmul.f32 %v4596_v59, %v5841_v26  ;;  %v4598_v13 = vpop.eup %4597 }
 0x430   : > { %v1081_v22 = vmul.f32 %v4598_v13, %v5835_v63 }
 0x433   : > { %1830 = vperm.xlu0 %4357, %v1796_v20   ;;  %v1067_v20 = vmul.f32 %v4594_v36, %v5835_v63 }
 0x437   : > { %v5929_v43 = vpop.permute.xlu1 %1151 }
 0x43b   : > { %v5933_v38 = vpop.permute.xlu1 %1885 }
 0x43f   : > { %2851 = vxpose.xlu1.c.b16.start.end [1/1] (short) %v2847_v3, 128  ;;  %v5936_v35 = vpop.permute.xlu1 %1141 }
 0x440   : > { %7387 = vst [vmem:[#allocation36_spill] sm:$0xff] %v5936_v35 }
 0x443   : > { %v5941_v48 = vpop.permute.xlu1 %1875 }
 0x444   : > { %7388 = vst [vmem:[#allocation16_spill] sm:$0xff] %v5941_v48 }
 0x44e   : > { %v5945_v41 = vpop.permute.xlu1 %1171 }
 0x451   : > { %2117 = vxpose.xlu0.c.b16.start.end [1/1] (short) %v539_v58, 128  ;;  %v7390_v58 = vld [vmem:[#allocation24_spill] sm:$0xff] }
 0x452   : > { %v535_v3 = vadd.f32 %v7390_v58, %v7383_v19 }
 0x454   : > { %v5956_v50 = vpack.c.bf16 %v535_v3, %v531_v25  ;;  %v5981_v3 = vpop.permute.xlu0 %1126 }
 0x455   : > { %7393 = vst [vmem:[#allocation19_spill] sm:$0xff] %v5981_v3 }
 0x456   : > { %v5951_v16 = vpop.permute.xlu1 %1905 }
 0x45b   : > { %v5961_v1 = vpop.permute.xlu1 %1161 }
 0x45f   : > { %1201 = vperm.xlu1 %4358, %v1083_v10   ;;  %v4600_v10 = vpop.eup %4599  ;;  %v5966_v19 = vpop.permute.xlu1 %1895 }
 0x460   : > { %v1815_v30 = vmul.f32 %v4600_v10, %v5841_v26  ;;  %v4602_v53 = vpop.eup %4601 }
 0x461   : > { %v1065_v57 = vmul.f32 %v4602_v53, %v5835_v63 }
 0x463   : > { %1935 = vperm.xlu1 %4358, %v1817_v44   ;;  %v4604_v44 = vpop.eup %4603 }
 0x464   : > { %v4606_v59 = vpop.eup %4605 }
 0x465   : > { %v1079_v61 = vmul.f32 %v4606_v59, %v5835_v63  ;;  %v4608_v21 = vpop.eup %4607 }
 0x466   : > { %v1813_v29 = vmul.f32 %v4608_v21, %v5841_v26 }
 0x467   : > { %1121 = vperm.xlu1 %4358, %v1067_v20   ;;  %v1799_v20 = vmul.f32 %v4604_v44, %v5841_v26 }
 0x46b   : > { %1855 = vperm.xlu1 %4358, %v1801_v6   ;;  %v4610_v6 = vpop.eup %4609 }
 0x46c   : > { %v1063_v31 = vmul.f32 %v4610_v6, %v5835_v63  ;;  %v4612_v58 = vpop.eup %4611 }
 0x46d   : > { %v4614_v10 = vpop.eup %4613 }
 0x46e   : > { %2133 = vxpose.xlu0.c.b16.start.end [1/1] (short) %v5956_v50, 128  ;;  %v1827_v53 = vmul.f32 %v4614_v10, %v5841_v26 }
 0x46f   : > { %1191 = vperm.xlu1 %4358, %v1081_v22   ;;  %v1797_v22 = vmul.f32 %v4612_v58, %v5841_v26 }
 0x473   : > { %1925 = vperm.xlu1 %4358, %v1815_v30   ;;  %v5970_v36 = vpop.permute.xlu1 %1211  ;;  %v5988_v30 = vpop.permute.xlu0 %1860 }
 0x474   : > { %7391 = vst [vmem:[#allocation35_spill] sm:$0xff] %v5970_v36  ;;  %7394 = vst [vmem:[#allocation23_spill] sm:$0xff] %v5988_v30 }
 0x477   : > { %1111 = vperm.xlu1 %4358, %v1065_v57   ;;  %v5974_v25 = vpop.permute.xlu1 %1945  ;;  %v4616_v57 = vpop.eup %4615 }
 0x478   : > { %7392 = vst [vmem:[#allocation21_spill] sm:$0xff] %v5974_v25  ;;  %v1091_v44 = vmul.f32 %v4616_v57, %v5835_v63  ;;  %v5994_v59 = vpop.permute.xlu0 %1116 }
 0x479   : > { %7395 = vst [vmem:[#allocation22_spill] sm:$0xff] %v5994_v59 }
 0x47b   : > { %1845 = vperm.xlu1 %4358, %v1799_v20   ;;  %v4618_v20 = vpop.eup %4617 }
 0x47f   : > { %1181 = vperm.xlu1 %4358, %v1079_v61   ;;  %v1825_v61 = vmul.f32 %v4618_v20, %v5841_v26 }
 0x483   : > { %1915 = vperm.xlu1 %4358, %v1813_v29   ;;  %v5977_v13 = vpop.permute.xlu1 %1231  ;;  %v5997_v29 = vpop.permute.xlu0 %1850 }
 0x484   : > { %7396 = vst [vmem:[#allocation24_spill] sm:$0xff] %v5997_v29 }
 0x487   : > { %1101 = vperm.xlu1 %4358, %v1063_v31   ;;  %v5983_v8 = vpop.permute.xlu1 %1965  ;;  %v5999_v31 = vpop.permute.xlu0 %1146 }
 0x48b   : > { %1835 = vperm.xlu1 %4358, %v1797_v22   ;;  %v5986_v5 = vpop.permute.xlu1 %1221  ;;  %v6002_v22 = vpop.permute.xlu0 %1880 }
 0x48f   : > { %1985 = vperm.xlu1 %4358, %v1827_v53   ;;  %v5991_v17 = vpop.permute.xlu1 %1955  ;;  %v6005_v53 = vpop.permute.xlu0 %1136 }
 0x490   : > { %7397 = vst [vmem:[#allocation65_spill] sm:$0xff] %v6005_v53 }
 0x493   : > { %1241 = vperm.xlu1 %4358, %v1091_v44   ;;  %v1981_v21 = vpop.permute.xlu1 %1980  ;;  %v6009_v57 = vpop.permute.xlu0 %1870 }
 0x494   : > { %7398 = vst [vmem:[#allocation66_spill] sm:$0xff] %v6009_v57  ;;  %v2018_v57 = vmul.f32 %v5795_v52, %v1981_v21 }
 0x497   : > { %1975 = vperm.xlu1 %4358, %v1825_v61   ;;  %v1252_v6 = vpop.permute.xlu1 %1251  ;;  %v1167_v61 = vpop.permute.xlu0 %1166 }
 0x49b   : > { %v1901_v59 = vpop.permute.xlu0 %1900 }
 0x4a1   : > { %v2859_v58 = vpop.trf.xlu1 }
 0x4a2   : > { %4239 = vmatprep.mubr.msk.bf16.mxu0 %vm588_vm2, %v2859_v58  ;;  %v2848_v58 = vrot.slane %v5956_v50, 4 }
 0x4a5   : > { %v2860_v10 = vpop.trf.xlu1 }
 0x4a6   : > { %4240 = vmatmul.mubr.msk.bf16.vlgmr.msra.gmra.mxu0 %vm588_vm2, %v2860_v10 }
 0x4a9   : > { %v2861_v63 = vpop.trf.xlu1 }
 0x4aa   : > { %4243 = vmatprep.mubr.msk.bf16.mxu0 %vm588_vm2, %v2861_v63 }
 0x4ad   : > { %v2862_v26 = vpop.trf.xlu1 }
 0x4ae   : > { %4244 = vmatmul.mubr.msk.bf16.gmra.mxu0 %vm588_vm2, %v2862_v26  ;;  %v1157_v26 = vpop.permute.xlu0 %1156 }
 0x4b1   : > { %v2863_v44 = vpop.trf.xlu1 }
 0x4b2   : > { %4247 = vmatprep.mubr.msk.bf16.mxu0 %vm588_vm2, %v2863_v44  ;;  %v1891_v29 = vpop.permute.xlu0 %1890 }
 0x4b5   : > { %v2864_v20 = vpop.trf.xlu1 }
 0x4b6   : > { %4248 = vmatmul.mubr.msk.bf16.gmra.mxu0 %vm588_vm2, %v2864_v20  ;;  %v6016_v3 = vpop.permute.xlu0 %1186 }
 0x4b7   : > { %7399 = vst [vmem:[#allocation67_spill] sm:$0xff] %v6016_v3 }
 0x4b9   : > { %v2865_v10 = vpop.trf.xlu1 }
 0x4ba   : > { %2867 = vxpose.xlu1.c.b16.start.end [1/1] (short) %v2848_v58, 128  ;;  %4251 = vmatprep.mubr.msk.bf16.mxu0 %vm588_vm2, %v2865_v10  ;;  %v6018_v11 = vpop.permute.xlu0 %1920 }
 0x4bb   : > { %7400 = vst [vmem:[#allocation68_spill] sm:$0xff] %v6018_v11 }
 0x4bd   : > { %v2866_v63 = vpop.trf.xlu1 }
 0x4be   : > { %4252 = vmatmul.mubr.msk.bf16.gmra.mxu0 %vm588_vm2, %v2866_v63  ;;  %v6020_v44 = vpop.permute.xlu0 %1206 }
 0x4bf   : > { %7401 = vst [vmem:[#allocation69_spill] sm:$0xff] %v6020_v44 }
 0x4c2   : > { %v6022_v30 = vpop.permute.xlu0 %1940 }
 0x4c3   : > { %7402 = vst [vmem:[#allocation70_spill] sm:$0xff] %v6022_v30 }
 0x4c6   : > { %v6028_v58 = vpop.permute.xlu0 %1196 }
 0x4c7   : > { %7405 = vst [vmem:[#allocation73_spill] sm:$0xff] %v6028_v58 }
 0x4ca   : > { %v6032_v24 = vpop.permute.xlu0 %1930 }
 0x4cb   : > { %7407 = vst [vmem:[#allocation75_spill] sm:$0xff] %v6032_v24 }
 0x4ce   : > { %v1227_v3 = vpop.permute.xlu0 %1226 }
 0x4d2   : > { %v1961_v44 = vpop.permute.xlu0 %1960 }
 0x4da   : > { %v6024_v20 = vpop.permute.xlu1 %1201 }
 0x4db   : > { %7403 = vst [vmem:[#allocation71_spill] sm:$0xff] %v6024_v20  ;;  %v1217_v20 = vpop.permute.xlu0 %1216 }
 0x4de   : > { %v6026_v50 = vpop.permute.xlu1 %1935 }
 0x4df   : > { %7404 = vst [vmem:[#allocation72_spill] sm:$0xff] %v6026_v50  ;;  %v1951_v58 = vpop.permute.xlu0 %1950 }
 0x4e2   : > { %v6030_v10 = vpop.permute.xlu1 %1121 }
 0x4e3   : > { %7406 = vst [vmem:[#allocation74_spill] sm:$0xff] %v6030_v10  ;;  %v1247_v24 = vpop.permute.xlu0 %1246 }
 0x4e4   : > { %v1284_v54 = vmul.f32 %v5788_v2, %v1247_v24  ;;  %v2015_v2 = vmul.f32 %v5777_v4, %v5983_v8 }
 0x4e6   : > { %v6034_v63 = vpop.permute.xlu1 %1855  ;;  %v2050_v39 = vadd.f32 %v2018_v57, %v1284_v54  ;;  %v2014_v54 = vmul.f32 %v5766_v47, %v1961_v44 }
 0x4e7   : > { %7408 = vst [vmem:[#allocation76_spill] sm:$0xff] %v6034_v63 }
 0x4ea   : > { %v6036_v53 = vpop.permute.xlu1 %1191 }
 0x4eb   : > { %7409 = vst [vmem:[#allocation77_spill] sm:$0xff] %v6036_v53  ;;  %v2003_v53 = vmul.f32 %v5687_v42, %v5951_v16 }
 0x4ee   : > { %v6038_v11 = vpop.permute.xlu1 %1925 }
 0x4ef   : > { %7410 = vst [vmem:[#allocation78_spill] sm:$0xff] %v6038_v11  ;;  %v1237_v11 = vpop.permute.xlu0 %1236 }
 0x4f2   : > { %v6040_v36 = vpop.permute.xlu1 %1111 }
 0x4f3   : > { %7411 = vst [vmem:[#allocation79_spill] sm:$0xff] %v6040_v36  ;;  %v2002_v36 = vmul.f32 %v5667_v23, %v1901_v59  ;;  %v1971_v48 = vpop.permute.xlu0 %1970  ;;  %v7419_v59 = vld [vmem:[#allocation21_spill] sm:$0xff] }
 0x4f6   : > { %v6042_v30 = vpop.permute.xlu1 %1845 }
 0x4f7   : > { %7412 = vst [vmem:[#allocation80_spill] sm:$0xff] %v6042_v30  ;;  %v1269_v30 = vmul.f32 %v5677_v32, %v5945_v41  ;;  %v2001_v32 = vmul.f32 %v5699_v60, %v5966_v19  ;;  %v1282_v60 = vmul.f32 %v5801_v18, %v1237_v11  ;;  %v2013_v18 = vmul.f32 %v5792_v0, %v5991_v17 }
 0x4f8   : > { %v1279_v11 = vmul.f32 %v5784_v34, %v5986_v5  ;;  %v7420_v34 = vld [vmem:[#allocation28_spill] sm:$0xff] }
 0x4f9   : > { %v2035_v25 = vadd.f32 %v2003_v53, %v1269_v30  ;;  %v7418_v30 = vld [vmem:[#allocation57_spill] sm:$0xff]  ;;  %v2011_v5 = vmul.f32 %v7420_v34, %v7419_v59  ;;  %v7424_v53 = vld [vmem:[#allocation56_spill] sm:$0xff] }
 0x4fa   : > { %v6044_v50 = vpop.permute.xlu1 %1181  ;;  %v7450_v59 = vld [vmem:[#allocation53_spill] sm:$0xff] }
 0x4fb   : > { %7413 = vst [vmem:[#allocation81_spill] sm:$0xff] %v6044_v50 }
 0x4fe   : > { %v6046_v35 = vpop.permute.xlu1 %1915 }
 0x4ff   : > { %7414 = vst [vmem:[#allocation82_spill] sm:$0xff] %v6046_v35  ;;  %v1285_v35 = vmul.f32 %v5799_v9, %v1252_v6  ;;  %v2016_v9 = vmul.f32 %v5805_v45, %v1971_v48  ;;  %v1266_v45 = vmul.f32 %v5672_v15, %v1157_v26  ;;  %v1998_v15 = vmul.f32 %v5638_v12, %v6002_v22  ;;  %v7421_v6 = vld [vmem:[#allocation66_spill] sm:$0xff]  ;;  %v7423_v22 = vld [vmem:[#allocation36_spill] sm:$0xff] }
 0x500   : > { %v1263_v57 = vmul.f32 %v7424_v53, %v7423_v22  ;;  %v7426_v26 = vld [vmem:[#allocation32_spill] sm:$0xff]  ;;  %v7454_v53 = vld [vmem:[#allocation51_spill] sm:$0xff] }
 0x501   : > { %v7453_v22 = vld [vmem:[#allocation24_spill] sm:$0xff] }
 0x502   : > { %v6048_v10 = vpop.permute.xlu1 %1101 }
 0x503   : > { %7415 = vst [vmem:[#allocation83_spill] sm:$0xff] %v6048_v10 }
 0x506   : > { %v6050_v63 = vpop.permute.xlu1 %1835 }
 0x507   : > { %7416 = vst [vmem:[#allocation84_spill] sm:$0xff] %v6050_v63  ;;  %v1268_v63 = vmul.f32 %v5659_v7, %v1167_v61  ;;  %v1267_v7 = vmul.f32 %v5691_v28, %v5961_v1  ;;  %v2048_v28 = vadd.f32 %v2016_v9, %v1282_v60  ;;  %v7425_v61 = vld [vmem:[#allocation70_spill] sm:$0xff] }
 0x508   : > { %v2010_v44 = vmul.f32 %v7426_v26, %v7425_v61  ;;  %v7455_v61 = vld [vmem:[#allocation74_spill] sm:$0xff]  ;;  %v7456_v26 = vld [vmem:[#allocation52_spill] sm:$0xff] }
 0x509   : > { %v2034_v16 = vadd.f32 %v2002_v36, %v1268_v63  ;;  %v2033_v48 = vadd.f32 %v2001_v32, %v1267_v7  ;;  %v7430_v63 = vld [vmem:[#allocation54_spill] sm:$0xff] }
 0x50a   : > { %v1986_v50 = vpop.permute.xlu1 %1985 }
 0x50b   : > { %v2019_v10 = vmul.f32 %v5808_v49, %v1986_v50  ;;  %v2059_v23 = vpack.c.bf16 %v2035_v25, %v2034_v16  ;;  %v2000_v49 = vmul.f32 %v5682_v33, %v1891_v29  ;;  %v1280_v33 = vmul.f32 %v5758_v46, %v1227_v3  ;;  %v6097_v29 = vpop.permute.xlu0 %1106  ;;  %v7428_v50 = vld [vmem:[#allocation27_spill] sm:$0xff] }
 0x50c   : > { %v1265_v46 = vmul.f32 %v5640_v14, %v5929_v43  ;;  %v2045_v3 = vadd.f32 %v2013_v18, %v1279_v11  ;;  %v7417_v43 = vld [vmem:[#allocation16_spill] sm:$0xff]  ;;  %v7446_v11 = vld [vmem:[#allocation45_spill] sm:$0xff] }
 0x50d   : > { %v2051_v42 = vadd.f32 %v2019_v10, %v1285_v35  ;;  %v2032_v47 = vadd.f32 %v2000_v49, %v1266_v45  ;;  %v2046_v19 = vadd.f32 %v2014_v54, %v1280_v33  ;;  %v7429_v10 = vld [vmem:[#allocation65_spill] sm:$0xff]  ;;  %v7433_v54 = vld [vmem:[#allocation38_spill] sm:$0xff] }
 0x50e   : > { %v1242_v52 = vpop.permute.xlu1 %1241  ;;  %v7436_v45 = vld [vmem:[#allocation33_spill] sm:$0xff] }
 0x50f   : > { %v2067_v21 = vpack.c.bf16 %v2051_v42, %v2050_v39  ;;  %v1281_v39 = vmul.f32 %v5770_v55, %v5977_v13  ;;  %v1283_v35 = vmul.f32 %v5813_v37, %v1242_v52  ;;  %v1999_v55 = vmul.f32 %v5647_v27, %v5933_v38  ;;  %v1841_v7 = vpop.permute.xlu0 %1840 }
 0x510   : > { %v2058_v25 = vpack.c.bf16 %v2033_v48, %v2032_v47  ;;  %v1264_v27 = vmul.f32 %v5631_v51, %v5999_v31  ;;  %v1278_v13 = vmul.f32 %v5773_v62, %v1217_v20  ;;  %v7422_v62 = vld [vmem:[#allocation55_spill] sm:$0xff]  ;;  %v1262_v42 = vmul.f32 %v7430_v63, %v7429_v10  ;;  %v7439_v47 = vld [vmem:[#allocation34_spill] sm:$0xff]  ;;  %v7459_v63 = vld [vmem:[#allocation77_spill] sm:$0xff] }
 0x511   : > { %4065 = vmatprep.subr.bf16.mxu1 %v2067_v21  ;;  %v2047_v41 = vadd.f32 %v2015_v2, %v1281_v39  ;;  %v2031_v38 = vadd.f32 %v1999_v55, %v1265_v46  ;;  %v1996_v31 = vmul.f32 %v7422_v62, %v7421_v6  ;;  %v7427_v20 = vld [vmem:[#allocation35_spill] sm:$0xff]  ;;  %v7431_v21 = vld [vmem:[#allocation69_spill] sm:$0xff]  ;;  %v7452_v6 = vld [vmem:[#allocation62_spill] sm:$0xff] }
 0x512   : > { %4066 = vmatpush3.bf16.xpose.msra.mxu1 %v2059_v23  ;;  %v1976_v24 = vpop.permute.xlu1 %1975  ;;  %v2030_v12 = vadd.f32 %v1998_v15, %v1264_v27  ;;  %v7432_v23 = vld [vmem:[#allocation30_spill] sm:$0xff]  ;;  %v7441_v55 = vld [vmem:[#allocation75_spill] sm:$0xff] }
 0x513   : > { %v2017_v4 = vmul.f32 %v5820_v40, %v1976_v24  ;;  %v2065_v37 = vpack.c.bf16 %v2047_v41, %v2046_v19  ;;  %v2012_v40 = vmul.f32 %v5780_v56, %v1951_v58  ;;  %v1997_v56 = vmul.f32 %v7418_v30, %v7417_v43  ;;  %v7434_v24 = vld [vmem:[#allocation50_spill] sm:$0xff]  ;;  %v7437_v41 = vld [vmem:[#allocation23_spill] sm:$0xff]  ;;  %v7440_v19 = vld [vmem:[#allocation48_spill] sm:$0xff] }
 0x514   : > { %v2057_v14 = vpack.c.bf16 %v2031_v38, %v2030_v12  ;;  %v1277_v58 = vmul.f32 %v7428_v50, %v7427_v20  ;;  %v1276_v32 = vmul.f32 %v7432_v23, %v7431_v21  ;;  %v2028_v9 = vadd.f32 %v1996_v31, %v1262_v42  ;;  %v7444_v15 = vld [vmem:[#allocation31_spill] sm:$0xff]  ;;  %v7457_v20 = vld [vmem:[#allocation68_spill] sm:$0xff]  ;;  %v7462_v21 = vld [vmem:[#allocation49_spill] sm:$0xff] }
 0x515   : > { %v2049_v1 = vadd.f32 %v2017_v4, %v1283_v35  ;;  %v2044_v8 = vadd.f32 %v2012_v40, %v1278_v13  ;;  %v2029_v16 = vadd.f32 %v1997_v56, %v1263_v57  ;;  %v1995_v39 = vmul.f32 %v7434_v24, %v7433_v54  ;;  %v7435_v4 = vld [vmem:[#allocation72_spill] sm:$0xff]  ;;  %v7445_v40 = vld [vmem:[#allocation19_spill] sm:$0xff]  ;;  %v7447_v13 = vld [vmem:[#allocation73_spill] sm:$0xff] }
 0x516   : > { %v2043_v2 = vadd.f32 %v2011_v5, %v1277_v58  ;;  %v2042_v49 = vadd.f32 %v2010_v44, %v1276_v32  ;;  %v2009_v48 = vmul.f32 %v7436_v45, %v7435_v4  ;;  %v1260_v27 = vmul.f32 %v7446_v11, %v7445_v40  ;;  %v7458_v50 = vld [vmem:[#allocation59_spill] sm:$0xff]  ;;  %v7460_v42 = vld [vmem:[#allocation60_spill] sm:$0xff]  ;;  %v7466_v45 = vld [vmem:[#allocation42_spill] sm:$0xff] }
 0x517   : > { %v2066_v36 = vpack.c.bf16 %v2049_v1, %v2048_v28  ;;  %v2064_v51 = vpack.c.bf16 %v2045_v3, %v2044_v8  ;;  %v2056_v60 = vpack.c.bf16 %v2029_v16, %v2028_v9  ;;  %v7438_v28 = vld [vmem:[#allocation47_spill] sm:$0xff]  ;;  %v1177_v8 = vpop.permute.xlu0 %1176  ;;  %v1992_v57 = vmul.f32 %v7454_v53, %v7453_v22  ;;  %v7465_v4 = vld [vmem:[#allocation80_spill] sm:$0xff]  ;;  %v7473_v40 = vld [vmem:[#allocation81_spill] sm:$0xff] }
 0x518   : > { %v2063_v33 = vpack.c.bf16 %v2043_v2, %v2042_v49  ;;  %v1994_v1 = vmul.f32 %v7438_v28, %v7437_v41  ;;  %v7448_v3 = vld [vmem:[#allocation63_spill] sm:$0xff]  ;;  %v1259_v44 = vmul.f32 %v7456_v26, %v7455_v61  ;;  %v2006_v58 = vmul.f32 %v7458_v50, %v7457_v20  ;;  %v7464_v49 = vld [vmem:[#allocation58_spill] sm:$0xff]  ;;  %v7474_v11 = vld [vmem:[#allocation25_spill] sm:$0xff] }
 0x519   : > { %4067 = vmatprep.subr.bf16.mxu1 %v2066_v36  ;;  %v1261_v36 = vmul.f32 %v7440_v19, %v7439_v47  ;;  %v1274_v12 = vmul.f32 %v7448_v3, %v7447_v13  ;;  %v1273_v16 = vmul.f32 %v7460_v42, %v7459_v63  ;;  %v7463_v9 = vld [vmem:[#allocation67_spill] sm:$0xff]  ;;  %v7467_v28 = vld [vmem:[#allocation82_spill] sm:$0xff]  ;;  %v7476_v3 = vld [vmem:[#allocation61_spill] sm:$0xff] }
 0x51a   : > { %4068 = vmatpush3.bf16.xpose.msra.mxu1 %v2058_v25  ;;  %v7442_v25 = vld [vmem:[#allocation64_spill] sm:$0xff]  ;;  %v2026_v43 = vadd.f32 %v1994_v1, %v1260_v27  ;;  %v1272_v54 = vmul.f32 %v7464_v49, %v7463_v9  ;;  %v7468_v1 = vld [vmem:[#allocation26_spill] sm:$0xff]  ;;  %v1271_v27 = vmul.f32 %v7474_v11, %v7473_v40 }
 0x51b   : > { %4069 = vmatprep.subr.bf16.mxu1 %v2065_v37  ;;  %v2008_v18 = vmul.f32 %v7442_v25, %v7441_v55  ;;  %v7443_v37 = vld [vmem:[#allocation71_spill] sm:$0xff]  ;;  %v2027_v38 = vadd.f32 %v1995_v39, %v1261_v36  ;;  %v1911_v10 = vpop.permute.xlu0 %1910  ;;  %v2005_v47 = vmul.f32 %v7468_v1, %v7467_v28  ;;  %v7469_v36 = vld [vmem:[#allocation40_spill] sm:$0xff] }
 0x51c   : > { %v2875_v0 = vpop.trf.xlu1  ;;  %v1275_v46 = vmul.f32 %v7444_v15, %v7443_v37  ;;  %v1990_v55 = vmul.f32 %v7469_v36, %v1841_v7  ;;  %v7470_v25 = vld [vmem:[#allocation79_spill] sm:$0xff]  ;;  %v7472_v15 = vld [vmem:[#allocation29_spill] sm:$0xff]  ;;  %v7483_v49 = vld [vmem:[#allocation20_spill] sm:$0xff] }
 0x51d   : > { %4255 = vmatprep.mubr.msk.bf16.mxu0 %vm588_vm2, %v2875_v0  ;;  %v2040_v30 = vadd.f32 %v2008_v18, %v1274_v12  ;;  %v2055_v56 = vpack.c.bf16 %v2027_v38, %v2026_v43  ;;  %v7471_v18 = vld [vmem:[#allocation37_spill] sm:$0xff]  ;;  %v7475_v38 = vld [vmem:[#allocation39_spill] sm:$0xff]  ;;  %v1270_v12 = vmul.f32 %v7476_v3, %v1177_v8 }
 0x51e   : > { %v1257_v37 = vmul.f32 %v7471_v18, %v7470_v25 }
 0x51f   : > { %v1097_v41 = vpop.permute.xlu0 %1096 }
 0x520   : > { %v2876_v17 = vpop.trf.xlu1 }
 0x521   : > { %4256 = vmatmul.mubr.msk.bf16.gmra.mxu0 %vm588_vm2, %v2876_v17  ;;  %v7449_v17 = vld [vmem:[#allocation76_spill] sm:$0xff] }
 0x522   : > { %4070 = vmatpush3.bf16.xpose.msra.mxu1 %v2057_v14  ;;  %v2041_v14 = vadd.f32 %v2009_v48, %v1275_v46  ;;  %v1993_v34 = vmul.f32 %v7450_v59, %v7449_v17  ;;  %v1991_v48 = vmul.f32 %v7466_v45, %v7465_v4  ;;  %v2004_v46 = vmul.f32 %v7472_v15, %v1911_v10  ;;  %v7477_v17 = vld [vmem:[#allocation84_spill] sm:$0xff]  ;;  %v7478_v59 = vld [vmem:[#allocation46_spill] sm:$0xff] }
 0x523   : > { %4071 = vmatprep.subr.bf16.mxu1 %v2064_v51  ;;  %v7451_v51 = vld [vmem:[#allocation78_spill] sm:$0xff]  ;;  %v1831_v7 = vpop.permute.xlu0 %1830 }
 0x524   : > { %v2877_v52 = vpop.trf.xlu1  ;;  %v2007_v62 = vmul.f32 %v7452_v6, %v7451_v51  ;;  %v2062_v31 = vpack.c.bf16 %v2041_v14, %v2040_v30  ;;  %v2025_v32 = vadd.f32 %v1993_v34, %v1259_v44  ;;  %v2023_v13 = vadd.f32 %v1991_v48, %v1257_v37  ;;  %v7479_v51 = vld [vmem:[#allocation43_spill] sm:$0xff] }
 0x525   : > { %4259 = vmatprep.mubr.msk.bf16.mxu0 %vm588_vm2, %v2877_v52  ;;  %v7461_v52 = vld [vmem:[#allocation22_spill] sm:$0xff]  ;;  %v2037_v14 = vadd.f32 %v2005_v47, %v1271_v27  ;;  %v2036_v30 = vadd.f32 %v2004_v46, %v1270_v12  ;;  %v1989_v34 = vmul.f32 %v7478_v59, %v7477_v17  ;;  %v1988_v6 = vmul.f32 %v7479_v51, %v1831_v7 }
 0x526   : > { %v1258_v23 = vmul.f32 %v7462_v21, %v7461_v52  ;;  %v2039_v24 = vadd.f32 %v2007_v62, %v1273_v16  ;;  %v7480_v62 = vld [vmem:[#allocation83_spill] sm:$0xff] }
 0x528   : > { %v2878_v35 = vpop.trf.xlu1  ;;  %v2024_v39 = vadd.f32 %v1992_v57, %v1258_v23 }
 0x529   : > { %4260 = vmatmul.mubr.msk.bf16.gmra.mxu0 %vm588_vm2, %v2878_v35 }
 0x52a   : > { %4072 = vmatpush3.bf16.xpose.msra.mxu1 %v2056_v60  ;;  %v2038_v60 = vadd.f32 %v2006_v58, %v1272_v54  ;;  %v2054_v35 = vpack.c.bf16 %v2025_v32, %v2024_v39  ;;  %v2125_v39 = vpop.trf.xlu0 }
 0x52b   : > { %4073 = vmatprep.subr.bf16.mxu1 %v2063_v33 }
 0x52c   : > { %v2879_v0 = vpop.trf.xlu1  ;;  %v2061_v19 = vpack.c.bf16 %v2039_v24, %v2038_v60  ;;  %v4361_v24 = vld [vmem:[%s5202_s29] sm:$0xff]   ;;  %v543_v60 = vld [vmem:[%s5195_s16 + $0x8] sm:$0xf]  ;;  %s5029_s16 = smov [#allocation7]  }
 0x52d   : > { %4263 = vmatprep.mubr.msk.bf16.mxu0 %vm588_vm2, %v2879_v0  ;;  %v1256_v0 = vmul.f32 %v7475_v38, %v6097_v29  ;;  %v7482_v29 = vld [vmem:[#allocation41_spill] sm:$0xff]  ;;  %4081 = vmatprep.mubr.bf16.mxu1 %v4361_v24  ;;  %s4940_s25 = sshll.u32 %s5029_s16, 4  ;;  %s4941_s25 = int_to_ptr.vmem [resolvable:$false] %s4940_s25 }
 0x52e   : > { %v1254_v53 = vmul.f32 %v7482_v29, %v1097_v41  ;;  %v2126_v4 = vpop.trf.xlu0  ;;  %s4942_s15 = scalar_lea.vmem %s4941_s25, 1024  ;;  %p4943_p6 = scmp.lt.s32.totalorder %s7129_s20, %s4941_s25 }
 0x52f   : > { %v2022_v43 = vadd.f32 %v1990_v55, %v1256_v0  ;;  %p4944_p4 = scmp.lt.s32.totalorder %s4942_s15, %s4936_s13 }
 0x530   : > { %v2880_v5 = vpop.trf.xlu1  ;;  %v2020_v8 = vadd.f32 %v1988_v6, %v1254_v53 }
 0x531   : > { %4264 = vmatmul.mubr.msk.bf16.gmra.mxu0 %vm588_vm2, %v2880_v5  ;;  %v2060_v5 = vpack.c.bf16 %v2037_v14, %v2036_v30  ;;  %p4945_p7 = por %p4944_p4, %p4943_p6 }
 0x532   : > { %4074 = vmatpush3.bf16.xpose.msra.mxu1 %v2055_v56  ;;  %v2053_v56 = vpack.c.bf16 %v2023_v13, %v2022_v43  ;;  %v2127_v45 = vpop.trf.xlu0 }
 0x533   : > { %4075 = vmatprep.subr.bf16.mxu1 %v2062_v31  ;;  %v7481_v31 = vld [vmem:[#allocation44_spill] sm:$0xff]  ;;  %p4946_p10 = pnand %p4945_p7, %p4939_p5 }
 0x534   : > { %v2881_v2 = vpop.trf.xlu1  ;;  %v1255_v22 = vmul.f32 %v7481_v31, %v7480_v62 }
 0x535   : > { %4267 = vmatprep.mubr.msk.bf16.mxu0 %vm588_vm2, %v2881_v2 }
 0x536   : > { %v2021_v57 = vadd.f32 %v1989_v34, %v1255_v22  ;;  %v2128_v48 = vpop.trf.xlu0 }
 0x538   : > { %v2882_v33 = vpop.trf.xlu1  ;;  %v2052_v61 = vpack.c.bf16 %v2021_v57, %v2020_v8 }
 0x539   : > { %4268 = vmatmul.mubr.msk.bf16.gmra.mxu0 %vm588_vm2, %v2882_v33 }
 0x53a   : > { %4076 = vmatpush3.bf16.xpose.msra.mxu1 %v2054_v35  ;;  %v2198_v35 = vsel %vm637_vm1, %v543_v60, 0  ;;  %v2129_v33 = vpop.trf.xlu0 }
 0x53b   : > { %4077 = vmatprep.subr.bf16.mxu1 %v2061_v19 }
 0x53e   : > { %v2130_v41 = vpop.trf.xlu0 }
 0x542   : > { %4078 = vmatpush3.bf16.xpose.msra.mxu1 %v2053_v56  ;;  %v2131_v28 = vpop.trf.xlu0 }
 0x543   : > { %4079 = vmatprep.subr.bf16.mxu1 %v2060_v5 }
 0x546   : > { %v2132_v1 = vpop.trf.xlu0 }
 0x54a   : > { %4080 = vmatpush3.bf16.xpose.msra.mxu1 %v2052_v61  ;;  %v2141_v47 = vpop.trf.xlu0 }
 0x54b   : > { %4281 = vmatprep.subr.msk.bf16.mxu1 %vm637_vm1, %v543_v60 }
 0x54e   : > { %v2142_v36 = vpop.trf.xlu0 }
 0x551   : > { %4082 = vmatmul.mubr.bf16.vlgmr.msra.gmra.mxu1 %v4361_v24 }
 0x552   : > { %4205 = vmatprep.mubr.msk.bf16.mxu1 %vm588_vm2, %v2125_v39  ;;  %4204 = vmatpush3.bf16.msra.mxu1 %v2198_v35  ;;  %v2143_v18 = vpop.trf.xlu0 }
 0x556   : > { %v2144_v46 = vpop.trf.xlu0 }
 0x559   : > { %4206 = vmatmul.mubr.msk.bf16.vlgmr.msra.gmra.mxu1 %vm588_vm2, %v2126_v4 }
 0x55a   : > { %4209 = vmatprep.mubr.msk.bf16.mxu1 %vm588_vm2, %v2127_v45  ;;  %v2145_v27 = vpop.trf.xlu0 }
 0x55e   : > { %v2146_v13 = vpop.trf.xlu0 }
 0x561   : > { %4210 = vmatmul.mubr.msk.bf16.gmra.mxu1 %vm588_vm2, %v2128_v48 }
 0x562   : > { %4213 = vmatprep.mubr.msk.bf16.mxu1 %vm588_vm2, %v2129_v33  ;;  %v2147_v14 = vpop.trf.xlu0 }
 0x566   : > { %v6169_v26 = vpop.f32.mrf.mxu0  ;;  %v2148_v7 = vpop.trf.xlu0 }
 0x568   : > { %v6171_v44 = vpop.f32.mrf.mxu0 }
 0x569   : > { %4214 = vmatmul.mubr.msk.bf16.gmra.mxu1 %vm588_vm2, %v2130_v41 }
 0x56a   : > { %v6173_v20 = vpop.f32.mrf.mxu0  ;;  %4217 = vmatprep.mubr.msk.bf16.mxu1 %vm588_vm2, %v2131_v28 }
 0x56c   : > { %v6175_v50 = vpop.f32.mrf.mxu0 }
 0x56e   : > { %v6177_v58 = vpop.f32.mrf.mxu0 }
 0x570   : > { %v6179_v10 = vpop.f32.mrf.mxu0 }
 0x571   : > { %4218 = vmatmul.mubr.msk.bf16.gmra.mxu1 %vm588_vm2, %v2132_v1 }
 0x572   : > { %v6181_v63 = vpop.f32.mrf.mxu0  ;;  %4221 = vmatprep.mubr.msk.bf16.mxu1 %vm588_vm2, %v2141_v47 }
 0x574   : > { %v6183_v42 = vpop.f32.mrf.mxu0 }
 0x576   : > { %v6185_v16 = vpop.f32.mrf.mxu0 }
 0x578   : > { %v6187_v52 = vpop.f32.mrf.mxu0 }
 0x579   : > { %4222 = vmatmul.mubr.msk.bf16.gmra.mxu1 %vm588_vm2, %v2142_v36 }
 0x57a   : > { %v6189_v21 = vpop.f32.mrf.mxu0  ;;  %4225 = vmatprep.mubr.msk.bf16.mxu1 %vm588_vm2, %v2143_v18 }
 0x57b   : > { %v6264_v57 = vadd.f32 %v6189_v21, %v7483_v49 }
 0x57c   : > { %v6191_v23 = vpop.f32.mrf.mxu0 }
 0x57d   : > { %v6282_v21 = vadd.f32 %v6191_v23, %v7483_v49  ;;  %v6300_v23 = vadd.f32 %v6181_v63, %v7483_v49  ;;  %v6318_v63 = vadd.f32 %v6183_v42, %v7483_v49  ;;  %v6337_v42 = vadd.f32 %v6173_v20, %v7483_v49 }
 0x57e   : > { %v6193_v32 = vpop.f32.mrf.mxu0  ;;  %v6357_v20 = vadd.f32 %v6175_v50, %v7483_v49 }
 0x57f   : > { %v6242_v62 = vadd.f32 %v6193_v32, %v7483_v49  ;;  %v6277_v32 = vadd.f32 %v6185_v16, %v7483_v49  ;;  %v6295_v16 = vadd.f32 %v6187_v52, %v7483_v49  ;;  %v6313_v52 = vadd.f32 %v6177_v58, %v7483_v49 }
 0x580   : > { %v6195_v2 = vpop.f32.mrf.mxu0  ;;  %v6332_v58 = vadd.f32 %v6179_v10, %v7483_v49  ;;  %v6352_v10 = vadd.f32 %v6169_v26, %v7483_v49  ;;  %v6368_v26 = vadd.f32 %v6171_v44, %v7483_v49 }
 0x581   : > { %4226 = vmatmul.mubr.msk.bf16.gmra.mxu1 %vm588_vm2, %v2144_v46  ;;  %v6259_v53 = vadd.f32 %v6195_v2, %v7483_v49 }
 0x582   : > { %v4254_v9 = vpop.f32.mrf.mxu0  ;;  %4229 = vmatprep.mubr.msk.bf16.mxu1 %vm588_vm2, %v2145_v27 }
 0x583   : > { %v6198_v54 = vadd.f32 %v4254_v9, %v7483_v49 }
 0x584   : > { %v3019_v19 = vpop.f32.mrf.mxu0 }
 0x585   : > { %3125 = vmax.xlane.f32.xlu1 %v6198_v54  ;;  %v6246_v31 = vadd.f32 %v3019_v19, %v7483_v49 }
 0x589   : > { %4230 = vmatmul.mubr.msk.bf16.gmra.mxu1 %vm588_vm2, %v2146_v13 }
 0x58a   : > { %4233 = vmatprep.mubr.msk.bf16.mxu1 %vm588_vm2, %v2147_v14 }
 0x591   : > { %4234 = vmatmul.mubr.msk.bf16.gmra.mxu1 %vm588_vm2, %v2148_v7 }
 0x5e1   : > { %v6214_v55 = vpop.f32.mrf.mxu0 }
 0x5e2   : > { %v6342_v4 = vadd.f32 %v6214_v55, %v7483_v49 }
 0x5e3   : > { %v6216_v25 = vpop.f32.mrf.mxu0 }
 0x5e4   : > { %v6362_v48 = vadd.f32 %v6216_v25, %v7483_v49 }
 0x5e5   : > { %v6219_v37 = vpop.f32.mrf.mxu0 }
 0x5e6   : > { %v6327_v35 = vadd.f32 %v6219_v37, %v7483_v49 }
 0x5e7   : > { %v6222_v15 = vpop.f32.mrf.mxu0 }
 0x5e8   : > { %v6347_v45 = vadd.f32 %v6222_v15, %v7483_v49 }
 0x5e9   : > { %v4261_v40 = vpop.f32.mrf.mxu0 }
 0x5ea   : > { %v6304_v24 = vadd.f32 %v4261_v40, %v7483_v49 }
 0x5eb   : > { %v3048_v11 = vpop.f32.mrf.mxu0 }
 0x5ec   : > { %v6322_v60 = vadd.f32 %v3048_v11, %v7483_v49 }
 0x5ed   : > { %v4262_v38 = vpop.f32.mrf.mxu0 }
 0x5ee   : > { %v6290_v9 = vadd.f32 %v4262_v38, %v7483_v49 }
 0x5ef   : > { %v3051_v0 = vpop.f32.mrf.mxu0 }
 0x5f0   : > { %v6308_v39 = vadd.f32 %v3051_v0, %v7483_v49 }
 0x5f1   : > { %v4265_v3 = vpop.f32.mrf.mxu0 }
 0x5f2   : > { %v6268_v8 = vadd.f32 %v4265_v3, %v7483_v49 }
 0x5f3   : > { %v3064_v12 = vpop.f32.mrf.mxu0 }
 0x5f4   : > { %v6286_v2 = vadd.f32 %v3064_v12, %v7483_v49 }
 0x5f5   : > { %v4266_v43 = vpop.f32.mrf.mxu0 }
 0x5f6   : > { %v6254_v29 = vadd.f32 %v4266_v43, %v7483_v49 }
 0x5f7   : > { %v3067_v30 = vpop.f32.mrf.mxu0 }
 0x5f8   : > { %v6272_v61 = vadd.f32 %v3067_v30, %v7483_v49 }
 0x5f9   : > { %v4269_v56 = vpop.f32.mrf.mxu0 }
 0x5fa   : > { %v6229_v17 = vadd.f32 %v4269_v56, %v7483_v49 }
 0x5fb   : > { %v3080_v59 = vpop.f32.mrf.mxu0 }
 0x5fc   : > { %3155 = vmax.xlane.f32.xlu0 %v6229_v17  ;;  %v6250_v22 = vadd.f32 %v3080_v59, %v7483_v49 }
 0x5fd   : > { %v4270_v34 = vpop.f32.mrf.mxu0 }
 0x5fe   : > { %v6234_v5 = vadd.f32 %v4270_v34, %v7483_v49 }
 0x5ff   : > { %v3083_v51 = vpop.f32.mrf.mxu0 }
 0x600   : > { %v6237_v6 = vadd.f32 %v3083_v51, %v7483_v49  ;;  %3157 = vmax.xlane.f32.xlu0 %v6234_v5 }
 0x602   : > { %3153 = vmax.xlane.f32.xlu1 %v6237_v6 }
 0x604   : > { %3123 = vmax.xlane.f32.xlu0 %v6242_v62 }
 0x606   : > { %3121 = vmax.xlane.f32.xlu1 %v6246_v31 }
 0x608   : > { %3151 = vmax.xlane.f32.xlu0 %v6250_v22 }
 0x60a   : > { %3149 = vmax.xlane.f32.xlu1 %v6254_v29 }
 0x60c   : > { %3119 = vmax.xlane.f32.xlu0 %v6259_v53 }
 0x60e   : > { %3117 = vmax.xlane.f32.xlu1 %v6264_v57  ;;  %v3126_v41 = vpop.xlane.xlu1 %3125 }
 0x60f   : > { %v3174_v1 = vsub.f32 %v6198_v54, %v3126_v41 }
 0x610   : > { %3147 = vmax.xlane.f32.xlu0 %v6268_v8 }
 0x611   : > { %v3221_v25 = vmul.f32 1.442695, %v3174_v1 }
 0x612   : > { %3145 = vmax.xlane.f32.xlu1 %v6272_v61 }
 0x614   : > { %3115 = vmax.xlane.f32.xlu0 %v6277_v32 }
 0x616   : > { %3113 = vmax.xlane.f32.xlu1 %v6282_v21 }
 0x618   : > { %3143 = vmax.xlane.f32.xlu0 %v6286_v2 }
 0x61a   : > { %3141 = vmax.xlane.f32.xlu1 %v6290_v9 }
 0x61c   : > { %3111 = vmax.xlane.f32.xlu0 %v6295_v16 }
 0x61e   : > { %3109 = vmax.xlane.f32.xlu1 %v6300_v23 }
 0x620   : > { %3139 = vmax.xlane.f32.xlu0 %v6304_v24 }
 0x622   : > { %3137 = vmax.xlane.f32.xlu1 %v6308_v39 }
 0x624   : > { %3107 = vmax.xlane.f32.xlu0 %v6313_v52 }
 0x626   : > { %3105 = vmax.xlane.f32.xlu1 %v6318_v63 }
 0x628   : > { %3135 = vmax.xlane.f32.xlu0 %v6322_v60 }
 0x62a   : > { %3133 = vmax.xlane.f32.xlu1 %v6327_v35 }
 0x62c   : > { %3103 = vmax.xlane.f32.xlu0 %v6332_v58 }
 0x62e   : > { %3101 = vmax.xlane.f32.xlu1 %v6337_v42 }
 0x630   : > { %3131 = vmax.xlane.f32.xlu0 %v6342_v4 }
 0x632   : > { %3129 = vmax.xlane.f32.xlu1 %v6347_v45 }
 0x634   : > { %3099 = vmax.xlane.f32.xlu0 %v6352_v10 }
 0x636   : > { %3097 = vmax.xlane.f32.xlu1 %v6357_v20 }
 0x638   : > { %3127 = vmax.xlane.f32.xlu0 %v6362_v48 }
 0x63c   : > { %3095 = vmax.xlane.f32.xlu0 %v6368_v26 }
 0x685   : > { %v3156_v33 = vpop.xlane.xlu0 %3155 }
 0x686   : > { %v3189_v50 = vsub.f32 %v6229_v17, %v3156_v33 }
 0x688   : > { %v3251_v28 = vmul.f32 1.442695, %v3189_v50 }
 0x689   : > { %v3158_v47 = vpop.xlane.xlu0 %3157 }
 0x68a   : > { %4619 = vpow2.f32 %v3251_v28  ;;  %v3190_v19 = vsub.f32 %v6234_v5, %v3158_v47 }
 0x68b   : > { %v3154_v36 = vpop.xlane.xlu1 %3153 }
 0x68c   : > { %v3253_v55 = vmul.f32 1.442695, %v3190_v19  ;;  %v3188_v18 = vsub.f32 %v6237_v6, %v3154_v36 }
 0x68d   : > { %v3124_v44 = vpop.xlane.xlu0 %3123 }
 0x68e   : > { %4621 = vpow2.f32 %v3253_v55  ;;  %v3173_v37 = vsub.f32 %v6242_v62, %v3124_v44  ;;  %v3249_v40 = vmul.f32 1.442695, %v3188_v18 }
 0x68f   : > { %v3122_v15 = vpop.xlane.xlu1 %3121  ;;  %4623 = vpow2.f32 %v3221_v25 }
 0x690   : > { %v3219_v46 = vmul.f32 1.442695, %v3173_v37  ;;  %v3172_v11 = vsub.f32 %v6246_v31, %v3122_v15 }
 0x691   : > { %v3152_v54 = vpop.xlane.xlu0 %3151 }
 0x692   : > { %4625 = vpow2.f32 %v3219_v46  ;;  %v3187_v27 = vsub.f32 %v6250_v22, %v3152_v54  ;;  %v3217_v13 = vmul.f32 1.442695, %v3172_v11 }
 0x693   : > { %v3150_v38 = vpop.xlane.xlu1 %3149  ;;  %4627 = vpow2.f32 %v3249_v40 }
 0x694   : > { %v3247_v0 = vmul.f32 1.442695, %v3187_v27  ;;  %v3186_v3 = vsub.f32 %v6254_v29, %v3150_v38 }
 0x695   : > { %v3120_v12 = vpop.xlane.xlu0 %3119 }
 0x696   : > { %4629 = vpow2.f32 %v3247_v0  ;;  %v3171_v14 = vsub.f32 %v6259_v53, %v3120_v12  ;;  %v3245_v56 = vmul.f32 1.442695, %v3186_v3 }
 0x697   : > { %v6380_v43 = vpop.eup %4619  ;;  %v3118_v30 = vpop.xlane.xlu1 %3117  ;;  %4631 = vpow2.f32 %v3217_v13 }
 0x698   : > { %7484 = vst [vmem:[#allocation16_spill] sm:$0xff] %v6380_v43  ;;  %v3215_v7 = vmul.f32 1.442695, %v3171_v14  ;;  %3315 = vadd.xlane.f32.xlu0 %v6380_v43  ;;  %v3170_v17 = vsub.f32 %v6264_v57, %v3118_v30 }
 0x699   : > { %v3148_v59 = vpop.xlane.xlu0 %3147 }
 0x69a   : > { %4633 = vpow2.f32 %v3215_v7  ;;  %v3185_v34 = vsub.f32 %v6268_v8, %v3148_v59  ;;  %v3213_v62 = vmul.f32 1.442695, %v3170_v17 }
 0x69b   : > { %v6385_v5 = vpop.eup %4621  ;;  %v3146_v51 = vpop.xlane.xlu1 %3145  ;;  %4635 = vpow2.f32 %v3245_v56 }
 0x69c   : > { %7485 = vst [vmem:[#allocation57_spill] sm:$0xff] %v6385_v5  ;;  %v3243_v6 = vmul.f32 1.442695, %v3185_v34  ;;  %3317 = vadd.xlane.f32.xlu1 %v6385_v5  ;;  %v3184_v31 = vsub.f32 %v6272_v61, %v3146_v51  ;;  %v6389_v29 = vpop.eup %4623 }
 0x69d   : > { %v3116_v22 = vpop.xlane.xlu0 %3115  ;;  %7486 = vst [vmem:[#allocation21_spill] sm:$0xff] %v6389_v29 }
 0x69e   : > { %4637 = vpow2.f32 %v3243_v6  ;;  %v3169_v53 = vsub.f32 %v6277_v32, %v3116_v22  ;;  %v3241_v41 = vmul.f32 1.442695, %v3184_v31 }
 0x69f   : > { %v6392_v57 = vpop.eup %4625  ;;  %v3114_v33 = vpop.xlane.xlu1 %3113  ;;  %4639 = vpow2.f32 %v3213_v62 }
 0x6a0   : > { %7487 = vst [vmem:[#allocation28_spill] sm:$0xff] %v6392_v57  ;;  %v3211_v8 = vmul.f32 1.442695, %v3169_v53  ;;  %3283 = vadd.xlane.f32.xlu0 %v6392_v57  ;;  %3285 = vadd.xlane.f32.xlu1 %v6389_v29  ;;  %v3168_v50 = vsub.f32 %v6282_v21, %v3114_v33  ;;  %v6397_v61 = vpop.eup %4627 }
 0x6a1   : > { %v3144_v28 = vpop.xlane.xlu0 %3143  ;;  %7488 = vst [vmem:[#allocation66_spill] sm:$0xff] %v6397_v61 }
 0x6a2   : > { %4641 = vpow2.f32 %v3211_v8  ;;  %v3183_v1 = vsub.f32 %v6286_v2, %v3144_v28  ;;  %v3209_v36 = vmul.f32 1.442695, %v3168_v50 }
 0x6a3   : > { %v6400_v47 = vpop.eup %4629  ;;  %v3142_v32 = vpop.xlane.xlu1 %3141  ;;  %4643 = vpow2.f32 %v3241_v41 }
 0x6a4   : > { %7489 = vst [vmem:[#allocation55_spill] sm:$0xff] %v6400_v47  ;;  %v3239_v19 = vmul.f32 1.442695, %v3183_v1  ;;  %3311 = vadd.xlane.f32.xlu0 %v6400_v47  ;;  %3313 = vadd.xlane.f32.xlu1 %v6397_v61  ;;  %v3182_v55 = vsub.f32 %v6290_v9, %v3142_v32  ;;  %v6405_v21 = vpop.eup %4631 }
 0x6a5   : > { %v3112_v25 = vpop.xlane.xlu0 %3111  ;;  %7490 = vst [vmem:[#allocation36_spill] sm:$0xff] %v6405_v21 }
 0x6a6   : > { %4645 = vpow2.f32 %v3239_v19  ;;  %v3167_v18 = vsub.f32 %v6295_v16, %v3112_v25  ;;  %v3237_v15 = vmul.f32 1.442695, %v3182_v55 }
 0x6a7   : > { %v6408_v44 = vpop.eup %4633  ;;  %v3110_v2 = vpop.xlane.xlu1 %3109  ;;  %4647 = vpow2.f32 %v3209_v36 }
 0x6a8   : > { %7491 = vst [vmem:[#allocation56_spill] sm:$0xff] %v6408_v44  ;;  %v3207_v37 = vmul.f32 1.442695, %v3167_v18  ;;  %3279 = vadd.xlane.f32.xlu0 %v6408_v44  ;;  %3281 = vadd.xlane.f32.xlu1 %v6405_v21  ;;  %v3166_v46 = vsub.f32 %v6300_v23, %v3110_v2  ;;  %v6413_v9 = vpop.eup %4635 }
 0x6a9   : > { %v3140_v40 = vpop.xlane.xlu0 %3139  ;;  %7492 = vst [vmem:[#allocation70_spill] sm:$0xff] %v6413_v9 }
 0x6aa   : > { %4649 = vpow2.f32 %v3207_v37  ;;  %v3181_v11 = vsub.f32 %v6304_v24, %v3140_v40  ;;  %v3205_v38 = vmul.f32 1.442695, %v3166_v46 }
 0x6ab   : > { %v6416_v54 = vpop.eup %4637  ;;  %v3138_v16 = vpop.xlane.xlu1 %3137  ;;  %4651 = vpow2.f32 %v3237_v15 }
 0x6ac   : > { %7493 = vst [vmem:[#allocation32_spill] sm:$0xff] %v6416_v54  ;;  %v3235_v27 = vmul.f32 1.442695, %v3181_v11  ;;  %3307 = vadd.xlane.f32.xlu0 %v6416_v54  ;;  %3309 = vadd.xlane.f32.xlu1 %v6413_v9  ;;  %v3180_v0 = vsub.f32 %v6308_v39, %v3138_v16  ;;  %v6421_v23 = vpop.eup %4639 }
 0x6ad   : > { %v3108_v13 = vpop.xlane.xlu0 %3107  ;;  %7494 = vst [vmem:[#allocation35_spill] sm:$0xff] %v6421_v23 }
 0x6ae   : > { %4653 = vpow2.f32 %v3235_v27  ;;  %v3165_v3 = vsub.f32 %v6313_v52, %v3108_v13  ;;  %v3233_v30 = vmul.f32 1.442695, %v3180_v0 }
 0x6af   : > { %v6424_v12 = vpop.eup %4641  ;;  %v3106_v24 = vpop.xlane.xlu1 %3105  ;;  %4655 = vpow2.f32 %v3205_v38 }
 0x6b0   : > { %v3203_v14 = vmul.f32 1.442695, %v3165_v3  ;;  %3275 = vadd.xlane.f32.xlu0 %v6424_v12  ;;  %3277 = vadd.xlane.f32.xlu1 %v6421_v23  ;;  %v3164_v7 = vsub.f32 %v6318_v63, %v3106_v24  ;;  %v6429_v39 = vpop.eup %4643 }
 0x6b1   : > { %v3136_v56 = vpop.xlane.xlu0 %3135  ;;  %7495 = vst [vmem:[#allocation27_spill] sm:$0xff] %v6429_v39 }
 0x6b2   : > { %4657 = vpow2.f32 %v3203_v14  ;;  %v3179_v17 = vsub.f32 %v6322_v60, %v3136_v56  ;;  %v3201_v51 = vmul.f32 1.442695, %v3164_v7  ;;  %v6499_v56 = vpop.f32.mrf.mxu1 }
 0x6b3   : > { %v6432_v59 = vpop.eup %4645  ;;  %v3134_v52 = vpop.xlane.xlu1 %3133  ;;  %4659 = vpow2.f32 %v3233_v30  ;;  %7515 = vst [vmem:[#allocation63_spill] sm:$0xff] %v6499_v56 }
 0x6b4   : > { %7496 = vst [vmem:[#allocation65_spill] sm:$0xff] %v6432_v59  ;;  %v3231_v34 = vmul.f32 1.442695, %v3179_v17  ;;  %3303 = vadd.xlane.f32.xlu0 %v6432_v59  ;;  %3305 = vadd.xlane.f32.xlu1 %v6429_v39  ;;  %v3178_v6 = vsub.f32 %v6327_v35, %v3134_v52  ;;  %v6437_v63 = vpop.eup %4647  ;;  %v6501_v17 = vpop.f32.mrf.mxu1 }
 0x6b5   : > { %v3104_v62 = vpop.xlane.xlu0 %3103  ;;  %7497 = vst [vmem:[#allocation54_spill] sm:$0xff] %v6437_v63  ;;  %7516 = vst [vmem:[#allocation76_spill] sm:$0xff] %v6501_v17 }
 0x6b6   : > { %4661 = vpow2.f32 %v3231_v34  ;;  %v3163_v31 = vsub.f32 %v6332_v58, %v3104_v62  ;;  %v3229_v33 = vmul.f32 1.442695, %v3178_v6  ;;  %v6503_v52 = vpop.f32.mrf.mxu1 }
 0x6b7   : > { %v6440_v22 = vpop.eup %4649  ;;  %v3102_v60 = vpop.xlane.xlu1 %3101  ;;  %4663 = vpow2.f32 %v3201_v51  ;;  %7517 = vst [vmem:[#allocation53_spill] sm:$0xff] %v6503_v52 }
 0x6b8   : > { %7498 = vst [vmem:[#allocation69_spill] sm:$0xff] %v6440_v22  ;;  %v3199_v53 = vmul.f32 1.442695, %v3163_v31  ;;  %3271 = vadd.xlane.f32.xlu0 %v6440_v22  ;;  %3273 = vadd.xlane.f32.xlu1 %v6437_v63  ;;  %v3162_v8 = vsub.f32 %v6337_v42, %v3102_v60  ;;  %v6445_v35 = vpop.eup %4651  ;;  %v6505_v6 = vpop.f32.mrf.mxu1 }
 0x6b9   : > { %v3132_v41 = vpop.xlane.xlu0 %3131  ;;  %7499 = vst [vmem:[#allocation30_spill] sm:$0xff] %v6445_v35  ;;  %7518 = vst [vmem:[#allocation78_spill] sm:$0xff] %v6505_v6 }
 0x6ba   : > { %4665 = vpow2.f32 %v3199_v53  ;;  %v3177_v50 = vsub.f32 %v6342_v4, %v3132_v41  ;;  %v3197_v32 = vmul.f32 1.442695, %v3162_v8  ;;  %v4207_v60 = vpop.f32.mrf.mxu1 }
 0x6bb   : > { %v6448_v28 = vpop.eup %4653  ;;  %v3130_v58 = vpop.xlane.xlu1 %3129  ;;  %4667 = vpow2.f32 %v3229_v33 }
 0x6bc   : > { %7500 = vst [vmem:[#allocation38_spill] sm:$0xff] %v6448_v28  ;;  %v3227_v1 = vmul.f32 1.442695, %v3177_v50  ;;  %3299 = vadd.xlane.f32.xlu0 %v6448_v28  ;;  %3301 = vadd.xlane.f32.xlu1 %v6445_v35  ;;  %v3176_v19 = vsub.f32 %v6347_v45, %v3130_v58  ;;  %v6453_v42 = vpop.eup %4655  ;;  %v2234_v8 = vpop.f32.mrf.mxu1 }
 0x6bd   : > { %v3100_v36 = vpop.xlane.xlu0 %3099  ;;  %7501 = vst [vmem:[#allocation50_spill] sm:$0xff] %v6453_v42 }
 0x6be   : > { %4669 = vpow2.f32 %v3227_v1  ;;  %v3161_v55 = vsub.f32 %v6352_v10, %v3100_v36  ;;  %v3225_v2 = vmul.f32 1.442695, %v3176_v19  ;;  %v4208_v58 = vpop.f32.mrf.mxu1  ;;  %v7519_v36 = vld [vmem:[#allocation18_spill] sm:$0xff] }
 0x6bf   : > { %v6456_v25 = vpop.eup %4657  ;;  %v3098_v4 = vpop.xlane.xlu1 %3097  ;;  %4671 = vpow2.f32 %v3197_v32 }
 0x6c0   : > { %7502 = vst [vmem:[#allocation72_spill] sm:$0xff] %v6456_v25  ;;  %v3195_v18 = vmul.f32 1.442695, %v3161_v55  ;;  %3267 = vadd.xlane.f32.xlu0 %v6456_v25  ;;  %3269 = vadd.xlane.f32.xlu1 %v6453_v42  ;;  %v3160_v37 = vsub.f32 %v6357_v20, %v3098_v4  ;;  %v6461_v45 = vpop.eup %4659  ;;  %v2237_v1 = vpop.f32.mrf.mxu1 }
 0x6c1   : > { %v3128_v15 = vpop.xlane.xlu0 %3127  ;;  %7503 = vst [vmem:[#allocation33_spill] sm:$0xff] %v6461_v45 }
 0x6c2   : > { %4673 = vpow2.f32 %v3195_v18  ;;  %v3175_v46 = vsub.f32 %v6362_v48, %v3128_v15  ;;  %v3193_v11 = vmul.f32 1.442695, %v3160_v37  ;;  %v4211_v18 = vpop.f32.mrf.mxu1 }
 0x6c3   : > { %v6464_v40 = vpop.eup %4661  ;;  %4675 = vpow2.f32 %v3225_v2 }
 0x6c4   : > { %7504 = vst [vmem:[#allocation23_spill] sm:$0xff] %v6464_v40  ;;  %v3223_v10 = vmul.f32 1.442695, %v3175_v46  ;;  %3295 = vadd.xlane.f32.xlu0 %v6464_v40  ;;  %3297 = vadd.xlane.f32.xlu1 %v6461_v45  ;;  %v6468_v27 = vpop.eup %4663  ;;  %v2250_v2 = vpop.f32.mrf.mxu1 }
 0x6c5   : > { %v3096_v16 = vpop.xlane.xlu0 %3095  ;;  %7505 = vst [vmem:[#allocation47_spill] sm:$0xff] %v6468_v27 }
 0x6c6   : > { %4677 = vpow2.f32 %v3223_v10  ;;  %v3159_v20 = vsub.f32 %v6368_v26, %v3096_v16 }
 0x6c7   : > { %v6471_v38 = vpop.eup %4665  ;;  %4679 = vpow2.f32 %v3193_v11 }
 0x6c8   : > { %7506 = vst [vmem:[#allocation34_spill] sm:$0xff] %v6471_v38  ;;  %v3191_v0 = vmul.f32 1.442695, %v3159_v20  ;;  %3263 = vadd.xlane.f32.xlu0 %v6471_v38  ;;  %3265 = vadd.xlane.f32.xlu1 %v6468_v27  ;;  %v6475_v48 = vpop.eup %4667  ;;  %v4212_v20 = vpop.f32.mrf.mxu1 }
 0x6c9   : > { %7507 = vst [vmem:[#allocation48_spill] sm:$0xff] %v6475_v48 }
 0x6ca   : > { %4681 = vpow2.f32 %v3191_v0 }
 0x6cb   : > { %v6477_v13 = vpop.eup %4669 }
 0x6cc   : > { %7508 = vst [vmem:[#allocation75_spill] sm:$0xff] %v6477_v13  ;;  %3291 = vadd.xlane.f32.xlu0 %v6477_v13  ;;  %3293 = vadd.xlane.f32.xlu1 %v6475_v48  ;;  %v6481_v3 = vpop.eup %4671 }
 0x6cd   : > { %7509 = vst [vmem:[#allocation64_spill] sm:$0xff] %v6481_v3 }
 0x6cf   : > { %v6483_v26 = vpop.eup %4673 }
 0x6d0   : > { %7510 = vst [vmem:[#allocation71_spill] sm:$0xff] %v6483_v26  ;;  %3259 = vadd.xlane.f32.xlu0 %v6483_v26  ;;  %3261 = vadd.xlane.f32.xlu1 %v6481_v3  ;;  %v6487_v24 = vpop.eup %4675 }
 0x6d1   : > { %7511 = vst [vmem:[#allocation31_spill] sm:$0xff] %v6487_v24 }
 0x6d3   : > { %v6489_v14 = vpop.eup %4677 }
 0x6d4   : > { %7512 = vst [vmem:[#allocation19_spill] sm:$0xff] %v6489_v14  ;;  %3287 = vadd.xlane.f32.xlu0 %v6489_v14  ;;  %3289 = vadd.xlane.f32.xlu1 %v6487_v24  ;;  %v6493_v30 = vpop.eup %4679 }
 0x6d5   : > { %7513 = vst [vmem:[#allocation45_spill] sm:$0xff] %v6493_v30 }
 0x6d7   : > { %v6495_v7 = vpop.eup %4681 }
 0x6d8   : > { %7514 = vst [vmem:[#allocation73_spill] sm:$0xff] %v6495_v7  ;;  %3255 = vadd.xlane.f32.xlu0 %v6495_v7  ;;  %3257 = vadd.xlane.f32.xlu1 %v6493_v30 }
 0x721   : > { %v3316_v34 = vpop.xlane.xlu0 %3315 }
 0x725   : > { %v3318_v51 = vpop.xlane.xlu1 %3317 }
 0x729   : > { %v3284_v62 = vpop.xlane.xlu0 %3283  ;;  %v3286_v31 = vpop.xlane.xlu1 %3285 }
 0x72a   : > { %4683 = vrcp.f32 %v3284_v62  ;;  %v2253_v62 = vpop.f32.mrf.mxu1 }
 0x72b   : > { %4685 = vrcp.f32 %v3286_v31 }
 0x72d   : > { %v3312_v53 = vpop.xlane.xlu0 %3311  ;;  %v3314_v33 = vpop.xlane.xlu1 %3313 }
 0x731   : > { %v3280_v41 = vpop.xlane.xlu0 %3279  ;;  %v3282_v50 = vpop.xlane.xlu1 %3281 }
 0x732   : > { %4687 = vrcp.f32 %v3280_v41 }
 0x733   : > { %4689 = vrcp.f32 %v3282_v50 }
 0x734   : > { %4691 = vrcp.f32 %v3312_v53 }
 0x735   : > { %4693 = vrcp.f32 %v3316_v34 }
 0x736   : > { %4695 = vrcp.f32 %v3318_v51 }
 0x737   : > { %v4684_v32 = vpop.eup %4683  ;;  %4697 = vrcp.f32 %v3314_v33  ;;  %v4215_v33 = vpop.f32.mrf.mxu1 }
 0x738   : > { %v4686_v19 = vpop.eup %4685  ;;  %v3369_v55 = vmul.f32 %v4684_v32, %v7519_v36 }
 0x739   : > { %v3370_v4 = vmul.f32 %v4686_v19, %v7519_v36  ;;  %v2266_v50 = vpop.f32.mrf.mxu1 }
 0x73a   : > { %3459 = vperm.xlu0 %4357, %v3369_v55  }
 0x73b   : > { %3464 = vperm.xlu1 %4358, %v3370_v4   ;;  %v4216_v32 = vpop.f32.mrf.mxu1 }
 0x73d   : > { %v2269_v19 = vpop.f32.mrf.mxu1 }
 0x73f   : > { %v4688_v37 = vpop.eup %4687  ;;  %v4219_v55 = vpop.f32.mrf.mxu1 }
 0x740   : > { %v4690_v15 = vpop.eup %4689  ;;  %v3367_v46 = vmul.f32 %v4688_v37, %v7519_v36 }
 0x741   : > { %v4692_v10 = vpop.eup %4691  ;;  %v3368_v11 = vmul.f32 %v4690_v15, %v7519_v36  ;;  %v2282_v4 = vpop.f32.mrf.mxu1  ;;  %v6516_v15 = vadd.f32 %v4207_v60, %v7483_v49  ;;  %v6531_v60 = vadd.f32 %v4208_v58, %v7483_v49  ;;  %v6547_v58 = vadd.f32 %v4212_v20, %v7483_v49 }
 0x742   : > { %v4694_v16 = vpop.eup %4693  ;;  %3449 = vperm.xlu0 %4357, %v3367_v46   ;;  %v3383_v0 = vmul.f32 %v4692_v10, %v7519_v36  ;;  %v6520_v10 = vadd.f32 %v2234_v8, %v7483_v49  ;;  %v6535_v8 = vadd.f32 %v4215_v33, %v7483_v49  ;;  %v6551_v33 = vadd.f32 %v4219_v55, %v7483_v49 }
 0x743   : > { %3454 = vperm.xlu1 %4358, %v3368_v11   ;;  %v3385_v34 = vmul.f32 %v4694_v16, %v7519_v36  ;;  %v4696_v51 = vpop.eup %4695  ;;  %v4220_v37 = vpop.f32.mrf.mxu1  ;;  %v6524_v16 = vadd.f32 %v4211_v18, %v7483_v49  ;;  %v6539_v18 = vadd.f32 %v2237_v1, %v7483_v49  ;;  %v6555_v1 = vadd.f32 %v2253_v62, %v7483_v49 }
 0x744   : > { %v3386_v31 = vmul.f32 %v4696_v51, %v7519_v36  ;;  %v4698_v53 = vpop.eup %4697  ;;  %v6563_v20 = vadd.f32 %v4216_v32, %v7483_v49  ;;  %v6571_v62 = vadd.f32 %v2269_v19, %v7483_v49  ;;  %v6579_v32 = vadd.f32 %v4220_v37, %v7483_v49 }
 0x745   : > { %v3384_v41 = vmul.f32 %v4698_v53, %v7519_v36  ;;  %v2285_v46 = vpop.f32.mrf.mxu1 }
 0x746   : > { %3529 = vperm.xlu0 %4357, %v3383_v0   ;;  %v6587_v19 = vadd.f32 %v2285_v46, %v7483_v49 }
 0x747   : > { %3539 = vperm.xlu1 %4358, %v3385_v34   ;;  %v4223_v11 = vpop.f32.mrf.mxu1  ;;  %v6528_v34 = vadd.f32 %v2250_v2, %v7483_v49  ;;  %v6543_v2 = vadd.f32 %v2266_v50, %v7483_v49  ;;  %v6559_v50 = vadd.f32 %v2282_v4, %v7483_v49 }
 0x748   : > { %v6567_v56 = vadd.f32 %v4223_v11, %v7483_v49 }
 0x749   : > { %v2298_v0 = vpop.f32.mrf.mxu1 }
 0x74a   : > { %v6575_v17 = vadd.f32 %v2298_v0, %v7483_v49 }
 0x74b   : > { %3544 = vperm.xlu1 %4358, %v3386_v31   ;;  %v4224_v51 = vpop.f32.mrf.mxu1 }
 0x74c   : > { %v6595_v37 = vadd.f32 %v4224_v51, %v7483_v49 }
 0x74d   : > { %v2301_v31 = vpop.f32.mrf.mxu1 }
 0x74e   : > { %v6603_v46 = vadd.f32 %v2301_v31, %v7483_v49  ;;  %v6620_v31 = vpop.xlane.xlu1 %3309 }
 0x74f   : > { %3534 = vperm.xlu1 %4358, %v3384_v41   ;;  %v4227_v53 = vpop.f32.mrf.mxu1 }
 0x750   : > { %v6583_v52 = vadd.f32 %v4227_v53, %v7483_v49 }
 0x751   : > { %v2314_v41 = vpop.f32.mrf.mxu1 }
 0x752   : > { %v6591_v6 = vadd.f32 %v2314_v41, %v7483_v49  ;;  %v6636_v13 = vpop.xlane.xlu1 %3277 }
 0x753   : > { %v4228_v55 = vpop.f32.mrf.mxu1 }
 0x754   : > { %v6611_v51 = vadd.f32 %v4228_v55, %v7483_v49 }
 0x755   : > { %v2317_v4 = vpop.f32.mrf.mxu1 }
 0x756   : > { %v6645_v48 = vpop.xlane.xlu1 %3305 }
 0x757   : > { %v4231_v11 = vpop.f32.mrf.mxu1 }
 0x758   : > { %v6599_v30 = vadd.f32 %v4231_v11, %v7483_v49  ;;  %v6614_v11 = vpop.xlane.xlu0 %3307 }
 0x759   : > { %v2330_v0 = vpop.f32.mrf.mxu1 }
 0x75a   : > { %v6607_v7 = vadd.f32 %v2330_v0, %v7483_v49  ;;  %v6623_v0 = vadd.f32 %v2317_v4, %v7483_v49 }
 0x75b   : > { %v4232_v53 = vpop.f32.mrf.mxu1 }
 0x75c   : > { %v6630_v3 = vpop.xlane.xlu0 %3275 }
 0x75d   : > { %v2333_v41 = vpop.f32.mrf.mxu1 }
 0x75e   : > { %v6640_v4 = vadd.f32 %v2333_v41, %v7483_v49  ;;  %v6656_v41 = vpop.xlane.xlu1 %3273 }
 0x75f   : > { %v4235_v24 = vpop.f32.mrf.mxu1 }
 0x760   : > { %v6617_v14 = vadd.f32 %v4235_v24, %v7483_v49  ;;  %v6633_v24 = vadd.f32 %v4232_v53, %v7483_v49  ;;  %v6642_v38 = vpop.xlane.xlu0 %3303 }
 0x761   : > { %v2346_v26 = vpop.f32.mrf.mxu1 }
 0x762   : > { %v6627_v55 = vadd.f32 %v2346_v26, %v7483_v49  ;;  %v6661_v42 = vpop.xlane.xlu1 %3301 }
 0x763   : > { %v4236_v26 = vpop.f32.mrf.mxu1 }
 0x764   : > { %v6648_v27 = vadd.f32 %v4236_v26, %v7483_v49  ;;  %v6651_v40 = vpop.xlane.xlu0 %3271 }
 0x765   : > { %2365 = vmax.xlane.f32.xlu0 %v6516_v15  ;;  %v2349_v53 = vpop.f32.mrf.mxu1 }
 0x766   : > { %v6654_v25 = vadd.f32 %v2349_v53, %v7483_v49  ;;  %v6665_v26 = vpop.xlane.xlu1 %3269 }
 0x767   : > { %7520 = vst [vmem:[#allocation62_spill] sm:$0xff] %v6665_v26 }
 0x768   : > { %v6659_v45 = vpop.xlane.xlu0 %3299 }
 0x769   : > { %2361 = vmax.xlane.f32.xlu0 %v6520_v10 }
 0x76a   : > { %v6669_v57 = vpop.xlane.xlu1 %3297 }
 0x76b   : > { %7521 = vst [vmem:[#allocation24_spill] sm:$0xff] %v6669_v57 }
 0x76c   : > { %v6663_v61 = vpop.xlane.xlu0 %3267 }
 0x76d   : > { %2373 = vmax.xlane.f32.xlu0 %v6524_v16 }
 0x76e   : > { %v6673_v49 = vpop.xlane.xlu1 %3265 }
 0x76f   : > { %7522 = vst [vmem:[#allocation51_spill] sm:$0xff] %v6673_v49 }
 0x770   : > { %v6667_v47 = vpop.xlane.xlu0 %3295 }
 0x771   : > { %2369 = vmax.xlane.f32.xlu0 %v6528_v34 }
 0x772   : > { %v6677_v43 = vpop.xlane.xlu1 %3293 }
 0x773   : > { %2367 = vmax.xlane.f32.xlu1 %v6531_v60  ;;  %7523 = vst [vmem:[#allocation74_spill] sm:$0xff] %v6677_v43 }
 0x774   : > { %v6671_v5 = vpop.xlane.xlu0 %3263 }
 0x775   : > { %2381 = vmax.xlane.f32.xlu0 %v6535_v8 }
 0x776   : > { %v6681_v39 = vpop.xlane.xlu1 %3261 }
 0x777   : > { %2363 = vmax.xlane.f32.xlu1 %v6539_v18  ;;  %7524 = vst [vmem:[#allocation52_spill] sm:$0xff] %v6681_v39 }
 0x778   : > { %v6675_v53 = vpop.xlane.xlu0 %3291 }
 0x779   : > { %2377 = vmax.xlane.f32.xlu0 %v6543_v2 }
 0x77a   : > { %v6685_v54 = vpop.xlane.xlu1 %3289 }
 0x77b   : > { %2375 = vmax.xlane.f32.xlu1 %v6547_v58  ;;  %7525 = vst [vmem:[#allocation68_spill] sm:$0xff] %v6685_v54 }
 0x77c   : > { %v6679_v29 = vpop.xlane.xlu0 %3259 }
 0x77d   : > { %2389 = vmax.xlane.f32.xlu0 %v6551_v33 }
 0x77e   : > { %v6689_v21 = vpop.xlane.xlu1 %3257 }
 0x77f   : > { %2371 = vmax.xlane.f32.xlu1 %v6555_v1  ;;  %7526 = vst [vmem:[#allocation59_spill] sm:$0xff] %v6689_v21 }
 0x780   : > { %v6683_v9 = vpop.xlane.xlu0 %3287 }
 0x781   : > { %2385 = vmax.xlane.f32.xlu0 %v6559_v50 }
 0x783   : > { %2383 = vmax.xlane.f32.xlu1 %v6563_v20 }
 0x784   : > { %v6687_v35 = vpop.xlane.xlu0 %3255 }
 0x785   : > { %2397 = vmax.xlane.f32.xlu0 %v6567_v56 }
 0x787   : > { %2379 = vmax.xlane.f32.xlu1 %v6571_v62 }
 0x789   : > { %2393 = vmax.xlane.f32.xlu0 %v6575_v17 }
 0x78b   : > { %2391 = vmax.xlane.f32.xlu1 %v6579_v32 }
 0x78d   : > { %2405 = vmax.xlane.f32.xlu0 %v6583_v52 }
 0x78f   : > { %2387 = vmax.xlane.f32.xlu1 %v6587_v19 }
 0x791   : > { %2401 = vmax.xlane.f32.xlu0 %v6591_v6 }
 0x793   : > { %2399 = vmax.xlane.f32.xlu1 %v6595_v37 }
 0x795   : > { %2413 = vmax.xlane.f32.xlu0 %v6599_v30 }
 0x797   : > { %2395 = vmax.xlane.f32.xlu1 %v6603_v46 }
 0x799   : > { %2409 = vmax.xlane.f32.xlu0 %v6607_v7 }
 0x79b   : > { %2407 = vmax.xlane.f32.xlu1 %v6611_v51 }
 0x79d   : > { %2421 = vmax.xlane.f32.xlu0 %v6617_v14 }
 0x79f   : > { %2403 = vmax.xlane.f32.xlu1 %v6623_v0 }
 0x7a1   : > { %2417 = vmax.xlane.f32.xlu0 %v6627_v55 }
 0x7a3   : > { %2415 = vmax.xlane.f32.xlu1 %v6633_v24 }
 0x7a7   : > { %2411 = vmax.xlane.f32.xlu1 %v6640_v4 }
 0x7ab   : > { %2423 = vmax.xlane.f32.xlu1 %v6648_v27 }
 0x7af   : > { %2419 = vmax.xlane.f32.xlu1 %v6654_v25 }
 0x7b5   : > { %v6691_v44 = vpop.permute.xlu0 %3459 }
 0x7b6   : > { %7527 = vst [vmem:[#allocation77_spill] sm:$0xff] %v6691_v44  ;;  %v6693_v63 = vpop.permute.xlu1 %3464 }
 0x7b7   : > { %7528 = vst [vmem:[#allocation60_spill] sm:$0xff] %v6693_v63 }
 0x7bd   : > { %v6695_v59 = vpop.permute.xlu0 %3449 }
 0x7be   : > { %7529 = vst [vmem:[#allocation22_spill] sm:$0xff] %v6695_v59  ;;  %v6697_v49 = vpop.permute.xlu1 %3454 }
 0x7bf   : > { %7530 = vst [vmem:[#allocation49_spill] sm:$0xff] %v6697_v49 }
 0x7c1   : > { %v6699_v43 = vpop.permute.xlu0 %3529 }
 0x7c2   : > { %7531 = vst [vmem:[#allocation67_spill] sm:$0xff] %v6699_v43  ;;  %v6701_v23 = vpop.permute.xlu1 %3539 }
 0x7c3   : > { %7532 = vst [vmem:[#allocation58_spill] sm:$0xff] %v6701_v23 }
 0x7c6   : > { %v6704_v28 = vpop.permute.xlu1 %3544 }
 0x7c7   : > { %7533 = vst [vmem:[#allocation80_spill] sm:$0xff] %v6704_v28 }
 0x7ca   : > { %v6708_v49 = vpop.permute.xlu1 %3534 }
 0x7ee   : > { %v2366_v39 = vpop.xlane.xlu0 %2365 }
 0x7ef   : > { %v2427_v57 = vsub.f32 %v6516_v15, %v2366_v39 }
 0x7f1   : > { %v2461_v54 = vmul.f32 1.442695, %v2427_v57 }
 0x7f2   : > { %v2362_v26 = vpop.xlane.xlu0 %2361 }
 0x7f3   : > { %4699 = vpow2.f32 %v2461_v54  ;;  %v2425_v44 = vsub.f32 %v6520_v10, %v2362_v26 }
 0x7f5   : > { %v2457_v21 = vmul.f32 1.442695, %v2425_v44 }
 0x7f6   : > { %v2374_v63 = vpop.xlane.xlu0 %2373 }
 0x7f7   : > { %4701 = vpow2.f32 %v2457_v21  ;;  %v2431_v59 = vsub.f32 %v6524_v16, %v2374_v63 }
 0x7f9   : > { %v2469_v43 = vmul.f32 1.442695, %v2431_v59 }
 0x7fa   : > { %v2370_v22 = vpop.xlane.xlu0 %2369 }
 0x7fb   : > { %4703 = vpow2.f32 %v2469_v43  ;;  %v2429_v23 = vsub.f32 %v6528_v34, %v2370_v22 }
 0x7fc   : > { %v2368_v39 = vpop.xlane.xlu1 %2367 }
 0x7fd   : > { %v2465_v57 = vmul.f32 1.442695, %v2429_v23  ;;  %v2428_v15 = vsub.f32 %v6531_v60, %v2368_v39 }
 0x7fe   : > { %v2382_v28 = vpop.xlane.xlu0 %2381 }
 0x7ff   : > { %4705 = vpow2.f32 %v2465_v57  ;;  %v2463_v54 = vmul.f32 1.442695, %v2428_v15  ;;  %v2435_v44 = vsub.f32 %v6535_v8, %v2382_v28 }
 0x800   : > { %v6713_v10 = vpop.eup %4699  ;;  %v2364_v21 = vpop.xlane.xlu1 %2363 }
 0x801   : > { %7534 = vst [vmem:[#allocation42_spill] sm:$0xff] %v6713_v10  ;;  %4707 = vpow2.f32 %v2463_v54  ;;  %v2477_v63 = vmul.f32 1.442695, %v2435_v44  ;;  %v2426_v59 = vsub.f32 %v6539_v18, %v2364_v21  ;;  %2525 = vadd.xlane.f32.xlu0 %v6713_v10 }
 0x802   : > { %v2378_v43 = vpop.xlane.xlu0 %2377 }
 0x803   : > { %4709 = vpow2.f32 %v2477_v63  ;;  %v2459_v22 = vmul.f32 1.442695, %v2426_v59  ;;  %v2433_v23 = vsub.f32 %v6543_v2, %v2378_v43 }
 0x804   : > { %v6718_v16 = vpop.eup %4701  ;;  %v2376_v34 = vpop.xlane.xlu1 %2375 }
 0x805   : > { %7535 = vst [vmem:[#allocation82_spill] sm:$0xff] %v6718_v16  ;;  %4711 = vpow2.f32 %v2459_v22  ;;  %v2473_v60 = vmul.f32 1.442695, %v2433_v23  ;;  %v2432_v28 = vsub.f32 %v6547_v58, %v2376_v34  ;;  %2521 = vadd.xlane.f32.xlu0 %v6718_v16 }
 0x806   : > { %v2390_v8 = vpop.xlane.xlu0 %2389 }
 0x807   : > { %4713 = vpow2.f32 %v2473_v60  ;;  %v2471_v26 = vmul.f32 1.442695, %v2432_v28  ;;  %v2439_v18 = vsub.f32 %v6551_v33, %v2390_v8 }
 0x808   : > { %v6723_v39 = vpop.eup %4703  ;;  %v2372_v57 = vpop.xlane.xlu1 %2371 }
 0x809   : > { %4715 = vpow2.f32 %v2471_v26  ;;  %v2485_v15 = vmul.f32 1.442695, %v2439_v18  ;;  %v2430_v2 = vsub.f32 %v6555_v1, %v2372_v57  ;;  %2533 = vadd.xlane.f32.xlu0 %v6723_v39 }
 0x80a   : > { %v2386_v54 = vpop.xlane.xlu0 %2385 }
 0x80b   : > { %4717 = vpow2.f32 %v2485_v15  ;;  %v2467_v44 = vmul.f32 1.442695, %v2430_v2  ;;  %v2437_v58 = vsub.f32 %v6559_v50, %v2386_v54 }
 0x80c   : > { %v6728_v21 = vpop.eup %4705  ;;  %v2384_v63 = vpop.xlane.xlu1 %2383 }
 0x80d   : > { %4719 = vpow2.f32 %v2467_v44  ;;  %v2481_v59 = vmul.f32 1.442695, %v2437_v58  ;;  %v2436_v33 = vsub.f32 %v6563_v20, %v2384_v63  ;;  %2529 = vadd.xlane.f32.xlu0 %v6728_v21 }
 0x80e   : > { %v6732_v43 = vpop.eup %4707  ;;  %v2398_v22 = vpop.xlane.xlu0 %2397 }
 0x80f   : > { %7536 = vst [vmem:[#allocation26_spill] sm:$0xff] %v6732_v43  ;;  %4721 = vpow2.f32 %v2481_v59  ;;  %v2479_v1 = vmul.f32 1.442695, %v2436_v33  ;;  %v2443_v23 = vsub.f32 %v6567_v56, %v2398_v22  ;;  %2527 = vadd.xlane.f32.xlu1 %v6732_v43 }
 0x810   : > { %v6736_v34 = vpop.eup %4709  ;;  %v2380_v50 = vpop.xlane.xlu1 %2379 }
 0x811   : > { %4723 = vpow2.f32 %v2479_v1  ;;  %v2493_v60 = vmul.f32 1.442695, %v2443_v23  ;;  %v2434_v28 = vsub.f32 %v6571_v62, %v2380_v50  ;;  %2541 = vadd.xlane.f32.xlu0 %v6736_v34 }
 0x812   : > { %v6740_v20 = vpop.eup %4711  ;;  %v2394_v8 = vpop.xlane.xlu0 %2393 }
 0x813   : > { %7537 = vst [vmem:[#allocation40_spill] sm:$0xff] %v6740_v20  ;;  %4725 = vpow2.f32 %v2493_v60  ;;  %v2475_v26 = vmul.f32 1.442695, %v2434_v28  ;;  %v2441_v18 = vsub.f32 %v6575_v17, %v2394_v8  ;;  %2523 = vadd.xlane.f32.xlu1 %v6740_v20 }
 0x814   : > { %v6744_v56 = vpop.eup %4713  ;;  %v2392_v57 = vpop.xlane.xlu1 %2391 }
 0x815   : > { %4727 = vpow2.f32 %v2475_v26  ;;  %v2489_v15 = vmul.f32 1.442695, %v2441_v18  ;;  %v2440_v2 = vsub.f32 %v6579_v32, %v2392_v57  ;;  %2537 = vadd.xlane.f32.xlu0 %v6744_v56 }
 0x816   : > { %v6748_v62 = vpop.eup %4715  ;;  %v2406_v54 = vpop.xlane.xlu0 %2405 }
 0x817   : > { %4729 = vpow2.f32 %v2489_v15  ;;  %v2487_v44 = vmul.f32 1.442695, %v2440_v2  ;;  %v2447_v58 = vsub.f32 %v6583_v52, %v2406_v54  ;;  %2535 = vadd.xlane.f32.xlu1 %v6748_v62 }
 0x818   : > { %v6752_v17 = vpop.eup %4717  ;;  %v2388_v63 = vpop.xlane.xlu1 %2387 }
 0x819   : > { %4731 = vpow2.f32 %v2487_v44  ;;  %v2501_v59 = vmul.f32 1.442695, %v2447_v58  ;;  %v2438_v33 = vsub.f32 %v6587_v19, %v2388_v63  ;;  %2549 = vadd.xlane.f32.xlu0 %v6752_v17 }
 0x81a   : > { %v6756_v32 = vpop.eup %4719  ;;  %v2402_v22 = vpop.xlane.xlu0 %2401 }
 0x81b   : > { %4733 = vpow2.f32 %v2501_v59  ;;  %v2483_v1 = vmul.f32 1.442695, %v2438_v33  ;;  %v2445_v23 = vsub.f32 %v6591_v6, %v2402_v22  ;;  %2531 = vadd.xlane.f32.xlu1 %v6756_v32 }
 0x81c   : > { %v6760_v52 = vpop.eup %4721  ;;  %v2400_v50 = vpop.xlane.xlu1 %2399 }
 0x81d   : > { %4735 = vpow2.f32 %v2483_v1  ;;  %v2497_v60 = vmul.f32 1.442695, %v2445_v23  ;;  %v2444_v28 = vsub.f32 %v6595_v37, %v2400_v50  ;;  %2545 = vadd.xlane.f32.xlu0 %v6760_v52 }
 0x81e   : > { %v6764_v19 = vpop.eup %4723  ;;  %v2414_v8 = vpop.xlane.xlu0 %2413 }
 0x81f   : > { %4737 = vpow2.f32 %v2497_v60  ;;  %v2495_v26 = vmul.f32 1.442695, %v2444_v28  ;;  %v2451_v18 = vsub.f32 %v6599_v30, %v2414_v8  ;;  %2543 = vadd.xlane.f32.xlu1 %v6764_v19 }
 0x820   : > { %v6768_v6 = vpop.eup %4725  ;;  %v2396_v57 = vpop.xlane.xlu1 %2395 }
 0x821   : > { %4739 = vpow2.f32 %v2495_v26  ;;  %v2509_v15 = vmul.f32 1.442695, %v2451_v18  ;;  %v2442_v2 = vsub.f32 %v6603_v46, %v2396_v57  ;;  %2557 = vadd.xlane.f32.xlu0 %v6768_v6 }
 0x822   : > { %v6772_v37 = vpop.eup %4727  ;;  %v2410_v54 = vpop.xlane.xlu0 %2409 }
 0x823   : > { %4741 = vpow2.f32 %v2509_v15  ;;  %v2491_v44 = vmul.f32 1.442695, %v2442_v2  ;;  %v2449_v58 = vsub.f32 %v6607_v7, %v2410_v54  ;;  %2539 = vadd.xlane.f32.xlu1 %v6772_v37 }
 0x824   : > { %v6776_v30 = vpop.eup %4729  ;;  %v2408_v63 = vpop.xlane.xlu1 %2407 }
 0x825   : > { %7538 = vst [vmem:[#allocation79_spill] sm:$0xff] %v6776_v30  ;;  %4743 = vpow2.f32 %v2491_v44  ;;  %v2505_v59 = vmul.f32 1.442695, %v2449_v58  ;;  %v2448_v33 = vsub.f32 %v6611_v51, %v2408_v63  ;;  %2553 = vadd.xlane.f32.xlu0 %v6776_v30 }
 0x826   : > { %v6780_v46 = vpop.eup %4731  ;;  %v2422_v22 = vpop.xlane.xlu0 %2421 }
 0x827   : > { %4745 = vpow2.f32 %v2505_v59  ;;  %v2503_v1 = vmul.f32 1.442695, %v2448_v33  ;;  %v2455_v23 = vsub.f32 %v6617_v14, %v2422_v22  ;;  %2551 = vadd.xlane.f32.xlu1 %v6780_v46 }
 0x828   : > { %v6784_v7 = vpop.eup %4733  ;;  %v2404_v50 = vpop.xlane.xlu1 %2403 }
 0x829   : > { %4747 = vpow2.f32 %v2503_v1  ;;  %v2517_v60 = vmul.f32 1.442695, %v2455_v23  ;;  %v2446_v28 = vsub.f32 %v6623_v0, %v2404_v50  ;;  %2565 = vadd.xlane.f32.xlu0 %v6784_v7 }
 0x82a   : > { %v6788_v51 = vpop.eup %4735 }
 0x82b   : > { %4749 = vpow2.f32 %v2517_v60  ;;  %v2499_v8 = vmul.f32 1.442695, %v2446_v28  ;;  %2547 = vadd.xlane.f32.xlu1 %v6788_v51  ;;  %v2418_v28 = vpop.xlane.xlu0 %2417 }
 0x82c   : > { %v6791_v26 = vpop.eup %4737  ;;  %v2416_v14 = vpop.xlane.xlu1 %2415 }
 0x82d   : > { %4751 = vpow2.f32 %v2499_v8  ;;  %v2452_v18 = vsub.f32 %v6633_v24, %v2416_v14  ;;  %2561 = vadd.xlane.f32.xlu0 %v6791_v26 }
 0x82e   : > { %v6795_v57 = vpop.eup %4739 }
 0x82f   : > { %v2511_v15 = vmul.f32 1.442695, %v2452_v18  ;;  %2559 = vadd.xlane.f32.xlu1 %v6795_v57 }
 0x830   : > { %v6798_v0 = vpop.eup %4741  ;;  %v2412_v2 = vpop.xlane.xlu1 %2411 }
 0x831   : > { %4753 = vpow2.f32 %v2511_v15  ;;  %v2450_v54 = vsub.f32 %v6640_v4, %v2412_v2  ;;  %2573 = vadd.xlane.f32.xlu0 %v6798_v0 }
 0x832   : > { %v6802_v44 = vpop.eup %4743 }
 0x833   : > { %7539 = vst [vmem:[#allocation37_spill] sm:$0xff] %v6802_v44  ;;  %v2507_v58 = vmul.f32 1.442695, %v2450_v54  ;;  %2555 = vadd.xlane.f32.xlu1 %v6802_v44 }
 0x834   : > { %v6805_v24 = vpop.eup %4745  ;;  %v2424_v14 = vpop.xlane.xlu1 %2423 }
 0x835   : > { %4755 = vpow2.f32 %v2507_v58  ;;  %2569 = vadd.xlane.f32.xlu0 %v6805_v24  ;;  %v2456_v18 = vsub.f32 %v6648_v27, %v2424_v14 }
 0x836   : > { %v6808_v63 = vpop.eup %4747  ;;  %4757 = vrcp.f32 %v6614_v11  ;;  %v2453_v11 = vsub.f32 %v6627_v55, %v2418_v28 }
 0x837   : > { %2567 = vadd.xlane.f32.xlu1 %v6808_v63  ;;  %4759 = vrcp.f32 %v6620_v31  ;;  %v2519_v15 = vmul.f32 1.442695, %v2456_v18 }
 0x838   : > { %v6811_v59 = vpop.eup %4749  ;;  %v2513_v8 = vmul.f32 1.442695, %v2453_v11  ;;  %v2420_v28 = vpop.xlane.xlu1 %2419 }
 0x839   : > { %2581 = vadd.xlane.f32.xlu0 %v6811_v59  ;;  %v2454_v11 = vsub.f32 %v6654_v25, %v2420_v28 }
 0x83a   : > { %v6814_v4 = vpop.eup %4751  ;;  %4761 = vpow2.f32 %v2513_v8 }
 0x83b   : > { %2563 = vadd.xlane.f32.xlu1 %v6814_v4  ;;  %4763 = vpow2.f32 %v2519_v15  ;;  %v2515_v18 = vmul.f32 1.442695, %v2454_v11 }
 0x83c   : > { %4765 = vrcp.f32 %v6630_v3 }
 0x83d   : > { %4767 = vrcp.f32 %v6642_v38 }
 0x83e   : > { %v6818_v33 = vpop.eup %4753  ;;  %4769 = vrcp.f32 %v6636_v13 }
 0x83f   : > { %2575 = vadd.xlane.f32.xlu1 %v6818_v33  ;;  %4771 = vrcp.f32 %v6651_v40 }
 0x840   : > { %4773 = vrcp.f32 %v6659_v45 }
 0x842   : > { %v6821_v22 = vpop.eup %4755 }
 0x843   : > { %2571 = vadd.xlane.f32.xlu1 %v6821_v22  ;;  %v4758_v1 = vpop.eup %4757 }
 0x844   : > { %v3381_v23 = vmul.f32 %v4758_v1, %v7519_v36  ;;  %v4760_v50 = vpop.eup %4759 }
 0x845   : > { %v3382_v60 = vmul.f32 %v4760_v50, %v7519_v36 }
 0x847   : > { %v6829_v31 = vpop.eup %4761 }
 0x848   : > { %v6834_v2 = vpop.eup %4763 }
 0x849   : > { %v4766_v27 = vpop.eup %4765 }
 0x84a   : > { %v3365_v55 = vmul.f32 %v4766_v27, %v7519_v36  ;;  %v4768_v54 = vpop.eup %4767 }
 0x84b   : > { %v4770_v58 = vpop.eup %4769  ;;  %v3379_v3 = vmul.f32 %v4768_v54, %v7519_v36 }
 0x84c   : > { %v4772_v1 = vpop.eup %4771  ;;  %v3366_v38 = vmul.f32 %v4770_v58, %v7519_v36 }
 0x84d   : > { %v4774_v40 = vpop.eup %4773 }
 0x84e   : > { %v3377_v50 = vmul.f32 %v4774_v40, %v7519_v36 }
 0x84f   : > { %3519 = vperm.xlu0 %4357, %v3381_v23   ;;  %v3363_v23 = vmul.f32 %v4772_v1, %v7519_v36 }
 0x854   : > { %3524 = vperm.xlu1 %4358, %v3382_v60  }
 0x86e   : > { %2577 = vadd.xlane.f32.xlu0 %v6829_v31 }
 0x878   : > { %2583 = vadd.xlane.f32.xlu1 %v6834_v2 }
 0x884   : > { %3439 = vperm.xlu0 %4357, %v3365_v55  }
 0x888   : > { %3509 = vperm.xlu0 %4357, %v3379_v3  }
 0x889   : > { %3444 = vperm.xlu1 %4358, %v3366_v38  }
 0x88a   : > { %v6843_v13 = vpop.xlane.xlu0 %2525 }
 0x88c   : > { %3429 = vperm.xlu0 %4357, %v3363_v23   ;;  %v7540_v23 = vld [vmem:[#allocation17_spill] sm:$0xff] }
 0x88e   : > { %v6846_v45 = vpop.xlane.xlu0 %2521 }
 0x890   : > { %3499 = vperm.xlu0 %4357, %v3377_v50  }
 0x892   : > { %v6849_v60 = vpop.xlane.xlu0 %2533 }
 0x896   : > { %v6852_v8 = vpop.xlane.xlu0 %2529 }
 0x898   : > { %v6854_v14 = vpop.xlane.xlu1 %2527 }
 0x89a   : > { %v2542_v15 = vpop.xlane.xlu0 %2541 }
 0x89b   : > { %4775 = vrcp.f32 %v2542_v15 }
 0x89c   : > { %v6856_v27 = vpop.xlane.xlu1 %2523  ;;  %4777 = vpow2.f32 %v2515_v18 }
 0x89e   : > { %v2538_v55 = vpop.xlane.xlu0 %2537 }
 0x89f   : > { %4779 = vrcp.f32 %v2538_v55 }
 0x8a0   : > { %v6858_v54 = vpop.xlane.xlu1 %2535 }
 0x8a2   : > { %v2550_v58 = vpop.xlane.xlu0 %2549 }
 0x8a3   : > { %4781 = vrcp.f32 %v2550_v58 }
 0x8a4   : > { %v6860_v3 = vpop.xlane.xlu1 %2531 }
 0x8a6   : > { %v2546_v1 = vpop.xlane.xlu0 %2545 }
 0x8a7   : > { %4783 = vrcp.f32 %v2546_v1 }
 0x8a8   : > { %v4776_v25 = vpop.eup %4775  ;;  %v2544_v38 = vpop.xlane.xlu1 %2543  ;;  %4785 = vrcp.f32 %v6645_v48 }
 0x8a9   : > { %v2631_v40 = vmul.f32 %v4776_v25, %v7540_v23  ;;  %v6865_v28 = vpop.eup %4777  ;;  %4787 = vrcp.f32 %v6656_v41 }
 0x8aa   : > { %v6863_v50 = vpop.xlane.xlu0 %2557 }
 0x8ab   : > { %2705 = vperm.xlu0 %4357, %v2631_v40  }
 0x8ac   : > { %v4780_v11 = vpop.eup %4779  ;;  %v2540_v18 = vpop.xlane.xlu1 %2539 }
 0x8ad   : > { %2579 = vadd.xlane.f32.xlu1 %v6865_v28  ;;  %v2629_v15 = vmul.f32 %v4780_v11, %v7540_v23 }
 0x8ae   : > { %v6870_v55 = vpop.xlane.xlu0 %2553 }
 0x8af   : > { %2695 = vperm.xlu0 %4357, %v2629_v15  }
 0x8b0   : > { %v4782_v58 = vpop.eup %4781  ;;  %v2552_v1 = vpop.xlane.xlu1 %2551 }
 0x8b1   : > { %v2635_v25 = vmul.f32 %v4782_v58, %v7540_v23 }
 0x8b2   : > { %v2566_v20 = vpop.xlane.xlu0 %2565 }
 0x8b3   : > { %4789 = vrcp.f32 %v2566_v20  ;;  %2725 = vperm.xlu0 %4357, %v2635_v25  }
 0x8b4   : > { %v4784_v40 = vpop.eup %4783  ;;  %4791 = vrcp.f32 %v6661_v42  ;;  %v2548_v48 = vpop.xlane.xlu1 %2547 }
 0x8b5   : > { %v2633_v16 = vmul.f32 %v4784_v40, %v7540_v23  ;;  %4793 = vrcp.f32 %v2544_v38  ;;  %v4786_v15 = vpop.eup %4785 }
 0x8b6   : > { %v6876_v44 = vpop.xlane.xlu0 %2561  ;;  %v3380_v20 = vmul.f32 %v4786_v15, %v7519_v36  ;;  %v4788_v25 = vpop.eup %4787 }
 0x8b7   : > { %2715 = vperm.xlu0 %4357, %v2633_v16   ;;  %v3364_v16 = vmul.f32 %v4788_v25, %v7519_v36 }
 0x8b8   : > { %v6878_v11 = vpop.xlane.xlu1 %2559 }
 0x8ba   : > { %v2574_v41 = vpop.xlane.xlu0 %2573 }
 0x8bb   : > { %4795 = vrcp.f32 %v2574_v41 }
 0x8bc   : > { %4797 = vrcp.f32 %v2540_v18  ;;  %v6880_v58 = vpop.xlane.xlu1 %2555 }
 0x8be   : > { %3514 = vperm.xlu1 %4358, %v3380_v20   ;;  %v2570_v42 = vpop.xlane.xlu0 %2569 }
 0x8bf   : > { %4799 = vrcp.f32 %v2570_v42 }
 0x8c0   : > { %v4790_v30 = vpop.eup %4789  ;;  %4801 = vrcp.f32 %v2552_v1  ;;  %v2568_v40 = vpop.xlane.xlu1 %2567 }
 0x8c1   : > { %v4792_v38 = vpop.eup %4791  ;;  %v2643_v10 = vmul.f32 %v4790_v30, %v7540_v23 }
 0x8c2   : > { %3434 = vperm.xlu1 %4358, %v3364_v16   ;;  %v2582_v43 = vpop.xlane.xlu0 %2581  ;;  %v3378_v15 = vmul.f32 %v4792_v38, %v7519_v36  ;;  %v4794_v41 = vpop.eup %4793 }
 0x8c3   : > { %4803 = vrcp.f32 %v2582_v43  ;;  %2765 = vperm.xlu0 %4357, %v2643_v10   ;;  %v2632_v25 = vmul.f32 %v4794_v41, %v7540_v23 }
 0x8c4   : > { %4805 = vrcp.f32 %v2548_v48  ;;  %v6885_v18 = vpop.xlane.xlu1 %2563 }
 0x8c5   : > { %4807 = vrcp.f32 %v6849_v60 }
 0x8c6   : > { %3504 = vperm.xlu1 %4358, %v3378_v15   ;;  %4809 = vrcp.f32 %v2568_v40 }
 0x8c8   : > { %v4796_v1 = vpop.eup %4795  ;;  %v2576_v20 = vpop.xlane.xlu1 %2575 }
 0x8c9   : > { %v4798_v42 = vpop.eup %4797  ;;  %v2647_v30 = vmul.f32 %v4796_v1, %v7540_v23  ;;  %4811 = vrcp.f32 %v2576_v20 }
 0x8ca   : > { %2710 = vperm.xlu1 %4358, %v2632_v25   ;;  %v2630_v43 = vmul.f32 %v4798_v42, %v7540_v23 }
 0x8cb   : > { %2785 = vperm.xlu0 %4357, %v2647_v30  }
 0x8cc   : > { %v4800_v10 = vpop.eup %4799  ;;  %v2572_v16 = vpop.xlane.xlu1 %2571 }
 0x8cd   : > { %v4802_v48 = vpop.eup %4801  ;;  %v2645_v38 = vmul.f32 %v4800_v10, %v7540_v23  ;;  %4813 = vrcp.f32 %v2572_v16 }
 0x8ce   : > { %2700 = vperm.xlu1 %4358, %v2630_v43   ;;  %v2636_v40 = vmul.f32 %v4802_v48, %v7540_v23 }
 0x8cf   : > { %2775 = vperm.xlu0 %4357, %v2645_v38   ;;  %v6900_v38 = vpop.permute.xlu0 %3519 }
 0x8d0   : > { %v4804_v60 = vpop.eup %4803 }
 0x8d1   : > { %v4806_v15 = vpop.eup %4805  ;;  %v2651_v41 = vmul.f32 %v4804_v60, %v7540_v23 }
 0x8d2   : > { %v4808_v1 = vpop.eup %4807  ;;  %2730 = vperm.xlu1 %4358, %v2636_v40   ;;  %v2634_v20 = vmul.f32 %v4806_v15, %v7540_v23  ;;  %v6903_v40 = vpop.permute.xlu1 %3524 }
 0x8d3   : > { %2805 = vperm.xlu0 %4357, %v2651_v41   ;;  %v4810_v25 = vpop.eup %4809  ;;  %v2627_v42 = vmul.f32 %v4808_v1, %v7540_v23 }
 0x8d4   : > { %v2644_v30 = vmul.f32 %v4810_v25, %v7540_v23 }
 0x8d6   : > { %2720 = vperm.xlu1 %4358, %v2634_v20   ;;  %v4812_v10 = vpop.eup %4811 }
 0x8d7   : > { %2685 = vperm.xlu0 %4357, %v2627_v42   ;;  %v2648_v43 = vmul.f32 %v4812_v10, %v7540_v23 }
 0x8da   : > { %2770 = vperm.xlu1 %4358, %v2644_v30   ;;  %v4814_v48 = vpop.eup %4813 }
 0x8db   : > { %v2646_v16 = vmul.f32 %v4814_v48, %v7540_v23 }
 0x8de   : > { %2790 = vperm.xlu1 %4358, %v2648_v43  }
 0x8e2   : > { %2780 = vperm.xlu1 %4358, %v2646_v16  }
 0x8f7   : > { %v2578_v60 = vpop.xlane.xlu0 %2577 }
 0x8f8   : > { %4815 = vrcp.f32 %v2578_v60 }
 0x8f9   : > { %4817 = vrcp.f32 %v6663_v61 }
 0x8fa   : > { %4819 = vrcp.f32 %v6876_v44 }
 0x8fb   : > { %4821 = vrcp.f32 %v6667_v47 }
 0x901   : > { %v2584_v15 = vpop.xlane.xlu1 %2583 }
 0x902   : > { %4823 = vrcp.f32 %v2584_v15 }
 0x903   : > { %4825 = vrcp.f32 %v6858_v54  ;;  %v3440_v54 = vpop.permute.xlu0 %3439 }
 0x904   : > { %4827 = vrcp.f32 %v6852_v8 }
 0x905   : > { %v4816_v41 = vpop.eup %4815  ;;  %4829 = vrcp.f32 %v6671_v5 }
 0x906   : > { %v2649_v1 = vmul.f32 %v4816_v41, %v7540_v23  ;;  %v4818_v20 = vpop.eup %4817  ;;  %4831 = vrcp.f32 %v6863_v50 }
 0x907   : > { %v3361_v61 = vmul.f32 %v4818_v20, %v7519_v36  ;;  %v4820_v25 = vpop.eup %4819  ;;  %4833 = vrcp.f32 %v6675_v53  ;;  %v6919_v50 = vpop.permute.xlu0 %3509 }
 0x908   : > { %2795 = vperm.xlu0 %4357, %v2649_v1   ;;  %v4822_v44 = vpop.eup %4821  ;;  %v2641_v47 = vmul.f32 %v4820_v25, %v7540_v23  ;;  %4835 = vrcp.f32 %v6843_v13 }
 0x909   : > { %v3375_v5 = vmul.f32 %v4822_v44, %v7519_v36  ;;  %4837 = vrcp.f32 %v6679_v29 }
 0x90a   : > { %4839 = vrcp.f32 %v6870_v55 }
 0x90b   : > { %v3430_v15 = vpop.permute.xlu0 %3429  ;;  %4841 = vrcp.f32 %v6683_v9 }
 0x90c   : > { %3419 = vperm.xlu0 %4357, %v3361_v61   ;;  %4843 = vrcp.f32 %v6846_v45 }
 0x90d   : > { %4845 = vrcp.f32 %v6687_v35 }
 0x90f   : > { %v4824_v42 = vpop.eup %4823  ;;  %v3500_v13 = vpop.permute.xlu0 %3499 }
 0x910   : > { %2755 = vperm.xlu0 %4357, %v2641_v47   ;;  %v2652_v8 = vmul.f32 %v4824_v42, %v7540_v23  ;;  %v4826_v30 = vpop.eup %4825  ;;  %v3557_v47 = vmul.f32 %v6424_v12, %v3440_v54 }
 0x911   : > { %v4828_v10 = vpop.eup %4827  ;;  %v2628_v43 = vmul.f32 %v4826_v30, %v7540_v23 }
 0x912   : > { %2810 = vperm.xlu1 %4358, %v2652_v8   ;;  %v2625_v48 = vmul.f32 %v4828_v10, %v7540_v23  ;;  %v4830_v16 = vpop.eup %4829 }
 0x913   : > { %v3359_v53 = vmul.f32 %v4830_v16, %v7519_v36  ;;  %v4832_v60 = vpop.eup %4831 }
 0x914   : > { %3489 = vperm.xlu0 %4357, %v3375_v5   ;;  %v2639_v41 = vmul.f32 %v4832_v60, %v7540_v23  ;;  %v4834_v1 = vpop.eup %4833  ;;  %v7541_v5 = vld [vmem:[#allocation69_spill] sm:$0xff] }
 0x915   : > { %v3373_v20 = vmul.f32 %v4834_v1, %v7519_v36  ;;  %v4836_v61 = vpop.eup %4835  ;;  %v3555_v10 = vmul.f32 %v7541_v5, %v3430_v15 }
 0x916   : > { %2690 = vperm.xlu1 %4358, %v2628_v43   ;;  %v2623_v25 = vmul.f32 %v4836_v61, %v7540_v23  ;;  %v4838_v44 = vpop.eup %4837  ;;  %v3676_v61 = vld [vmem:[%s7192_s7] sm:$0xff] }
 0x917   : > { %v3357_v8 = vmul.f32 %v4838_v44, %v7519_v36  ;;  %v4840_v30 = vpop.eup %4839  ;;  %v7543_v44 = vld [vmem:[#allocation38_spill] sm:$0xff] }
 0x918   : > { %2675 = vperm.xlu0 %4357, %v2625_v48   ;;  %v2637_v12 = vmul.f32 %v4840_v30, %v7540_v23  ;;  %v4842_v54 = vpop.eup %4841 }
 0x919   : > { %v3371_v48 = vmul.f32 %v4842_v54, %v7519_v36  ;;  %v4844_v16 = vpop.eup %4843  ;;  %v7545_v54 = vld [vmem:[#allocation35_spill] sm:$0xff] }
 0x91a   : > { %v2621_v60 = vmul.f32 %v4844_v16, %v7540_v23  ;;  %v4846_v15 = vpop.eup %4845 }
 0x91c   : > { %3409 = vperm.xlu0 %4357, %v3359_v53  }
 0x920   : > { %2745 = vperm.xlu0 %4357, %v2639_v41  }
 0x924   : > { %3479 = vperm.xlu0 %4357, %v3373_v20   ;;  %v3355_v20 = vmul.f32 %v4846_v15, %v7519_v36  ;;  %v7547_v15 = vld [vmem:[#allocation65_spill] sm:$0xff] }
 0x926   : > { %v2706_v29 = vpop.permute.xlu0 %2705 }
 0x927   : > { %v2823_v55 = vmul.f32 %v6736_v34, %v2706_v29  ;;  %v3445_v34 = vpop.permute.xlu1 %3444 }
 0x928   : > { %2665 = vperm.xlu0 %4357, %v2623_v25  }
 0x929   : > { %v6932_v42 = vadd.f32 %v3557_v47, %v2823_v55  ;;  %v3569_v47 = vmul.f32 %v7543_v44, %v3500_v13 }
 0x92a   : > { %v2696_v9 = vpop.permute.xlu0 %2695 }
 0x92b   : > { %v2821_v45 = vmul.f32 %v6744_v56, %v2696_v9  ;;  %v7542_v56 = vld [vmem:[#allocation62_spill] sm:$0xff]  ;;  %v7544_v9 = vld [vmem:[#allocation24_spill] sm:$0xff] }
 0x92c   : > { %3399 = vperm.xlu0 %4357, %v3357_v8  }
 0x92d   : > { %v6938_v43 = vadd.f32 %v3555_v10, %v2821_v45 }
 0x92e   : > { %v6942_v35 = vpop.permute.xlu0 %2725 }
 0x930   : > { %2735 = vperm.xlu0 %4357, %v2637_v12  }
 0x932   : > { %v2716_v41 = vpop.permute.xlu0 %2715 }
 0x934   : > { %3469 = vperm.xlu0 %4357, %v3371_v48   ;;  %v3558_v48 = vmul.f32 %v7545_v54, %v3445_v34  ;;  %v7551_v54 = vld [vmem:[#allocation56_spill] sm:$0xff] }
 0x936   : > { %v2580_v53 = vpop.xlane.xlu1 %2579 }
 0x937   : > { %4847 = vrcp.f32 %v2580_v53 }
 0x938   : > { %2655 = vperm.xlu0 %4357, %v2621_v60   ;;  %4849 = vrcp.f32 %v7542_v56 }
 0x939   : > { %4851 = vrcp.f32 %v6885_v18 }
 0x93a   : > { %v6946_v1 = vpop.permute.xlu1 %3514  ;;  %4853 = vrcp.f32 %v7544_v9 }
 0x93b   : > { %4855 = vrcp.f32 %v6860_v3  ;;  %v3571_v3 = vmul.f32 %v7547_v15, %v6919_v50 }
 0x93c   : > { %3389 = vperm.xlu0 %4357, %v3355_v20  }
 0x93e   : > { %v3435_v29 = vpop.permute.xlu1 %3434  ;;  %v2766_v25 = vpop.permute.xlu0 %2765 }
 0x93f   : > { %v2835_v55 = vmul.f32 %v6784_v7, %v2766_v25  ;;  %v7546_v7 = vld [vmem:[#allocation51_spill] sm:$0xff] }
 0x940   : > { %3680 = vperm.xlu0 %4357, %v3676_v61   ;;  %4857 = vrcp.f32 %v7546_v7  ;;  %v7548_v61 = vld [vmem:[#allocation54_spill] sm:$0xff]  ;;  %v7553_v7 = vld [vmem:[#allocation36_spill] sm:$0xff] }
 0x941   : > { %v6956_v8 = vadd.f32 %v3569_v47, %v2835_v55  ;;  %v3556_v25 = vmul.f32 %v7548_v61, %v3435_v29  ;;  %4859 = vrcp.f32 %v6878_v11 }
 0x942   : > { %v3505_v30 = vpop.permute.xlu1 %3504 }
 0x944   : > { %v4848_v5 = vpop.eup %4847 }
 0x945   : > { %v2650_v18 = vmul.f32 %v4848_v5, %v7540_v23  ;;  %v4850_v10 = vpop.eup %4849 }
 0x946   : > { %v2711_v45 = vpop.permute.xlu1 %2710  ;;  %v2786_v12 = vpop.permute.xlu0 %2785  ;;  %v3362_v53 = vmul.f32 %v4850_v10, %v7519_v36 }
 0x947   : > { %v2824_v13 = vmul.f32 %v6764_v19, %v2711_v45  ;;  %2800 = vperm.xlu1 %4358, %v2650_v18   ;;  %v4852_v60 = vpop.eup %4851  ;;  %v7549_v18 = vld [vmem:[#allocation74_spill] sm:$0xff] }
 0x948   : > { %v2642_v50 = vmul.f32 %v4852_v60, %v7540_v23  ;;  %v4854_v9 = vpop.eup %4853  ;;  %4861 = vrcp.f32 %v7549_v18  ;;  %v7550_v45 = vld [vmem:[#allocation22_spill] sm:$0xff] }
 0x949   : > { %v6963_v16 = vadd.f32 %v3558_v48, %v2824_v13  ;;  %v4856_v11 = vpop.eup %4855  ;;  %v3559_v48 = vmul.f32 %v7551_v54, %v7550_v45  ;;  %v7552_v13 = vld [vmem:[#allocation49_spill] sm:$0xff]  ;;  %4863 = vrcp.f32 %v6854_v14  ;;  %v2839_v14 = vmul.f32 %v6798_v0, %v2786_v12 }
 0x94a   : > { %v2701_v56 = vpop.permute.xlu1 %2700  ;;  %v2776_v20 = vpop.permute.xlu0 %2775 }
 0x94b   : > { %v3616_v34 = vpack.c.bf16 %v6963_v16, %v6932_v42  ;;  %v2822_v19 = vmul.f32 %v6772_v37, %v2701_v56  ;;  %v2837_v44 = vmul.f32 %v6805_v24, %v2776_v20  ;;  %3424 = vperm.xlu1 %4358, %v3362_v53   ;;  %v2825_v37 = vmul.f32 %v6760_v52, %v2716_v41  ;;  %v7554_v20 = vld [vmem:[#allocation30_spill] sm:$0xff]  ;;  %v7575_v16 = vld [vmem:[#allocation23_spill] sm:$0xff] }
 0x94c   : > { %v3376_v24 = vmul.f32 %v4854_v9, %v7519_v36  ;;  %v3560_v53 = vmul.f32 %v7553_v7, %v7552_v13  ;;  %v2626_v52 = vmul.f32 %v4856_v11, %v7540_v23  ;;  %v3570_v61 = vmul.f32 %v7554_v20, %v3505_v30  ;;  %v7557_v30 = vld [vmem:[#allocation70_spill] sm:$0xff]  ;;  %v7559_v7 = vld [vmem:[#allocation68_spill] sm:$0xff] }
 0x94d   : > { %v6974_v47 = vadd.f32 %v3556_v25, %v2822_v19  ;;  %v6976_v55 = vadd.f32 %v3571_v3, %v2837_v44  ;;  %v6992_v15 = vadd.f32 %v3559_v48, %v2825_v37  ;;  %v4858_v41 = vpop.eup %4857  ;;  %v7556_v37 = vld [vmem:[#allocation32_spill] sm:$0xff]  ;;  %v3574_v11 = vmul.f32 %v7557_v30, %v6903_v40 }
 0x94e   : > { %v6979_v5 = vpop.permute.xlu1 %2730  ;;  %v4860_v9 = vpop.eup %4859 }
 0x94f   : > { %v3615_v29 = vpack.c.bf16 %v6974_v47, %v6938_v43  ;;  %2760 = vperm.xlu1 %4358, %v2642_v50   ;;  %v3360_v50 = vmul.f32 %v4858_v41, %v7519_v36  ;;  %v2640_v45 = vmul.f32 %v4860_v9, %v7540_v23  ;;  %v7560_v41 = vld [vmem:[#allocation59_spill] sm:$0xff]  ;;  %v2828_v30 = vmul.f32 %v6780_v46, %v6979_v5 }
 0x952   : > { %v2721_v10 = vpop.permute.xlu1 %2720 }
 0x953   : > { %v2826_v60 = vmul.f32 %v6788_v51, %v2721_v10  ;;  %3494 = vperm.xlu1 %4358, %v3376_v24   ;;  %v7555_v51 = vld [vmem:[#allocation52_spill] sm:$0xff]  ;;  %v3573_v24 = vmul.f32 %v7556_v37, %v6900_v38  ;;  %v7558_v38 = vld [vmem:[#allocation27_spill] sm:$0xff] }
 0x954   : > { %4865 = vrcp.f32 %v7555_v51  ;;  %v3572_v13 = vmul.f32 %v7558_v38, %v6946_v1  ;;  %v7042_v37 = vld [vmem:[%s5202_s29 + $0x8] sm:$0xff]   ;;  %v7564_v38 = vld [vmem:[#allocation16_spill] sm:$0xff] }
 0x955   : > { %v6994_v3 = vadd.f32 %v3560_v53, %v2826_v60  ;;  %4867 = vrcp.f32 %v6880_v58  ;;  %v7014_v0 = vadd.f32 %v3573_v24, %v2839_v14  ;;  %v4862_v54 = vpop.eup %4861  ;;  %4133 = vmatprep.mubr.bf16.mxu1 %v7042_v37  ;;  %v2806_v24 = vpop.permute.xlu0 %2805 }
 0x956   : > { %v2771_v56 = vpop.permute.xlu1 %2770  ;;  %4869 = vrcp.f32 %v7559_v7  ;;  %v3374_v53 = vmul.f32 %v4862_v54, %v7519_v36  ;;  %v4864_v60 = vpop.eup %4863  ;;  %v7566_v7 = vld [vmem:[#allocation57_spill] sm:$0xff] }
 0x957   : > { %v3617_v25 = vpack.c.bf16 %v6994_v3, %v6992_v15  ;;  %v2836_v19 = vmul.f32 %v6808_v63, %v2771_v56  ;;  %2680 = vperm.xlu1 %4358, %v2626_v52   ;;  %4871 = vrcp.f32 %v6856_v27  ;;  %v2624_v1 = vmul.f32 %v4864_v60, %v7540_v23  ;;  %v7572_v15 = vld [vmem:[#allocation50_spill] sm:$0xff] }
 0x958   : > { %4873 = vrcp.f32 %v7560_v41 }
 0x959   : > { %v7003_v44 = vadd.f32 %v3570_v61, %v2836_v19 }
 0x95a   : > { %v2791_v18 = vpop.permute.xlu1 %2790 }
 0x95b   : > { %v2840_v10 = vmul.f32 %v6818_v33, %v2791_v18  ;;  %3414 = vperm.xlu1 %4358, %v3360_v50   ;;  %v3622_v63 = vpack.c.bf16 %v7003_v44, %v6956_v8  ;;  %v3677_v18 = vld [vmem:[%s7192_s7 + $0x8] sm:$0xff]  ;;  %v7579_v44 = vld [vmem:[#allocation75_spill] sm:$0xff] }
 0x95d   : > { %v7016_v12 = vadd.f32 %v3574_v11, %v2840_v10  ;;  %v7561_v11 = vld [vmem:[#allocation60_spill] sm:$0xff]  ;;  %v7562_v10 = vld [vmem:[#allocation21_spill] sm:$0xff] }
 0x95e   : > { %v2781_v48 = vpop.permute.xlu1 %2780 }
 0x95f   : > { %v2838_v40 = vmul.f32 %v6821_v22, %v2781_v48  ;;  %2750 = vperm.xlu1 %4358, %v2640_v45   ;;  %v3624_v33 = vpack.c.bf16 %v7016_v12, %v7014_v0  ;;  %v3562_v45 = vmul.f32 %v7562_v10, %v7561_v11  ;;  %v7563_v48 = vld [vmem:[#allocation58_spill] sm:$0xff] }
 0x960   : > { %v7571_v11 = vld [vmem:[#allocation66_spill] sm:$0xff] }
 0x961   : > { %v7025_v58 = vadd.f32 %v3572_v13, %v2838_v40  ;;  %v4866_v22 = vpop.eup %4865  ;;  %v3577_v13 = vmul.f32 %v7564_v38, %v7563_v48  ;;  %v7565_v40 = vld [vmem:[#allocation80_spill] sm:$0xff]  ;;  %v3594_v5 = vadd.f32 %v3562_v45, %v2828_v30  ;;  %v7570_v30 = vld [vmem:[#allocation55_spill] sm:$0xff]  ;;  %v3576_v10 = vmul.f32 %v7571_v11, %v6708_v49 }
 0x962   : > { %v3358_v56 = vmul.f32 %v4866_v22, %v7519_v36  ;;  %v4868_v20 = vpop.eup %4867  ;;  %v7568_v22 = vld [vmem:[#allocation28_spill] sm:$0xff]  ;;  %v7581_v11 = vld [vmem:[#allocation71_spill] sm:$0xff] }
 0x963   : > { %3484 = vperm.xlu1 %4358, %v3374_v53   ;;  %v3623_v52 = vpack.c.bf16 %v7025_v58, %v6976_v55  ;;  %v2638_v61 = vmul.f32 %v4868_v20, %v7540_v23  ;;  %v4870_v19 = vpop.eup %4869  ;;  %v3578_v53 = vmul.f32 %v7566_v7, %v7565_v40 }
 0x964   : > { %v3372_v51 = vmul.f32 %v4870_v19, %v7519_v36  ;;  %v4872_v14 = vpop.eup %4871 }
 0x965   : > { %v2622_v27 = vmul.f32 %v4872_v14, %v7540_v23  ;;  %v4874_v50 = vpop.eup %4873  ;;  %v2843_v23 = vmul.f32 %v6811_v59, %v2806_v24  ;;  %v7569_v24 = vld [vmem:[#allocation67_spill] sm:$0xff] }
 0x966   : > { %v3356_v9 = vmul.f32 %v4874_v50, %v7519_v36  ;;  %v2827_v36 = vmul.f32 %v6752_v17, %v6942_v35  ;;  %v2686_v17 = vpop.permute.xlu0 %2685 }
 0x967   : > { %2670 = vperm.xlu1 %4358, %v2624_v1   ;;  %v7567_v1 = vld [vmem:[#allocation77_spill] sm:$0xff]  ;;  %v3609_v59 = vadd.f32 %v3577_v13, %v2843_v23  ;;  %v3575_v23 = vmul.f32 %v7570_v30, %v7569_v24  ;;  %v2819_v58 = vmul.f32 %v6723_v39, %v2686_v17  ;;  %v7580_v30 = vld [vmem:[#allocation64_spill] sm:$0xff] }
 0x968   : > { %v3561_v46 = vmul.f32 %v7568_v22, %v7567_v1  ;;  %v7574_v1 = vld [vmem:[#allocation72_spill] sm:$0xff] }
 0x96b   : > { %3404 = vperm.xlu1 %4358, %v3358_v56   ;;  %v3593_v56 = vadd.f32 %v3561_v46, %v2827_v36 }
 0x96f   : > { %2740 = vperm.xlu1 %4358, %v2638_v61   ;;  %v3618_v61 = vpack.c.bf16 %v3594_v5, %v3593_v56  ;;  %v7577_v56 = vld [vmem:[#allocation48_spill] sm:$0xff] }
 0x973   : > { %3474 = vperm.xlu1 %4358, %v3372_v51  }
 0x977   : > { %2660 = vperm.xlu1 %4358, %v2622_v27  }
 0x97b   : > { %3394 = vperm.xlu1 %4358, %v3356_v9  }
 0x97f   : > { %3685 = vperm.xlu1 %4358, %v3677_v18  }
 0x983   : > { %v2796_v35 = vpop.permute.xlu0 %2795 }
 0x987   : > { %v3420_v19 = vpop.permute.xlu0 %3419 }
 0x988   : > { %v3553_v0 = vmul.f32 %v7574_v1, %v3420_v19 }
 0x98a   : > { %v3585_v46 = vadd.f32 %v3553_v0, %v2819_v58  ;;  %v7590_v58 = vld [vmem:[#allocation40_spill] sm:$0xff] }
 0x98b   : > { %v2756_v51 = vpop.permute.xlu0 %2755 }
 0x98c   : > { %v2833_v22 = vmul.f32 %v6791_v26, %v2756_v51 }
 0x98d   : > { %v2811_v54 = vpop.permute.xlu1 %2810 }
 0x98e   : > { %v2844_v60 = vmul.f32 %v6834_v2, %v2811_v54  ;;  %v2841_v2 = vmul.f32 %v6829_v31, %v2796_v35 }
 0x98f   : > { %v3490_v14 = vpop.permute.xlu0 %3489 }
 0x990   : > { %v3610_v41 = vadd.f32 %v3578_v53, %v2844_v60  ;;  %v3607_v36 = vadd.f32 %v3575_v23, %v2841_v2 }
 0x991   : > { %v2691_v50 = vpop.permute.xlu1 %2690 }
 0x992   : > { %v3626_v20 = vpack.c.bf16 %v3610_v41, %v3609_v59  ;;  %v2820_v12 = vmul.f32 %v6748_v62, %v2691_v50 }
 0x993   : > { %v2676_v27 = vpop.permute.xlu0 %2675 }
 0x994   : > { %4117 = vmatprep.subr.bf16.mxu1 %v3626_v20  ;;  %v2817_v17 = vmul.f32 %v6728_v21, %v2676_v27  ;;  %v7583_v21 = vld [vmem:[#allocation42_spill] sm:$0xff] }
 0x995   : > { %4118 = vmatpush3.bf16.xpose.msra.mxu1 %v3618_v61  ;;  %v7578_v61 = vld [vmem:[#allocation34_spill] sm:$0xff] }
 0x997   : > { %v3410_v9 = vpop.permute.xlu0 %3409 }
 0x998   : > { %v3551_v35 = vmul.f32 %v7578_v61, %v3410_v9  ;;  %v551_v61 = vld [vmem:[%s7191_s6 + $0x8] sm:$0xff] }
 0x99a   : > { %v3583_v50 = vadd.f32 %v3551_v35, %v2817_v17  ;;  %v7594_v35 = vld [vmem:[#allocation76_spill] sm:$0xff] }
 0x99b   : > { %v2746_v13 = vpop.permute.xlu0 %2745 }
 0x99c   : > { %v2831_v51 = vmul.f32 %v6768_v6, %v2746_v13 }
 0x99f   : > { %v3480_v40 = vpop.permute.xlu0 %3479 }
 0x9c2   : > { %v2801_v18 = vpop.permute.xlu1 %2800 }
 0x9c3   : > { %v2842_v45 = vmul.f32 %v6865_v28, %v2801_v18  ;;  %v2666_v28 = vpop.permute.xlu0 %2665 }
 0x9c4   : > { %v2815_v27 = vmul.f32 %v7583_v21, %v2666_v28  ;;  %v7588_v28 = vld [vmem:[#allocation73_spill] sm:$0xff] }
 0x9c5   : > { %v3608_v54 = vadd.f32 %v3576_v10, %v2842_v45  ;;  %v7582_v45 = vld [vmem:[#allocation26_spill] sm:$0xff] }
 0x9c6   : > { %v3425_v48 = vpop.permute.xlu1 %3424 }
 0x9c7   : > { %v3625_v38 = vpack.c.bf16 %v3608_v54, %v3607_v36  ;;  %v3554_v3 = vmul.f32 %v7572_v15, %v3425_v48  ;;  %v7584_v48 = vld [vmem:[#allocation19_spill] sm:$0xff] }
 0x9c8   : > { %v7587_v15 = vld [vmem:[#allocation31_spill] sm:$0xff] }
 0x9c9   : > { %4119 = vmatprep.subr.bf16.mxu1 %v3625_v38 }
 0x9ca   : > { %4120 = vmatpush3.bf16.xpose.msra.mxu1 %v3617_v25  ;;  %v2761_v31 = vpop.permute.xlu1 %2760  ;;  %v7573_v25 = vld [vmem:[#allocation33_spill] sm:$0xff] }
 0x9cb   : > { %4121 = vmatprep.subr.bf16.mxu1 %v3624_v33  ;;  %v3400_v33 = vpop.permute.xlu0 %3399  ;;  %v2834_v55 = vmul.f32 %v6814_v4, %v2761_v31 }
 0x9cc   : > { %v3549_v10 = vmul.f32 %v7581_v11, %v3400_v33  ;;  %v4879_v11 = vld [vmem:[%s5217_s17 + $0x18] sm:$0xff] }
 0x9ce   : > { %v3495_v7 = vpop.permute.xlu1 %3494  ;;  %v3581_v13 = vadd.f32 %v3549_v10, %v2815_v27 }
 0x9cf   : > { %v3568_v60 = vmul.f32 %v7573_v25, %v3495_v7  ;;  %v2736_v43 = vpop.permute.xlu0 %2735 }
 0x9d1   : > { %v3600_v62 = vadd.f32 %v3568_v60, %v2834_v55 }
 0x9d2   : > { %4122 = vmatpush3.bf16.xpose.msra.mxu1 %v3616_v34  ;;  %v2681_v49 = vpop.permute.xlu1 %2680  ;;  %v3567_v34 = vmul.f32 %v7575_v16, %v3490_v14 }
 0x9d3   : > { %4123 = vmatprep.subr.bf16.mxu1 %v3623_v52  ;;  %v3586_v52 = vadd.f32 %v3554_v3, %v2820_v12  ;;  %v2818_v8 = vmul.f32 %v6756_v32, %v2681_v49  ;;  %v3470_v2 = vpop.permute.xlu0 %3469  ;;  %v7586_v49 = vld [vmem:[#allocation37_spill] sm:$0xff] }
 0x9d4   : > { %v3599_v59 = vadd.f32 %v3567_v34, %v2833_v22  ;;  %v3563_v38 = vmul.f32 %v7584_v48, %v3470_v2  ;;  %v7589_v34 = vld [vmem:[#allocation82_spill] sm:$0xff]  ;;  %v7591_v22 = vld [vmem:[#allocation45_spill] sm:$0xff] }
 0x9d5   : > { %v3614_v47 = vpack.c.bf16 %v3586_v52, %v3585_v46 }
 0x9d6   : > { %v3415_v53 = vpop.permute.xlu1 %3414  ;;  %v3621_v4 = vpack.c.bf16 %v3600_v62, %v3599_v59 }
 0x9d7   : > { %v2656_v54 = vpop.permute.xlu0 %2655 }
 0x9d8   : > { %v2813_v55 = vmul.f32 %v7589_v34, %v2656_v54 }
 0x9da   : > { %4124 = vmatpush3.bf16.xpose.msra.mxu1 %v3615_v29  ;;  %v2751_v42 = vpop.permute.xlu1 %2750  ;;  %v7576_v29 = vld [vmem:[#allocation47_spill] sm:$0xff] }
 0x9db   : > { %4125 = vmatprep.subr.bf16.mxu1 %v3622_v63  ;;  %v3552_v41 = vmul.f32 %v7576_v29, %v3415_v53  ;;  %v3565_v63 = vmul.f32 %v7579_v44, %v3480_v40  ;;  %v2832_v26 = vmul.f32 %v6795_v57, %v2751_v42  ;;  %v7585_v40 = vld [vmem:[#allocation79_spill] sm:$0xff]  ;;  %v3390_v0 = vpop.permute.xlu0 %3389 }
 0x9dc   : > { %v2829_v7 = vmul.f32 %v7585_v40, %v2736_v43  ;;  %v3547_v42 = vmul.f32 %v7588_v28, %v3390_v0  ;;  %v5028_v43 = vmov 0.0  }
 0x9dd   : > { %v3584_v19 = vadd.f32 %v3552_v41, %v2818_v8  ;;  %v3597_v24 = vadd.f32 %v3565_v63, %v2831_v51  ;;  %3759 = vmatprep.mubr.f32.mxu0 %v5028_v43  ;;  %v7595_v8 = vld [vmem:[#allocation63_spill] sm:$0xff] }
 0x9de   : > { %v3485_v5 = vpop.permute.xlu1 %3484  ;;  %v3595_v60 = vadd.f32 %v3563_v38, %v2829_v7  ;;  %v3579_v46 = vadd.f32 %v3547_v42, %v2813_v55 }
 0x9df   : > { %v3566_v20 = vmul.f32 %v7577_v56, %v3485_v5  ;;  %v3613_v9 = vpack.c.bf16 %v3584_v19, %v3583_v50  ;;  %v4876_v50 = vld [vmem:[%s5217_s17] sm:$0xff] }
 0x9e1   : > { %v3598_v14 = vadd.f32 %v3566_v20, %v2832_v26  ;;  %v7592_v20 = vld [vmem:[#allocation78_spill] sm:$0xff] }
 0x9e2   : > { %4126 = vmatpush3.bf16.xpose.msra.mxu1 %v3614_v47  ;;  %v2671_v39 = vpop.permute.xlu1 %2670 }
 0x9e3   : > { %4127 = vmatprep.subr.bf16.mxu1 %v3621_v4  ;;  %v3620_v23 = vpack.c.bf16 %v3598_v14, %v3597_v24  ;;  %v2816_v36 = vmul.f32 %v7582_v45, %v2671_v39  ;;  %v550_v4 = vld [vmem:[%s7191_s6] sm:$0xff]  ;;  %v3681_v39 = vpop.permute.xlu0 %3680 }
 0x9e6   : > { %v3405_v18 = vpop.permute.xlu1 %3404 }
 0x9e7   : > { %v3550_v32 = vmul.f32 %v7580_v30, %v3405_v18  ;;  %v4877_v18 = vld [vmem:[%s5217_s17 + $0x10] sm:$0xff] }
 0x9e9   : > { %v3582_v6 = vadd.f32 %v3550_v32, %v2816_v36  ;;  %v4878_v32 = vld [vmem:[%s5217_s17 + $0x8] sm:$0xff] }
 0x9ea   : > { %4128 = vmatpush3.bf16.xpose.msra.mxu1 %v3613_v9  ;;  %v2741_v57 = vpop.permute.xlu1 %2740 }
 0x9eb   : > { %4129 = vmatprep.subr.bf16.mxu1 %v3620_v23  ;;  %v2830_v53 = vmul.f32 %v7586_v49, %v2741_v57  ;;  %v3612_v25 = vpack.c.bf16 %v3582_v6, %v3581_v13 }
 0x9ee   : > { %v3475_v31 = vpop.permute.xlu1 %3474 }
 0x9ef   : > { %v3564_v3 = vmul.f32 %v7587_v15, %v3475_v31 }
 0x9f1   : > { %v3596_v1 = vadd.f32 %v3564_v3, %v2830_v53 }
 0x9f2   : > { %4130 = vmatpush3.bf16.xpose.msra.mxu1 %v3612_v25  ;;  %v2661_v12 = vpop.permute.xlu1 %2660 }
 0x9f3   : > { %v3619_v33 = vpack.c.bf16 %v3596_v1, %v3595_v60  ;;  %v2814_v52 = vmul.f32 %v7590_v58, %v2661_v12 }
 0x9f5   : > { %4131 = vmatprep.subr.bf16.mxu1 %v3619_v33 }
 0x9f6   : > { %v3395_v16 = vpop.permute.xlu1 %3394 }
 0x9f7   : > { %v3548_v62 = vmul.f32 %v7591_v22, %v3395_v16 }
 0x9f9   : > { %v3580_v5 = vadd.f32 %v3548_v62, %v2814_v52 }
 0x9fa   : > { %v3686_v44 = vpop.permute.xlu1 %3685 }
 0x9fb   : > { %v3611_v59 = vpack.c.bf16 %v3580_v5, %v3579_v46 }
 0x9fd   : > { %4132 = vmatpush3.bf16.xpose.msra.mxu1 %v3611_v59 }
 0xa04   : > { %4134 = vmatmul.mubr.bf16.vlgmr.msra.gmra.mxu1 %v7042_v37  ;;  %v7593_v37 = vld [vmem:[#allocation53_spill] sm:$0xff] }
 0xa05   : > { %3765 = vmatprep.mubr.f32.mxu1 %v5028_v43 }
 0xac4   : > { %v3667_v47 = vpop.f32.mrf.mxu1 }
 0xac6   : > { %v3669_v29 = vpop.f32.mrf.mxu1 }
 0xac8   : > { %v3671_v41 = vpop.f32.mrf.mxu1 }
 0xaca   : > { %v3673_v56 = vpop.f32.mrf.mxu1 }
 0xacb   : > { %3719 = vmatprep.subr.mxu0 %v3673_v56  ;;  %4271 = vmatprep.subr.mxu1 %v3673_v56 }
 0xacc   : > { %3720 = vmatpush1.msra.mxu0 %v3671_v41  ;;  %4275 = vmatpush1.msra.mxu1 %v3671_v41 }
 0xacd   : > { %3721 = vmatprep.subr.mxu0 %v3669_v29  ;;  %4272 = vmatprep.subr.mxu1 %v3669_v29 }
 0xace   : > { %3722 = vmatpush1.msra.mxu0 %v3667_v47  ;;  %4276 = vmatpush1.msra.mxu1 %v3667_v47 }
 0xacf   : > { %3723 = vmatprep.subr.mxu0 %v7592_v20  ;;  %4273 = vmatprep.subr.mxu1 %v7592_v20 }
 0xad0   : > { %3724 = vmatpush1.msra.mxu0 %v7593_v37  ;;  %4277 = vmatpush1.msra.mxu1 %v7593_v37 }
 0xad1   : > { %3725 = vmatprep.subr.mxu0 %v7594_v35  ;;  %4274 = vmatprep.subr.mxu1 %v7594_v35 }
 0xad2   : > { %3726 = vmatpush1.msra.mxu0 %v7595_v8  ;;  %4278 = vmatpush1.msra.mxu1 %v7595_v8 }
 0xad3   : > { %4020 = vmatmul.mubr.msk.f32.vlgmr.msra.gmra.mxu0 %vm3688_vm4, %v550_v4  ;;  %4021 = vmatmul.mubr.msk.f32.vlgmr.msra.gmra.mxu1 %vm3688_vm4, %v551_v61 }
 0xb93   : > { %v3761_v63 = vpop.f32.mrf.mxu0  ;;  %v3767_v26 = vpop.f32.mrf.mxu1 }
 0xb94   : > { %v3762_v17 = vadd.f32 %v3761_v63, %v3681_v39  ;;  %v3768_v19 = vadd.f32 %v3767_v26, %v3686_v44 }
 0xb95   : > { %v3763_v51 = vpop.f32.mrf.mxu0  ;;  %v3769_v14 = vpop.f32.mrf.mxu1 }
 0xb96   : > { %v3772_v2 = vadd.f32 %v4876_v50, %v3762_v17  ;;  %v3774_v24 = vadd.f32 %v4877_v18, %v3768_v19  ;;  %v3764_v9 = vadd.f32 %v3763_v51, %v3681_v39  ;;  %v3770_v30 = vadd.f32 %v3769_v14, %v3686_v44 }
 0xb98   : > { %3776 = vst [vmem:[%s416_s27] sm:$0xff] %v3772_v2  ;;  %3778 = vst [vmem:[%s416_s27 + $0x10] sm:$0xff] %v3774_v24  ;;  %v3773_v23 = vadd.f32 %v4878_v32, %v3764_v9  ;;  %v3775_v10 = vadd.f32 %v4879_v11, %v3770_v30 }
 0xb9a   : > { %3777 = vst [vmem:[%s416_s27 + $0x8] sm:$0xff] %v3773_v23  ;;  %3779 = vst [vmem:[%s416_s27 + $0x18] sm:$0xff] %v3775_v10 }
 0xb9b   : > { %4949 = shalt.err (!%p4946_p10)
}
 0xb9c   : > { %s4950_s17 = scalar_lea.hbm %s7135_s24, 512  ;;  %s4954_s12 = scalar_lea.hbm %s7193_s8, 1024 }
 0xb9d   : > { %p4951_p1 = scmp.ne.s32.totalorder %s7135_s24, %s4950_s17  ;;  %p4955_p0 = scmp.lt.s32.totalorder %s7135_s24, %s7193_s8 }
 0xb9e   : > { %p4956_p8 = scmp.lt.s32.totalorder %s4954_s12, %s4950_s17 }
 0xb9f   : > { %p4952_p13 = pnand %p4951_p1, %p5128_p9 }
 0xba0   : > { %p4957_p2 = por %p4956_p8, %p4955_p0 }
 0xba1   : > { %p4953_p3 = pneg %p4952_p13 }
 0xba3   : > { %p4958_p5 = pnand %p4957_p2, %p4953_p3 }
 0xba5   : > { %4961 = shalt.err (!%p4958_p5)
}
 0xba6   : > { %s5030_s23 = smov 256   ;;  %s5031_s27 = smov 16  }
 0xba7   : > { %4287 = dma.vmem_to_hbm [thread:$0]  (%p5128_p9), %s7129_s20, 512, %s7135_s24, %s3781_s30, %s5030_s23, %s5030_s23, %s5031_s27  }
 0xba8 PF: > { %s7596_s22 = sld [smem:[#allocation11_spill]]  ;;  %p4297_p6 = pnand %p3936_p12, %p5135_p11 }
 0xbaa   : > { %p4298_p4 = pneg %p4297_p6 }
 0xbae   : > { %s3811_s11 = sand.u32 1, %s7596_s22  }
 0xbaf   : > { %s3812_s13 = scalar_lea.sflag [#allocation4], %s3811_s11 }
 0xbb0   : > { %4995 = dma.done.wait (%p4298_p4), %s3812_s13, 512  }
 0xbb1   : > { %4997 = vsyncadd (%p4298_p4), %s3812_s13, 4294966784  ;;  %s27_s10 = sadd.s32 1, %s5020_s10   ;;  %s7598_s16 = sld [smem:[#allocation12_spill]] }
 0xbb2   : > { %p24_p7 = scmp.ge.s32.totalorder %s27_s10, 4   ;;  %s7599_s29 = sld [smem:[#allocation14_spill]] }
 0xbb3   : > { %s7600_s18 = sld [smem:[#allocation13_spill]]  ;;  %s7601_s27 = smov %s5004_s28 }
 0xbb4   : > { %s7603_s30 = smov %s5016_s9 }
 0xbb5   :  { %26 = sbr.rel (!%p24_p7) target bundleno = 10 (0xa), region = 116 }
 0xbb7   : > { %s7602_s28 = smov %s7598_s16 }
 0xbb9   : > { %s7604_s9 = smov %s7600_s18 }
 0xbba   :  { %3817 = vsyncpa [#allocation3], 1 }
 0xbbb   :  { %3819 = vsyncpa [#allocation3 + $0x1], 1 }
 0xbbc   :  { %3820 = vsyncpa [#allocation6], 1 }
 0xbbd   :  { %3822 = vsyncpa [#allocation6 + $0x1], 1 }
 0xbbe   :  { %3823 = vsyncpa [#allocation4], 1 }
 0xbbf   :  { %3825 = vsyncpa [#allocation4 + $0x1], 1 }

</bundles_post_ra>
